<compile_context>
chip_gen: v7x
topology: tpu7x:2x2x1
jax: 0.10.0
libtpu: 0.0.40
codegen_flags: <defaults>
</compile_context>

<pallas_src>
import math
import functools

import jax
import jax.numpy as jnp
from jax import lax
from jax.experimental import pallas as pl
from jax.experimental.pallas import tpu as pltpu


def _recurrent_block_kernel(
    x_ref, seg_ref,
    wy_ref, by_ref, wx_ref, bx_ref,
    cw_ref, cb_ref,
    wgx_ref, bgx_ref, wga_ref, bga_ref,
    ap_ref, wo_ref, bo_ref,
    out_ref,
    h_carry_scr, conv_carry_scr, z_scr,
    *, conv_width: int, num_heads: int, chunk: int,
):
    f32 = jnp.float32
    bf16 = jnp.bfloat16
    TT = x_ref.shape[1]
    L = by_ref.shape[1]
    bw = L // num_heads
    cw1 = conv_width - 1

    tt = pl.program_id(1)

    # New batch element starts at tt == 0: reset the cross-tile carries.
    @pl.when(tt == 0)
    def _():
        h_carry_scr[...] = jnp.zeros_like(h_carry_scr)
        conv_carry_scr[...] = jnp.zeros_like(conv_carry_scr)

    x = x_ref[0]                               # [TT, W] f32
    seg = seg_ref[0]                           # [TT, 1] int32
    x16 = x.astype(bf16)                       # bf16 operands, f32 accumulation

    # --- y branch: linear + gelu (tanh approx, matches torch approximate="tanh") ---
    y = jnp.dot(x16, wy_ref[...], preferred_element_type=f32) + by_ref[...]
    y = jax.nn.gelu(y, approximate=True)

    # --- x branch: linear ---
    xb = jnp.dot(x16, wx_ref[...], preferred_element_type=f32) + bx_ref[...]

    # --- causal depthwise temporal conv1d (zero left-pad at sequence start) ---
    # conv carry holds the last conv_width-1 xb rows of the previous T tile.
    conv_prev = conv_carry_scr[...]            # [cw1, L]
    xc = xb * cw_ref[cw1:conv_width, :]        # tap looking back 0 steps
    for k in range(1, conv_width):             # taps looking back k = 1..cw1 steps
        shifted = jnp.concatenate(
            [conv_prev[cw1 - k:, :], xb[:TT - k, :]], axis=0)
        xc = xc + shifted * cw_ref[cw1 - k:conv_width - k, :]
    xc = xc + cb_ref[...]
    conv_carry_scr[...] = xb[TT - cw1:, :]     # carry for the next tile

    # --- RG-LRU gates: block-diagonal linears, one small matmul per head ---
    xc16 = xc.astype(bf16)
    gx_parts, ga_parts = [], []
    for h in range(num_heads):                 # static unroll over heads
        xh = xc16[:, h * bw:(h + 1) * bw]
        gx_parts.append(jnp.dot(xh, wgx_ref[h], preferred_element_type=f32))
        ga_parts.append(jnp.dot(xh, wga_ref[h], preferred_element_type=f32))
    gx = gx_parts[0] if num_heads == 1 else jnp.concatenate(gx_parts, axis=1)
    ga = ga_parts[0] if num_heads == 1 else jnp.concatenate(ga_parts, axis=1)
    gate_x = jax.nn.sigmoid(gx + bgx_ref[...])
    gate_a = jax.nn.sigmoid(ga + bga_ref[...])

    ap = ap_ref[...]                           # [1, L]
    softplus_ap = jnp.maximum(ap, 0.0) + jnp.log1p(jnp.exp(-jnp.abs(ap)))
    log_a = -8.0 * gate_a * softplus_ap        # [TT, L]
    a = jnp.exp(log_a)
    a_sq = a * a                               # == exp(2*log_a); avoids 2nd EUP pass

    rst = jnp.broadcast_to((seg == 0).astype(f32), (TT, L))   # hoisted broadcast
    not_rst = 1.0 - rst
    multiplier = rst + not_rst * jnp.sqrt(1.0 - a_sq)          # gamma normalization
    normalized = xc * gate_x * multiplier
    a_masked = a * not_rst                     # reset zeroes the carry

    # --- chunked linear recurrence:  h_t = a_t * h_{t-1} + x_t ---
    # Hillis-Steele scan within each [chunk, L] tile (log2-doubling sublane shifts),
    # serial [1, L] carry across chunks and across T tiles (via h_carry_scr).
    carry = h_carry_scr[...]                   # [1, L]
    for c in range(TT // chunk):               # static unroll over chunks in the tile
        s0 = c * chunk
        A = a_masked[s0:s0 + chunk, :]
        X = normalized[s0:s0 + chunk, :]
        d = 1
        while d < chunk:
            X = X + A * jnp.concatenate(
                [jnp.zeros((d, L), f32), X[:chunk - d, :]], axis=0)
            A = A * jnp.concatenate(
                [jnp.ones((d, L), f32), A[:chunk - d, :]], axis=0)
            d *= 2
        h_chunk = X + A * carry                # [chunk, L]
        carry = h_chunk[chunk - 1:chunk, :]
        # gate with the y branch and stage (bf16) for the output projection
        z_scr[s0:s0 + chunk, :] = (h_chunk * y[s0:s0 + chunk, :]).astype(z_scr.dtype)
    h_carry_scr[...] = carry

    # --- final output projection ---
    out = jnp.dot(z_scr[...], wo_ref[...], preferred_element_type=f32) + bo_ref[...]
    out_ref[0] = out.astype(out_ref.dtype)


def recurrent_block_forward(x, segment_pos, params, *,
                            conv_width, num_heads, t_tile=128, chunk=8):
    B, T, W = x.shape
    L = params["wy"].shape[1]
    assert L % num_heads == 0
    bw = L // num_heads
    TT = min(t_tile, T)
    assert T % TT == 0 and TT % chunk == 0 and chunk % 8 == 0
    n_tt = T // TT

    f32, bf16 = jnp.float32, jnp.bfloat16
    seg3 = segment_pos.astype(jnp.int32)[..., None]            # [B, T, 1]
    row = lambda v: v.reshape(1, -1).astype(f32)

    # bf16 weights for the MXU (f32 accumulation in-kernel); biases stay f32.
    wy = params["wy"].astype(bf16)
    wx = params["wx"].astype(bf16)
    wo = params["w_out"].astype(bf16)
    wgx = params["w_gate_x"].astype(bf16)
    wga = params["w_gate_a"].astype(bf16)

    # Weight index maps are grid-invariant so Pallas only DMAs them once.
    # (pipeline_mode=pl.Buffered(1) would also single-buffer them; omitted for
    # cross-version compatibility.)
    def full(shape):
        n = len(shape)
        return pl.BlockSpec(shape, lambda b, t, _n=n: (0,) * _n)

    grid_spec = pltpu.PrefetchScalarGridSpec(
        num_scalar_prefetch=0,
        grid=(B, n_tt),
        in_specs=[
            pl.BlockSpec((1, TT, W), lambda b, t: (b, t, 0)),   # x tile
            pl.BlockSpec((1, TT, 1), lambda b, t: (b, t, 0)),   # segment_pos tile
            full((W, L)), full((1, L)),                         # linear_y
            full((W, L)), full((1, L)),                         # linear_x
            full((conv_width, L)), full((1, L)),                # conv1d
            full((num_heads, bw, bw)), full((1, L)),            # input gate (block-diag)
            full((num_heads, bw, bw)), full((1, L)),            # a gate (block-diag)
            full((1, L)),                                       # a_param
            full((L, W)), full((1, W)),                         # linear_out
        ],
        out_specs=pl.BlockSpec((1, TT, W), lambda b, t: (b, t, 0)),
        scratch_shapes=[
            pltpu.VMEM((1, L), f32),                  # RG-LRU h carry across T tiles
            pltpu.VMEM((conv_width - 1, L), f32),     # conv xb carry across T tiles
            pltpu.VMEM((TT, L), bf16),                # (h*y) staging for out matmul
        ],
    )

    kernel = functools.partial(_recurrent_block_kernel,
                               conv_width=conv_width, num_heads=num_heads, chunk=chunk)
    return pl.pallas_call(
        kernel,
        out_shape=jax.ShapeDtypeStruct((B, T, W), x.dtype),
        grid_spec=grid_spec,
        compiler_params=pltpu.CompilerParams(
            dimension_semantics=("parallel", "arbitrary"),   # batch across cores; T sequential
            vmem_limit_bytes=64 * 1024 * 1024),
    )(x, seg3,
      wy, row(params["by"]), wx, row(params["bx"]),
      params["conv_w"].astype(f32), row(params["conv_b"]),
      wgx, row(params["b_gate_x"]), wga, row(params["b_gate_a"]),
      row(params["a_param"]),
      wo, row(params["b_out"]))


def init_params(key, width, lru_width, num_heads, conv_width, final_scale=1.0):
    ks = jax.random.split(key, 11)
    bw = lru_width // num_heads
    std_in = math.sqrt(1.0 / width)
    std_out = math.sqrt(final_scale / lru_width)
    std_block = math.sqrt(1.0 / bw)
    return dict(
        wy=jax.random.normal(ks[0], (width, lru_width), jnp.float32) * std_in,
        by=jax.random.normal(ks[1], (lru_width,), jnp.float32) * 0.02,
        wx=jax.random.normal(ks[2], (width, lru_width), jnp.float32) * std_in,
        bx=jax.random.normal(ks[3], (lru_width,), jnp.float32) * 0.02,
        conv_w=jax.random.normal(ks[4], (conv_width, lru_width), jnp.float32) * 0.1,
        conv_b=jax.random.normal(ks[5], (lru_width,), jnp.float32) * 0.02,
        # block-diagonal RG-LRU gate weights kept as [num_heads, bw, bw]
        w_gate_x=jax.random.normal(ks[6], (num_heads, bw, bw), jnp.float32) * std_block,
        b_gate_x=jnp.zeros((lru_width,), jnp.float32),
        w_gate_a=jax.random.normal(ks[7], (num_heads, bw, bw), jnp.float32) * std_block,
        b_gate_a=jnp.zeros((lru_width,), jnp.float32),
        a_param=jax.random.uniform(ks[8], (lru_width,), jnp.float32, 0.1, 1.0),
        w_out=jax.random.normal(ks[9], (lru_width, width), jnp.float32) * std_out,
        b_out=jax.random.normal(ks[10], (width,), jnp.float32) * 0.02,
    )


def reference_forward(x, seg, p, conv_width):
    """Pure-JAX reference mirroring the PyTorch forward (bf16 matmul operands)."""
    f32, bf16 = jnp.float32, jnp.bfloat16
    r = lambda v: v.astype(bf16).astype(f32)       # emulate bf16 MXU operand rounding
    y = jax.nn.gelu(r(x) @ r(p["wy"]) + p["by"], approximate=True)
    xb = r(x) @ r(p["wx"]) + p["bx"]
    B, T, L = xb.shape
    padded = jnp.pad(xb, ((0, 0), (conv_width - 1, 0), (0, 0)))
    xc = sum(padded[:, s:s + T, :] * p["conv_w"][s] for s in range(conv_width)) + p["conv_b"]
    H, bw, _ = p["w_gate_x"].shape
    xch = r(xc).reshape(B, T, H, bw)
    gx = jnp.einsum("bthi,hij->bthj", xch, r(p["w_gate_x"])).reshape(B, T, L)
    ga = jnp.einsum("bthi,hij->bthj", xch, r(p["w_gate_a"])).reshape(B, T, L)
    gate_x = jax.nn.sigmoid(gx + p["b_gate_x"])
    gate_a = jax.nn.sigmoid(ga + p["b_gate_a"])
    log_a = -8.0 * gate_a * jax.nn.softplus(p["a_param"])
    a = jnp.exp(log_a)
    reset = (seg == 0)[..., None]
    multiplier = jnp.where(reset, 1.0, jnp.sqrt(1.0 - a * a))
    normalized = xc * gate_x * multiplier
    a_masked = a * (1.0 - reset.astype(f32))

    def step(h, inp):
        a_t, x_t = inp
        h = a_t * h + x_t
        return h, h

    _, hs = lax.scan(step, jnp.zeros((B, L), f32),
                     (jnp.swapaxes(a_masked, 0, 1), jnp.swapaxes(normalized, 0, 1)))
    hidden = jnp.swapaxes(hs, 0, 1)
    return r(hidden * y) @ r(p["w_out"]) + p["b_out"]


if __name__ == "__main__":
    B, T = 2, 64
    width = 64          # block width
    lru_width = 256     # RG-LRU internal width -> bw = 128 per head (lane aligned)
    num_heads = 2
    conv_width = 4

    key = jax.random.PRNGKey(0)
    kx, kp = jax.random.split(key)
    x = jax.random.normal(kx, (B, T, width), jnp.float32)
    # batch 0: segment reset exactly at the T-tile boundary; batch 1: reset mid-chunk.
    segment_pos = jnp.stack([
        jnp.concatenate([jnp.arange(32, dtype=jnp.int32),
                         jnp.arange(T - 32, dtype=jnp.int32)]),
        jnp.concatenate([jnp.arange(13, dtype=jnp.int32),
                         jnp.arange(T - 13, dtype=jnp.int32)]),
    ])
    params = init_params(kp, width, lru_width, num_heads, conv_width)

    out = recurrent_block_forward(x, segment_pos, params,
                                  conv_width=conv_width, num_heads=num_heads,
                                  t_tile=32, chunk=8)
    out = jax.block_until_ready(out)

    ref = reference_forward(x, segment_pos, params, conv_width)
    assert out.shape == (B, T, width)
    max_err = float(jnp.max(jnp.abs(out - ref)))
    assert jnp.allclose(out, ref, atol=2e-3, rtol=2e-3), max_err
    print("KERNEL_OK")
</pallas_src>

<mosaic_0001>
module attributes {stable_mosaic.version = 11 : i64} {
  func.func @_recurrent_block_kernel(%arg0: i32, %arg1: i32, %arg2: memref<1x32x64xf32, #tpu.memory_space<vmem>>, %arg3: memref<1x32x1xi32, #tpu.memory_space<vmem>>, %arg4: memref<64x256xbf16, #tpu.memory_space<vmem>>, %arg5: memref<1x256xf32, #tpu.memory_space<vmem>>, %arg6: memref<64x256xbf16, #tpu.memory_space<vmem>>, %arg7: memref<1x256xf32, #tpu.memory_space<vmem>>, %arg8: memref<4x256xf32, #tpu.memory_space<vmem>>, %arg9: memref<1x256xf32, #tpu.memory_space<vmem>>, %arg10: memref<2x128x128xbf16, #tpu.memory_space<vmem>>, %arg11: memref<1x256xf32, #tpu.memory_space<vmem>>, %arg12: memref<2x128x128xbf16, #tpu.memory_space<vmem>>, %arg13: memref<1x256xf32, #tpu.memory_space<vmem>>, %arg14: memref<1x256xf32, #tpu.memory_space<vmem>>, %arg15: memref<256x64xbf16, #tpu.memory_space<vmem>>, %arg16: memref<1x64xf32, #tpu.memory_space<vmem>>, %arg17: memref<1x32x64xf32, #tpu.memory_space<vmem>>, %arg18: memref<1x256xf32, #tpu.memory_space<vmem>>, %arg19: memref<3x256xf32, #tpu.memory_space<vmem>>, %arg20: memref<32x256xbf16, #tpu.memory_space<vmem>>) attributes {dimension_semantics = [#tpu.dimension_semantics<parallel>, #tpu.dimension_semantics<arbitrary>], iteration_bounds = array<i64: 2, 2>, scalar_prefetch = 0 : i64, scratch_operands = 3 : i64, tpu.core_type = #tpu.core_type<tc>, window_params = [{transform_indices = @transform_0, window_bounds = array<i64: 1, 32, 64>}, {transform_indices = @transform_1, window_bounds = array<i64: 1, 32, 1>}, {pipeline_mode = #tpu.pipeline_mode<synchronous>, transform_indices = @transform_2, window_bounds = array<i64: 64, 256>}, {pipeline_mode = #tpu.pipeline_mode<synchronous>, transform_indices = @transform_3, window_bounds = array<i64: 1, 256>}, {pipeline_mode = #tpu.pipeline_mode<synchronous>, transform_indices = @transform_4, window_bounds = array<i64: 64, 256>}, {pipeline_mode = #tpu.pipeline_mode<synchronous>, transform_indices = @transform_5, window_bounds = array<i64: 1, 256>}, {pipeline_mode = #tpu.pipeline_mode<synchronous>, transform_indices = @transform_6, window_bounds = array<i64: 4, 256>}, {pipeline_mode = #tpu.pipeline_mode<synchronous>, transform_indices = @transform_7, window_bounds = array<i64: 1, 256>}, {pipeline_mode = #tpu.pipeline_mode<synchronous>, transform_indices = @transform_8, window_bounds = array<i64: 2, 128, 128>}, {pipeline_mode = #tpu.pipeline_mode<synchronous>, transform_indices = @transform_9, window_bounds = array<i64: 1, 256>}, {pipeline_mode = #tpu.pipeline_mode<synchronous>, transform_indices = @transform_10, window_bounds = array<i64: 2, 128, 128>}, {pipeline_mode = #tpu.pipeline_mode<synchronous>, transform_indices = @transform_11, window_bounds = array<i64: 1, 256>}, {pipeline_mode = #tpu.pipeline_mode<synchronous>, transform_indices = @transform_12, window_bounds = array<i64: 1, 256>}, {pipeline_mode = #tpu.pipeline_mode<synchronous>, transform_indices = @transform_13, window_bounds = array<i64: 256, 64>}, {pipeline_mode = #tpu.pipeline_mode<synchronous>, transform_indices = @transform_14, window_bounds = array<i64: 1, 64>}, {transform_indices = @transform_15, window_bounds = array<i64: 1, 32, 64>}]} {
    %c0_i32 = arith.constant 0 : i32
    %0 = arith.cmpi eq, %arg1, %c0_i32 : i32
    %1 = arith.extui %0 : i1 to i32
    %c0_i32_0 = arith.constant 0 : i32
    %2 = arith.cmpi ne, %1, %c0_i32_0 : i32
    scf.if %2 {
      %cst_103 = arith.constant 0.000000e+00 : f32
      %283 = vector.broadcast %cst_103 : f32 to vector<1x256xf32>
      %c0_104 = arith.constant 0 : index
      %c0_105 = arith.constant 0 : index
      %284 = vector.load %arg18[%c0_104, %c0_105] : memref<1x256xf32, #tpu.memory_space<vmem>>, vector<1x256xf32>
      tpu.vector_store %arg18[%c0_104, %c0_105], %283 {strides = array<i32>} : memref<1x256xf32, #tpu.memory_space<vmem>>, vector<1x256xf32>,
      %cst_106 = arith.constant 0.000000e+00 : f32
      %285 = vector.broadcast %cst_106 : f32 to vector<3x256xf32>
      %c0_107 = arith.constant 0 : index
      %c0_108 = arith.constant 0 : index
      %286 = vector.load %arg19[%c0_107, %c0_108] : memref<3x256xf32, #tpu.memory_space<vmem>>, vector<3x256xf32>
      tpu.vector_store %arg19[%c0_107, %c0_108], %285 {strides = array<i32>} : memref<3x256xf32, #tpu.memory_space<vmem>>, vector<3x256xf32>,
    } else {
    }
    %c0 = arith.constant 0 : index
    %c0_1 = arith.constant 0 : index
    %c0_2 = arith.constant 0 : index
    %3 = vector.load %arg2[%c0, %c0_1, %c0_2] : memref<1x32x64xf32, #tpu.memory_space<vmem>>, vector<1x32x64xf32>
    %4 = vector.shape_cast %3 : vector<1x32x64xf32> to vector<32x64xf32>
    %c0_3 = arith.constant 0 : index
    %c0_4 = arith.constant 0 : index
    %c0_5 = arith.constant 0 : index
    %5 = vector.load %arg3[%c0_3, %c0_4, %c0_5] : memref<1x32x1xi32, #tpu.memory_space<vmem>>, vector<1x32x1xi32>
    %6 = vector.shape_cast %5 : vector<1x32x1xi32> to vector<32x1xi32>
    %7 = arith.truncf %4 : vector<32x64xf32> to vector<32x64xbf16>
    %c0_6 = arith.constant 0 : index
    %c0_7 = arith.constant 0 : index
    %8 = vector.load %arg4[%c0_6, %c0_7] : memref<64x256xbf16, #tpu.memory_space<vmem>>, vector<64x256xbf16>
    %cst = arith.constant dense<0.000000e+00> : vector<32x256xf32>
    %9 = tpu.matmul %7, %8, %cst {dimension_numbers = #tpu.dot_dimension_numbers<[1], [0], [0], [1], [0, 0, 1, 1], [], []>} : vector<32x64xbf16>, vector<64x256xbf16>, vector<32x256xf32> -> vector<32x256xf32>
    %c0_8 = arith.constant 0 : index
    %c0_9 = arith.constant 0 : index
    %10 = vector.load %arg5[%c0_8, %c0_9] : memref<1x256xf32, #tpu.memory_space<vmem>>, vector<1x256xf32>
    %11 = vector.broadcast %10 : vector<1x256xf32> to vector<32x256xf32>
    %12 = arith.addf %9, %11 : vector<32x256xf32>
    %13 = arith.mulf %12, %12 : vector<32x256xf32>
    %14 = arith.mulf %12, %13 : vector<32x256xf32>
    %cst_10 = arith.constant 4.471500e-02 : f32
    %15 = vector.broadcast %cst_10 : f32 to vector<32x256xf32>
    %16 = arith.mulf %15, %14 : vector<32x256xf32>
    %17 = arith.addf %12, %16 : vector<32x256xf32>
    %cst_11 = arith.constant 0.797884583 : f32
    %18 = vector.broadcast %cst_11 : f32 to vector<32x256xf32>
    %19 = arith.mulf %18, %17 : vector<32x256xf32>
    %20 = math.tanh %19 : vector<32x256xf32>
    %cst_12 = arith.constant 1.000000e+00 : f32
    %21 = vector.broadcast %cst_12 : f32 to vector<32x256xf32>
    %22 = arith.addf %21, %20 : vector<32x256xf32>
    %cst_13 = arith.constant 5.000000e-01 : f32
    %23 = vector.broadcast %cst_13 : f32 to vector<32x256xf32>
    %24 = arith.mulf %23, %22 : vector<32x256xf32>
    %25 = arith.mulf %12, %24 : vector<32x256xf32>
    %c0_14 = arith.constant 0 : index
    %c0_15 = arith.constant 0 : index
    %26 = vector.load %arg6[%c0_14, %c0_15] : memref<64x256xbf16, #tpu.memory_space<vmem>>, vector<64x256xbf16>
    %cst_16 = arith.constant dense<0.000000e+00> : vector<32x256xf32>
    %27 = tpu.matmul %7, %26, %cst_16 {dimension_numbers = #tpu.dot_dimension_numbers<[1], [0], [0], [1], [0, 0, 1, 1], [], []>} : vector<32x64xbf16>, vector<64x256xbf16>, vector<32x256xf32> -> vector<32x256xf32>
    %c0_17 = arith.constant 0 : index
    %c0_18 = arith.constant 0 : index
    %28 = vector.load %arg7[%c0_17, %c0_18] : memref<1x256xf32, #tpu.memory_space<vmem>>, vector<1x256xf32>
    %29 = vector.broadcast %28 : vector<1x256xf32> to vector<32x256xf32>
    %30 = arith.addf %27, %29 : vector<32x256xf32>
    %c0_19 = arith.constant 0 : index
    %c0_20 = arith.constant 0 : index
    %31 = vector.load %arg19[%c0_19, %c0_20] : memref<3x256xf32, #tpu.memory_space<vmem>>, vector<3x256xf32>
    %c3 = arith.constant 3 : index
    %c0_21 = arith.constant 0 : index
    %32 = vector.load %arg8[%c3, %c0_21] : memref<4x256xf32, #tpu.memory_space<vmem>>, vector<1x256xf32>
    %33 = vector.broadcast %32 : vector<1x256xf32> to vector<32x256xf32>
    %34 = arith.mulf %30, %33 : vector<32x256xf32>
    %35 = vector.extract_strided_slice %31 {offsets = [2, 0], sizes = [1, 256], strides = [1, 1]} : vector<3x256xf32> to vector<1x256xf32>
    %36 = vector.extract_strided_slice %30 {offsets = [0, 0], sizes = [31, 256], strides = [1, 1]} : vector<32x256xf32> to vector<31x256xf32>
    %37 = tpu.concatenate %35, %36 in 0 : vector<1x256xf32>, vector<31x256xf32> -> vector<32x256xf32>
    %c2 = arith.constant 2 : index
    %c0_22 = arith.constant 0 : index
    %38 = vector.load %arg8[%c2, %c0_22] : memref<4x256xf32, #tpu.memory_space<vmem>>, vector<1x256xf32>
    %39 = vector.broadcast %38 : vector<1x256xf32> to vector<32x256xf32>
    %40 = arith.mulf %37, %39 : vector<32x256xf32>
    %41 = arith.addf %34, %40 : vector<32x256xf32>
    %42 = vector.extract_strided_slice %31 {offsets = [1, 0], sizes = [2, 256], strides = [1, 1]} : vector<3x256xf32> to vector<2x256xf32>
    %43 = vector.extract_strided_slice %30 {offsets = [0, 0], sizes = [30, 256], strides = [1, 1]} : vector<32x256xf32> to vector<30x256xf32>
    %44 = tpu.concatenate %42, %43 in 0 : vector<2x256xf32>, vector<30x256xf32> -> vector<32x256xf32>
    %c1 = arith.constant 1 : index
    %c0_23 = arith.constant 0 : index
    %45 = vector.load %arg8[%c1, %c0_23] : memref<4x256xf32, #tpu.memory_space<vmem>>, vector<1x256xf32>
    %46 = vector.broadcast %45 : vector<1x256xf32> to vector<32x256xf32>
    %47 = arith.mulf %44, %46 : vector<32x256xf32>
    %48 = arith.addf %41, %47 : vector<32x256xf32>
    %49 = vector.extract_strided_slice %30 {offsets = [0, 0], sizes = [29, 256], strides = [1, 1]} : vector<32x256xf32> to vector<29x256xf32>
    %50 = tpu.concatenate %31, %49 in 0 : vector<3x256xf32>, vector<29x256xf32> -> vector<32x256xf32>
    %c0_24 = arith.constant 0 : index
    %c0_25 = arith.constant 0 : index
    %51 = vector.load %arg8[%c0_24, %c0_25] : memref<4x256xf32, #tpu.memory_space<vmem>>, vector<1x256xf32>
    %52 = vector.broadcast %51 : vector<1x256xf32> to vector<32x256xf32>
    %53 = arith.mulf %50, %52 : vector<32x256xf32>
    %54 = arith.addf %48, %53 : vector<32x256xf32>
    %c0_26 = arith.constant 0 : index
    %c0_27 = arith.constant 0 : index
    %55 = vector.load %arg9[%c0_26, %c0_27] : memref<1x256xf32, #tpu.memory_space<vmem>>, vector<1x256xf32>
    %56 = vector.broadcast %55 : vector<1x256xf32> to vector<32x256xf32>
    %57 = arith.addf %54, %56 : vector<32x256xf32>
    %58 = vector.extract_strided_slice %30 {offsets = [29, 0], sizes = [3, 256], strides = [1, 1]} : vector<32x256xf32> to vector<3x256xf32>
    %c0_28 = arith.constant 0 : index
    %c0_29 = arith.constant 0 : index
    %59 = vector.load %arg19[%c0_28, %c0_29] : memref<3x256xf32, #tpu.memory_space<vmem>>, vector<3x256xf32>
    tpu.vector_store %arg19[%c0_28, %c0_29], %58 {strides = array<i32>} : memref<3x256xf32, #tpu.memory_space<vmem>>, vector<3x256xf32>,
    %60 = arith.truncf %57 : vector<32x256xf32> to vector<32x256xbf16>
    %61 = vector.extract_strided_slice %60 {offsets = [0, 0], sizes = [32, 128], strides = [1, 1]} : vector<32x256xbf16> to vector<32x128xbf16>
    %c0_30 = arith.constant 0 : index
    %c0_31 = arith.constant 0 : index
    %c0_32 = arith.constant 0 : index
    %62 = vector.load %arg10[%c0_30, %c0_31, %c0_32] : memref<2x128x128xbf16, #tpu.memory_space<vmem>>, vector<1x128x128xbf16>
    %63 = vector.shape_cast %62 : vector<1x128x128xbf16> to vector<128x128xbf16>
    %cst_33 = arith.constant dense<0.000000e+00> : vector<32x128xf32>
    %64 = tpu.matmul %61, %63, %cst_33 {dimension_numbers = #tpu.dot_dimension_numbers<[1], [0], [0], [1], [0, 0, 1, 1], [], []>} : vector<32x128xbf16>, vector<128x128xbf16>, vector<32x128xf32> -> vector<32x128xf32>
    %c0_34 = arith.constant 0 : index
    %c0_35 = arith.constant 0 : index
    %c0_36 = arith.constant 0 : index
    %65 = vector.load %arg12[%c0_34, %c0_35, %c0_36] : memref<2x128x128xbf16, #tpu.memory_space<vmem>>, vector<1x128x128xbf16>
    %66 = vector.shape_cast %65 : vector<1x128x128xbf16> to vector<128x128xbf16>
    %cst_37 = arith.constant dense<0.000000e+00> : vector<32x128xf32>
    %67 = tpu.matmul %61, %66, %cst_37 {dimension_numbers = #tpu.dot_dimension_numbers<[1], [0], [0], [1], [0, 0, 1, 1], [], []>} : vector<32x128xbf16>, vector<128x128xbf16>, vector<32x128xf32> -> vector<32x128xf32>
    %68 = vector.extract_strided_slice %60 {offsets = [0, 128], sizes = [32, 128], strides = [1, 1]} : vector<32x256xbf16> to vector<32x128xbf16>
    %c1_38 = arith.constant 1 : index
    %c0_39 = arith.constant 0 : index
    %c0_40 = arith.constant 0 : index
    %69 = vector.load %arg10[%c1_38, %c0_39, %c0_40] : memref<2x128x128xbf16, #tpu.memory_space<vmem>>, vector<1x128x128xbf16>
    %70 = vector.shape_cast %69 : vector<1x128x128xbf16> to vector<128x128xbf16>
    %cst_41 = arith.constant dense<0.000000e+00> : vector<32x128xf32>
    %71 = tpu.matmul %68, %70, %cst_41 {dimension_numbers = #tpu.dot_dimension_numbers<[1], [0], [0], [1], [0, 0, 1, 1], [], []>} : vector<32x128xbf16>, vector<128x128xbf16>, vector<32x128xf32> -> vector<32x128xf32>
    %c1_42 = arith.constant 1 : index
    %c0_43 = arith.constant 0 : index
    %c0_44 = arith.constant 0 : index
    %72 = vector.load %arg12[%c1_42, %c0_43, %c0_44] : memref<2x128x128xbf16, #tpu.memory_space<vmem>>, vector<1x128x128xbf16>
    %73 = vector.shape_cast %72 : vector<1x128x128xbf16> to vector<128x128xbf16>
    %cst_45 = arith.constant dense<0.000000e+00> : vector<32x128xf32>
    %74 = tpu.matmul %68, %73, %cst_45 {dimension_numbers = #tpu.dot_dimension_numbers<[1], [0], [0], [1], [0, 0, 1, 1], [], []>} : vector<32x128xbf16>, vector<128x128xbf16>, vector<32x128xf32> -> vector<32x128xf32>
    %75 = tpu.concatenate %64, %71 in 1 : vector<32x128xf32>, vector<32x128xf32> -> vector<32x256xf32>
    %76 = tpu.concatenate %67, %74 in 1 : vector<32x128xf32>, vector<32x128xf32> -> vector<32x256xf32>
    %c0_46 = arith.constant 0 : index
    %c0_47 = arith.constant 0 : index
    %77 = vector.load %arg11[%c0_46, %c0_47] : memref<1x256xf32, #tpu.memory_space<vmem>>, vector<1x256xf32>
    %78 = vector.broadcast %77 : vector<1x256xf32> to vector<32x256xf32>
    %79 = arith.addf %75, %78 : vector<32x256xf32>
    %80 = arith.negf %79 : vector<32x256xf32>
    %81 = math.exp %80 : vector<32x256xf32>
    %cst_48 = arith.constant 1.000000e+00 : f32
    %82 = vector.broadcast %cst_48 : f32 to vector<32x256xf32>
    %83 = arith.addf %82, %81 : vector<32x256xf32>
    %84 = arith.divf %82, %83 : vector<32x256xf32>
    %c0_49 = arith.constant 0 : index
    %c0_50 = arith.constant 0 : index
    %85 = vector.load %arg13[%c0_49, %c0_50] : memref<1x256xf32, #tpu.memory_space<vmem>>, vector<1x256xf32>
    %86 = vector.broadcast %85 : vector<1x256xf32> to vector<32x256xf32>
    %87 = arith.addf %76, %86 : vector<32x256xf32>
    %88 = arith.negf %87 : vector<32x256xf32>
    %89 = math.exp %88 : vector<32x256xf32>
    %cst_51 = arith.constant 1.000000e+00 : f32
    %90 = vector.broadcast %cst_51 : f32 to vector<32x256xf32>
    %91 = arith.addf %90, %89 : vector<32x256xf32>
    %92 = arith.divf %90, %91 : vector<32x256xf32>
    %c0_52 = arith.constant 0 : index
    %c0_53 = arith.constant 0 : index
    %93 = vector.load %arg14[%c0_52, %c0_53] : memref<1x256xf32, #tpu.memory_space<vmem>>, vector<1x256xf32>
    %cst_54 = arith.constant 0.000000e+00 : f32
    %94 = vector.broadcast %cst_54 : f32 to vector<1x256xf32>
    %95 = arith.maximumf %93, %94 : vector<1x256xf32>
    %96 = math.absf %93 : vector<1x256xf32>
    %cst_55 = arith.constant 0.000000e+00 : f32
    %97 = vector.broadcast %cst_55 : f32 to vector<1x256xf32>
    %98 = arith.subf %97, %96 : vector<1x256xf32>
    %99 = math.exp %98 : vector<1x256xf32>
    %100 = math.log1p %99 : vector<1x256xf32>
    %101 = arith.addf %95, %100 : vector<1x256xf32>
    %cst_56 = arith.constant -8.000000e+00 : f32
    %102 = vector.broadcast %cst_56 : f32 to vector<32x256xf32>
    %103 = arith.mulf %102, %92 : vector<32x256xf32>
    %104 = vector.broadcast %101 : vector<1x256xf32> to vector<32x256xf32>
    %105 = arith.mulf %103, %104 : vector<32x256xf32>
    %106 = math.exp %105 : vector<32x256xf32>
    %107 = arith.mulf %106, %106 : vector<32x256xf32>
    %c0_i32_57 = arith.constant 0 : i32
    %108 = vector.broadcast %c0_i32_57 : i32 to vector<32x1xi32>
    %109 = arith.cmpi eq, %6, %108 : vector<32x1xi32>
    %110 = arith.extui %109 : vector<32x1xi1> to vector<32x1xi32>
    %111 = arith.sitofp %110 : vector<32x1xi32> to vector<32x1xf32>
    %112 = vector.shape_cast %111 : vector<32x1xf32> to vector<32x1xf32>
    %113 = vector.broadcast %112 : vector<32x1xf32> to vector<32x256xf32>
    %cst_58 = arith.constant 1.000000e+00 : f32
    %114 = vector.broadcast %cst_58 : f32 to vector<32x256xf32>
    %115 = arith.subf %114, %113 : vector<32x256xf32>
    %cst_59 = arith.constant 1.000000e+00 : f32
    %116 = vector.broadcast %cst_59 : f32 to vector<32x256xf32>
    %117 = arith.subf %116, %107 : vector<32x256xf32>
    %118 = math.sqrt %117 : vector<32x256xf32>
    %119 = arith.mulf %115, %118 : vector<32x256xf32>
    %120 = arith.addf %113, %119 : vector<32x256xf32>
    %121 = arith.mulf %57, %84 : vector<32x256xf32>
    %122 = arith.mulf %121, %120 : vector<32x256xf32>
    %123 = arith.mulf %106, %115 : vector<32x256xf32>
    %c0_60 = arith.constant 0 : index
    %c0_61 = arith.constant 0 : index
    %124 = vector.load %arg18[%c0_60, %c0_61] : memref<1x256xf32, #tpu.memory_space<vmem>>, vector<1x256xf32>
    %125 = vector.extract_strided_slice %123 {offsets = [0, 0], sizes = [8, 256], strides = [1, 1]} : vector<32x256xf32> to vector<8x256xf32>
    %126 = vector.extract_strided_slice %122 {offsets = [0, 0], sizes = [8, 256], strides = [1, 1]} : vector<32x256xf32> to vector<8x256xf32>
    %cst_62 = arith.constant 0.000000e+00 : f32
    %127 = vector.broadcast %cst_62 : f32 to vector<1x256xf32>
    %128 = vector.extract_strided_slice %126 {offsets = [0, 0], sizes = [7, 256], strides = [1, 1]} : vector<8x256xf32> to vector<7x256xf32>
    %129 = tpu.concatenate %127, %128 in 0 : vector<1x256xf32>, vector<7x256xf32> -> vector<8x256xf32>
    %130 = arith.mulf %125, %129 : vector<8x256xf32>
    %131 = arith.addf %126, %130 : vector<8x256xf32>
    %cst_63 = arith.constant 1.000000e+00 : f32
    %132 = vector.broadcast %cst_63 : f32 to vector<1x256xf32>
    %133 = vector.extract_strided_slice %125 {offsets = [0, 0], sizes = [7, 256], strides = [1, 1]} : vector<8x256xf32> to vector<7x256xf32>
    %134 = tpu.concatenate %132, %133 in 0 : vector<1x256xf32>, vector<7x256xf32> -> vector<8x256xf32>
    %135 = arith.mulf %125, %134 : vector<8x256xf32>
    %cst_64 = arith.constant 0.000000e+00 : f32
    %136 = vector.broadcast %cst_64 : f32 to vector<2x256xf32>
    %137 = vector.extract_strided_slice %131 {offsets = [0, 0], sizes = [6, 256], strides = [1, 1]} : vector<8x256xf32> to vector<6x256xf32>
    %138 = tpu.concatenate %136, %137 in 0 : vector<2x256xf32>, vector<6x256xf32> -> vector<8x256xf32>
    %139 = arith.mulf %135, %138 : vector<8x256xf32>
    %140 = arith.addf %131, %139 : vector<8x256xf32>
    %cst_65 = arith.constant 1.000000e+00 : f32
    %141 = vector.broadcast %cst_65 : f32 to vector<2x256xf32>
    %142 = vector.extract_strided_slice %135 {offsets = [0, 0], sizes = [6, 256], strides = [1, 1]} : vector<8x256xf32> to vector<6x256xf32>
    %143 = tpu.concatenate %141, %142 in 0 : vector<2x256xf32>, vector<6x256xf32> -> vector<8x256xf32>
    %144 = arith.mulf %135, %143 : vector<8x256xf32>
    %cst_66 = arith.constant 0.000000e+00 : f32
    %145 = vector.broadcast %cst_66 : f32 to vector<4x256xf32>
    %146 = vector.extract_strided_slice %140 {offsets = [0, 0], sizes = [4, 256], strides = [1, 1]} : vector<8x256xf32> to vector<4x256xf32>
    %147 = tpu.concatenate %145, %146 in 0 : vector<4x256xf32>, vector<4x256xf32> -> vector<8x256xf32>
    %148 = arith.mulf %144, %147 : vector<8x256xf32>
    %149 = arith.addf %140, %148 : vector<8x256xf32>
    %cst_67 = arith.constant 1.000000e+00 : f32
    %150 = vector.broadcast %cst_67 : f32 to vector<4x256xf32>
    %151 = vector.extract_strided_slice %144 {offsets = [0, 0], sizes = [4, 256], strides = [1, 1]} : vector<8x256xf32> to vector<4x256xf32>
    %152 = tpu.concatenate %150, %151 in 0 : vector<4x256xf32>, vector<4x256xf32> -> vector<8x256xf32>
    %153 = arith.mulf %144, %152 : vector<8x256xf32>
    %154 = vector.broadcast %124 : vector<1x256xf32> to vector<8x256xf32>
    %155 = arith.mulf %153, %154 : vector<8x256xf32>
    %156 = arith.addf %149, %155 : vector<8x256xf32>
    %157 = vector.extract_strided_slice %156 {offsets = [7, 0], sizes = [1, 256], strides = [1, 1]} : vector<8x256xf32> to vector<1x256xf32>
    %158 = vector.extract_strided_slice %25 {offsets = [0, 0], sizes = [8, 256], strides = [1, 1]} : vector<32x256xf32> to vector<8x256xf32>
    %159 = arith.mulf %156, %158 : vector<8x256xf32>
    %160 = arith.truncf %159 : vector<8x256xf32> to vector<8x256xbf16>
    %c0_68 = arith.constant 0 : index
    %c0_69 = arith.constant 0 : index
    %161 = vector.load %arg20[%c0_68, %c0_69] : memref<32x256xbf16, #tpu.memory_space<vmem>>, vector<8x256xbf16>
    tpu.vector_store %arg20[%c0_68, %c0_69], %160 {strides = array<i32>} : memref<32x256xbf16, #tpu.memory_space<vmem>>, vector<8x256xbf16>,
    %162 = vector.extract_strided_slice %123 {offsets = [8, 0], sizes = [8, 256], strides = [1, 1]} : vector<32x256xf32> to vector<8x256xf32>
    %163 = vector.extract_strided_slice %122 {offsets = [8, 0], sizes = [8, 256], strides = [1, 1]} : vector<32x256xf32> to vector<8x256xf32>
    %cst_70 = arith.constant 0.000000e+00 : f32
    %164 = vector.broadcast %cst_70 : f32 to vector<1x256xf32>
    %165 = vector.extract_strided_slice %163 {offsets = [0, 0], sizes = [7, 256], strides = [1, 1]} : vector<8x256xf32> to vector<7x256xf32>
    %166 = tpu.concatenate %164, %165 in 0 : vector<1x256xf32>, vector<7x256xf32> -> vector<8x256xf32>
    %167 = arith.mulf %162, %166 : vector<8x256xf32>
    %168 = arith.addf %163, %167 : vector<8x256xf32>
    %cst_71 = arith.constant 1.000000e+00 : f32
    %169 = vector.broadcast %cst_71 : f32 to vector<1x256xf32>
    %170 = vector.extract_strided_slice %162 {offsets = [0, 0], sizes = [7, 256], strides = [1, 1]} : vector<8x256xf32> to vector<7x256xf32>
    %171 = tpu.concatenate %169, %170 in 0 : vector<1x256xf32>, vector<7x256xf32> -> vector<8x256xf32>
    %172 = arith.mulf %162, %171 : vector<8x256xf32>
    %cst_72 = arith.constant 0.000000e+00 : f32
    %173 = vector.broadcast %cst_72 : f32 to vector<2x256xf32>
    %174 = vector.extract_strided_slice %168 {offsets = [0, 0], sizes = [6, 256], strides = [1, 1]} : vector<8x256xf32> to vector<6x256xf32>
    %175 = tpu.concatenate %173, %174 in 0 : vector<2x256xf32>, vector<6x256xf32> -> vector<8x256xf32>
    %176 = arith.mulf %172, %175 : vector<8x256xf32>
    %177 = arith.addf %168, %176 : vector<8x256xf32>
    %cst_73 = arith.constant 1.000000e+00 : f32
    %178 = vector.broadcast %cst_73 : f32 to vector<2x256xf32>
    %179 = vector.extract_strided_slice %172 {offsets = [0, 0], sizes = [6, 256], strides = [1, 1]} : vector<8x256xf32> to vector<6x256xf32>
    %180 = tpu.concatenate %178, %179 in 0 : vector<2x256xf32>, vector<6x256xf32> -> vector<8x256xf32>
    %181 = arith.mulf %172, %180 : vector<8x256xf32>
    %cst_74 = arith.constant 0.000000e+00 : f32
    %182 = vector.broadcast %cst_74 : f32 to vector<4x256xf32>
    %183 = vector.extract_strided_slice %177 {offsets = [0, 0], sizes = [4, 256], strides = [1, 1]} : vector<8x256xf32> to vector<4x256xf32>
    %184 = tpu.concatenate %182, %183 in 0 : vector<4x256xf32>, vector<4x256xf32> -> vector<8x256xf32>
    %185 = arith.mulf %181, %184 : vector<8x256xf32>
    %186 = arith.addf %177, %185 : vector<8x256xf32>
    %cst_75 = arith.constant 1.000000e+00 : f32
    %187 = vector.broadcast %cst_75 : f32 to vector<4x256xf32>
    %188 = vector.extract_strided_slice %181 {offsets = [0, 0], sizes = [4, 256], strides = [1, 1]} : vector<8x256xf32> to vector<4x256xf32>
    %189 = tpu.concatenate %187, %188 in 0 : vector<4x256xf32>, vector<4x256xf32> -> vector<8x256xf32>
    %190 = arith.mulf %181, %189 : vector<8x256xf32>
    %191 = vector.broadcast %157 : vector<1x256xf32> to vector<8x256xf32>
    %192 = arith.mulf %190, %191 : vector<8x256xf32>
    %193 = arith.addf %186, %192 : vector<8x256xf32>
    %194 = vector.extract_strided_slice %193 {offsets = [7, 0], sizes = [1, 256], strides = [1, 1]} : vector<8x256xf32> to vector<1x256xf32>
    %195 = vector.extract_strided_slice %25 {offsets = [8, 0], sizes = [8, 256], strides = [1, 1]} : vector<32x256xf32> to vector<8x256xf32>
    %196 = arith.mulf %193, %195 : vector<8x256xf32>
    %197 = arith.truncf %196 : vector<8x256xf32> to vector<8x256xbf16>
    %c8 = arith.constant 8 : index
    %c0_76 = arith.constant 0 : index
    %198 = vector.load %arg20[%c8, %c0_76] : memref<32x256xbf16, #tpu.memory_space<vmem>>, vector<8x256xbf16>
    tpu.vector_store %arg20[%c8, %c0_76], %197 {strides = array<i32>} : memref<32x256xbf16, #tpu.memory_space<vmem>>, vector<8x256xbf16>,
    %199 = vector.extract_strided_slice %123 {offsets = [16, 0], sizes = [8, 256], strides = [1, 1]} : vector<32x256xf32> to vector<8x256xf32>
    %200 = vector.extract_strided_slice %122 {offsets = [16, 0], sizes = [8, 256], strides = [1, 1]} : vector<32x256xf32> to vector<8x256xf32>
    %cst_77 = arith.constant 0.000000e+00 : f32
    %201 = vector.broadcast %cst_77 : f32 to vector<1x256xf32>
    %202 = vector.extract_strided_slice %200 {offsets = [0, 0], sizes = [7, 256], strides = [1, 1]} : vector<8x256xf32> to vector<7x256xf32>
    %203 = tpu.concatenate %201, %202 in 0 : vector<1x256xf32>, vector<7x256xf32> -> vector<8x256xf32>
    %204 = arith.mulf %199, %203 : vector<8x256xf32>
    %205 = arith.addf %200, %204 : vector<8x256xf32>
    %cst_78 = arith.constant 1.000000e+00 : f32
    %206 = vector.broadcast %cst_78 : f32 to vector<1x256xf32>
    %207 = vector.extract_strided_slice %199 {offsets = [0, 0], sizes = [7, 256], strides = [1, 1]} : vector<8x256xf32> to vector<7x256xf32>
    %208 = tpu.concatenate %206, %207 in 0 : vector<1x256xf32>, vector<7x256xf32> -> vector<8x256xf32>
    %209 = arith.mulf %199, %208 : vector<8x256xf32>
    %cst_79 = arith.constant 0.000000e+00 : f32
    %210 = vector.broadcast %cst_79 : f32 to vector<2x256xf32>
    %211 = vector.extract_strided_slice %205 {offsets = [0, 0], sizes = [6, 256], strides = [1, 1]} : vector<8x256xf32> to vector<6x256xf32>
    %212 = tpu.concatenate %210, %211 in 0 : vector<2x256xf32>, vector<6x256xf32> -> vector<8x256xf32>
    %213 = arith.mulf %209, %212 : vector<8x256xf32>
    %214 = arith.addf %205, %213 : vector<8x256xf32>
    %cst_80 = arith.constant 1.000000e+00 : f32
    %215 = vector.broadcast %cst_80 : f32 to vector<2x256xf32>
    %216 = vector.extract_strided_slice %209 {offsets = [0, 0], sizes = [6, 256], strides = [1, 1]} : vector<8x256xf32> to vector<6x256xf32>
    %217 = tpu.concatenate %215, %216 in 0 : vector<2x256xf32>, vector<6x256xf32> -> vector<8x256xf32>
    %218 = arith.mulf %209, %217 : vector<8x256xf32>
    %cst_81 = arith.constant 0.000000e+00 : f32
    %219 = vector.broadcast %cst_81 : f32 to vector<4x256xf32>
    %220 = vector.extract_strided_slice %214 {offsets = [0, 0], sizes = [4, 256], strides = [1, 1]} : vector<8x256xf32> to vector<4x256xf32>
    %221 = tpu.concatenate %219, %220 in 0 : vector<4x256xf32>, vector<4x256xf32> -> vector<8x256xf32>
    %222 = arith.mulf %218, %221 : vector<8x256xf32>
    %223 = arith.addf %214, %222 : vector<8x256xf32>
    %cst_82 = arith.constant 1.000000e+00 : f32
    %224 = vector.broadcast %cst_82 : f32 to vector<4x256xf32>
    %225 = vector.extract_strided_slice %218 {offsets = [0, 0], sizes = [4, 256], strides = [1, 1]} : vector<8x256xf32> to vector<4x256xf32>
    %226 = tpu.concatenate %224, %225 in 0 : vector<4x256xf32>, vector<4x256xf32> -> vector<8x256xf32>
    %227 = arith.mulf %218, %226 : vector<8x256xf32>
    %228 = vector.broadcast %194 : vector<1x256xf32> to vector<8x256xf32>
    %229 = arith.mulf %227, %228 : vector<8x256xf32>
    %230 = arith.addf %223, %229 : vector<8x256xf32>
    %231 = vector.extract_strided_slice %230 {offsets = [7, 0], sizes = [1, 256], strides = [1, 1]} : vector<8x256xf32> to vector<1x256xf32>
    %232 = vector.extract_strided_slice %25 {offsets = [16, 0], sizes = [8, 256], strides = [1, 1]} : vector<32x256xf32> to vector<8x256xf32>
    %233 = arith.mulf %230, %232 : vector<8x256xf32>
    %234 = arith.truncf %233 : vector<8x256xf32> to vector<8x256xbf16>
    %c16 = arith.constant 16 : index
    %c0_83 = arith.constant 0 : index
    %235 = vector.load %arg20[%c16, %c0_83] : memref<32x256xbf16, #tpu.memory_space<vmem>>, vector<8x256xbf16>
    tpu.vector_store %arg20[%c16, %c0_83], %234 {strides = array<i32>} : memref<32x256xbf16, #tpu.memory_space<vmem>>, vector<8x256xbf16>,
    %236 = vector.extract_strided_slice %123 {offsets = [24, 0], sizes = [8, 256], strides = [1, 1]} : vector<32x256xf32> to vector<8x256xf32>
    %237 = vector.extract_strided_slice %122 {offsets = [24, 0], sizes = [8, 256], strides = [1, 1]} : vector<32x256xf32> to vector<8x256xf32>
    %cst_84 = arith.constant 0.000000e+00 : f32
    %238 = vector.broadcast %cst_84 : f32 to vector<1x256xf32>
    %239 = vector.extract_strided_slice %237 {offsets = [0, 0], sizes = [7, 256], strides = [1, 1]} : vector<8x256xf32> to vector<7x256xf32>
    %240 = tpu.concatenate %238, %239 in 0 : vector<1x256xf32>, vector<7x256xf32> -> vector<8x256xf32>
    %241 = arith.mulf %236, %240 : vector<8x256xf32>
    %242 = arith.addf %237, %241 : vector<8x256xf32>
    %cst_85 = arith.constant 1.000000e+00 : f32
    %243 = vector.broadcast %cst_85 : f32 to vector<1x256xf32>
    %244 = vector.extract_strided_slice %236 {offsets = [0, 0], sizes = [7, 256], strides = [1, 1]} : vector<8x256xf32> to vector<7x256xf32>
    %245 = tpu.concatenate %243, %244 in 0 : vector<1x256xf32>, vector<7x256xf32> -> vector<8x256xf32>
    %246 = arith.mulf %236, %245 : vector<8x256xf32>
    %cst_86 = arith.constant 0.000000e+00 : f32
    %247 = vector.broadcast %cst_86 : f32 to vector<2x256xf32>
    %248 = vector.extract_strided_slice %242 {offsets = [0, 0], sizes = [6, 256], strides = [1, 1]} : vector<8x256xf32> to vector<6x256xf32>
    %249 = tpu.concatenate %247, %248 in 0 : vector<2x256xf32>, vector<6x256xf32> -> vector<8x256xf32>
    %250 = arith.mulf %246, %249 : vector<8x256xf32>
    %251 = arith.addf %242, %250 : vector<8x256xf32>
    %cst_87 = arith.constant 1.000000e+00 : f32
    %252 = vector.broadcast %cst_87 : f32 to vector<2x256xf32>
    %253 = vector.extract_strided_slice %246 {offsets = [0, 0], sizes = [6, 256], strides = [1, 1]} : vector<8x256xf32> to vector<6x256xf32>
    %254 = tpu.concatenate %252, %253 in 0 : vector<2x256xf32>, vector<6x256xf32> -> vector<8x256xf32>
    %255 = arith.mulf %246, %254 : vector<8x256xf32>
    %cst_88 = arith.constant 0.000000e+00 : f32
    %256 = vector.broadcast %cst_88 : f32 to vector<4x256xf32>
    %257 = vector.extract_strided_slice %251 {offsets = [0, 0], sizes = [4, 256], strides = [1, 1]} : vector<8x256xf32> to vector<4x256xf32>
    %258 = tpu.concatenate %256, %257 in 0 : vector<4x256xf32>, vector<4x256xf32> -> vector<8x256xf32>
    %259 = arith.mulf %255, %258 : vector<8x256xf32>
    %260 = arith.addf %251, %259 : vector<8x256xf32>
    %cst_89 = arith.constant 1.000000e+00 : f32
    %261 = vector.broadcast %cst_89 : f32 to vector<4x256xf32>
    %262 = vector.extract_strided_slice %255 {offsets = [0, 0], sizes = [4, 256], strides = [1, 1]} : vector<8x256xf32> to vector<4x256xf32>
    %263 = tpu.concatenate %261, %262 in 0 : vector<4x256xf32>, vector<4x256xf32> -> vector<8x256xf32>
    %264 = arith.mulf %255, %263 : vector<8x256xf32>
    %265 = vector.broadcast %231 : vector<1x256xf32> to vector<8x256xf32>
    %266 = arith.mulf %264, %265 : vector<8x256xf32>
    %267 = arith.addf %260, %266 : vector<8x256xf32>
    %268 = vector.extract_strided_slice %267 {offsets = [7, 0], sizes = [1, 256], strides = [1, 1]} : vector<8x256xf32> to vector<1x256xf32>
    %269 = vector.extract_strided_slice %25 {offsets = [24, 0], sizes = [8, 256], strides = [1, 1]} : vector<32x256xf32> to vector<8x256xf32>
    %270 = arith.mulf %267, %269 : vector<8x256xf32>
    %271 = arith.truncf %270 : vector<8x256xf32> to vector<8x256xbf16>
    %c24 = arith.constant 24 : index
    %c0_90 = arith.constant 0 : index
    %272 = vector.load %arg20[%c24, %c0_90] : memref<32x256xbf16, #tpu.memory_space<vmem>>, vector<8x256xbf16>
    tpu.vector_store %arg20[%c24, %c0_90], %271 {strides = array<i32>} : memref<32x256xbf16, #tpu.memory_space<vmem>>, vector<8x256xbf16>,
    %c0_91 = arith.constant 0 : index
    %c0_92 = arith.constant 0 : index
    %273 = vector.load %arg18[%c0_91, %c0_92] : memref<1x256xf32, #tpu.memory_space<vmem>>, vector<1x256xf32>
    tpu.vector_store %arg18[%c0_91, %c0_92], %268 {strides = array<i32>} : memref<1x256xf32, #tpu.memory_space<vmem>>, vector<1x256xf32>,
    %c0_93 = arith.constant 0 : index
    %c0_94 = arith.constant 0 : index
    %274 = vector.load %arg20[%c0_93, %c0_94] : memref<32x256xbf16, #tpu.memory_space<vmem>>, vector<32x256xbf16>
    %c0_95 = arith.constant 0 : index
    %c0_96 = arith.constant 0 : index
    %275 = vector.load %arg15[%c0_95, %c0_96] : memref<256x64xbf16, #tpu.memory_space<vmem>>, vector<256x64xbf16>
    %cst_97 = arith.constant dense<0.000000e+00> : vector<32x64xf32>
    %276 = tpu.matmul %274, %275, %cst_97 {dimension_numbers = #tpu.dot_dimension_numbers<[1], [0], [0], [1], [0, 0, 1, 1], [], []>} : vector<32x256xbf16>, vector<256x64xbf16>, vector<32x64xf32> -> vector<32x64xf32>
    %c0_98 = arith.constant 0 : index
    %c0_99 = arith.constant 0 : index
    %277 = vector.load %arg16[%c0_98, %c0_99] : memref<1x64xf32, #tpu.memory_space<vmem>>, vector<1x64xf32>
    %278 = vector.broadcast %277 : vector<1x64xf32> to vector<32x64xf32>
    %279 = arith.addf %276, %278 : vector<32x64xf32>
    %c0_100 = arith.constant 0 : index
    %c0_101 = arith.constant 0 : index
    %c0_102 = arith.constant 0 : index
    %280 = vector.load %arg17[%c0_100, %c0_101, %c0_102] : memref<1x32x64xf32, #tpu.memory_space<vmem>>, vector<1x32x64xf32>
    %281 = vector.shape_cast %280 : vector<1x32x64xf32> to vector<32x64xf32>
    %282 = vector.shape_cast %279 : vector<32x64xf32> to vector<1x32x64xf32>
    tpu.vector_store %arg17[%c0_100, %c0_101, %c0_102], %282 {strides = array<i32>} : memref<1x32x64xf32, #tpu.memory_space<vmem>>, vector<1x32x64xf32>,
    return
  }
  func.func @transform_0(%arg0: i32, %arg1: i32) -> (i32, i32, i32) {
    %c0_i32 = arith.constant 0 : i32
    %c0_i32_0 = arith.constant 0 : i32
    return %arg0, %arg1, %c0_i32 : i32, i32, i32
  }
  func.func @transform_1(%arg0: i32, %arg1: i32) -> (i32, i32, i32) {
    %c0_i32 = arith.constant 0 : i32
    %c0_i32_0 = arith.constant 0 : i32
    return %arg0, %arg1, %c0_i32 : i32, i32, i32
  }
  func.func @transform_2(%arg0: i32, %arg1: i32) -> (i32, i32) {
    %c0_i32 = arith.constant 0 : i32
    %c0_i32_0 = arith.constant 0 : i32
    %c0_i32_1 = arith.constant 0 : i32
    return %c0_i32, %c0_i32_0 : i32, i32
  }
  func.func @transform_3(%arg0: i32, %arg1: i32) -> (i32, i32) {
    %c0_i32 = arith.constant 0 : i32
    %c0_i32_0 = arith.constant 0 : i32
    %c0_i32_1 = arith.constant 0 : i32
    return %c0_i32, %c0_i32_0 : i32, i32
  }
  func.func @transform_4(%arg0: i32, %arg1: i32) -> (i32, i32) {
    %c0_i32 = arith.constant 0 : i32
    %c0_i32_0 = arith.constant 0 : i32
    %c0_i32_1 = arith.constant 0 : i32
    return %c0_i32, %c0_i32_0 : i32, i32
  }
  func.func @transform_5(%arg0: i32, %arg1: i32) -> (i32, i32) {
    %c0_i32 = arith.constant 0 : i32
    %c0_i32_0 = arith.constant 0 : i32
    %c0_i32_1 = arith.constant 0 : i32
    return %c0_i32, %c0_i32_0 : i32, i32
  }
  func.func @transform_6(%arg0: i32, %arg1: i32) -> (i32, i32) {
    %c0_i32 = arith.constant 0 : i32
    %c0_i32_0 = arith.constant 0 : i32
    %c0_i32_1 = arith.constant 0 : i32
    return %c0_i32, %c0_i32_0 : i32, i32
  }
  func.func @transform_7(%arg0: i32, %arg1: i32) -> (i32, i32) {
    %c0_i32 = arith.constant 0 : i32
    %c0_i32_0 = arith.constant 0 : i32
    %c0_i32_1 = arith.constant 0 : i32
    return %c0_i32, %c0_i32_0 : i32, i32
  }
  func.func @transform_8(%arg0: i32, %arg1: i32) -> (i32, i32, i32) {
    %c0_i32 = arith.constant 0 : i32
    %c0_i32_0 = arith.constant 0 : i32
    %c0_i32_1 = arith.constant 0 : i32
    %c0_i32_2 = arith.constant 0 : i32
    return %c0_i32, %c0_i32_0, %c0_i32_1 : i32, i32, i32
  }
  func.func @transform_9(%arg0: i32, %arg1: i32) -> (i32, i32) {
    %c0_i32 = arith.constant 0 : i32
    %c0_i32_0 = arith.constant 0 : i32
    %c0_i32_1 = arith.constant 0 : i32
    return %c0_i32, %c0_i32_0 : i32, i32
  }
  func.func @transform_10(%arg0: i32, %arg1: i32) -> (i32, i32, i32) {
    %c0_i32 = arith.constant 0 : i32
    %c0_i32_0 = arith.constant 0 : i32
    %c0_i32_1 = arith.constant 0 : i32
    %c0_i32_2 = arith.constant 0 : i32
    return %c0_i32, %c0_i32_0, %c0_i32_1 : i32, i32, i32
  }
  func.func @transform_11(%arg0: i32, %arg1: i32) -> (i32, i32) {
    %c0_i32 = arith.constant 0 : i32
    %c0_i32_0 = arith.constant 0 : i32
    %c0_i32_1 = arith.constant 0 : i32
    return %c0_i32, %c0_i32_0 : i32, i32
  }
  func.func @transform_12(%arg0: i32, %arg1: i32) -> (i32, i32) {
    %c0_i32 = arith.constant 0 : i32
    %c0_i32_0 = arith.constant 0 : i32
    %c0_i32_1 = arith.constant 0 : i32
    return %c0_i32, %c0_i32_0 : i32, i32
  }
  func.func @transform_13(%arg0: i32, %arg1: i32) -> (i32, i32) {
    %c0_i32 = arith.constant 0 : i32
    %c0_i32_0 = arith.constant 0 : i32
    %c0_i32_1 = arith.constant 0 : i32
    return %c0_i32, %c0_i32_0 : i32, i32
  }
  func.func @transform_14(%arg0: i32, %arg1: i32) -> (i32, i32) {
    %c0_i32 = arith.constant 0 : i32
    %c0_i32_0 = arith.constant 0 : i32
    %c0_i32_1 = arith.constant 0 : i32
    return %c0_i32, %c0_i32_0 : i32, i32
  }
  func.func @transform_15(%arg0: i32, %arg1: i32) -> (i32, i32, i32) {
    %c0_i32 = arith.constant 0 : i32
    %c0_i32_0 = arith.constant 0 : i32
    return %arg0, %arg1, %c0_i32 : i32, i32, i32
  }
}

</mosaic_0001>

<bundles_post_ra>
// kernel: tpu_custom_call.1
= control target key start
LH: loop header
LB: loop body
LE: loop exit
PB: predicated region body
PF: predicated region fallthrough
CT: control target
= control target key end

     0   :  { %s5726_s0 = inlined_call_operand.hbm [shape: f32[2,64,64], index: 0, kind: input, shape index: {}]   ;;  %s5727_s1 = inlined_call_operand.hbm [shape: s32[2,64,1], index: 1, kind: input, shape index: {}]   ;;  %s5728_s2 = inlined_call_operand.hbm [shape: bf16[64,256], index: 2, kind: input, shape index: {}]   ;;  %s5729_s3 = inlined_call_operand.hbm [shape: f32[1,256], index: 3, kind: input, shape index: {}]   ;;  %s5730_s4 = inlined_call_operand.hbm [shape: bf16[64,256], index: 4, kind: input, shape index: {}]   ;;  %s5731_s5 = inlined_call_operand.hbm [shape: f32[1,256], index: 5, kind: input, shape index: {}]   ;;  %s5732_s6 = inlined_call_operand.hbm [shape: f32[4,256], index: 6, kind: input, shape index: {}]   ;;  %s5733_s7 = inlined_call_operand.hbm [shape: f32[1,256], index: 7, kind: input, shape index: {}]   ;;  %s5734_s8 = inlined_call_operand.hbm [shape: bf16[2,128,128], index: 8, kind: input, shape index: {}]   ;;  %s5735_s9 = inlined_call_operand.hbm [shape: f32[1,256], index: 9, kind: input, shape index: {}]   ;;  %s5736_s10 = inlined_call_operand.hbm [shape: bf16[2,128,128], index: 10, kind: input, shape index: {}]   ;;  %s5737_s11 = inlined_call_operand.hbm [shape: f32[1,256], index: 11, kind: input, shape index: {}]   ;;  %s5738_s12 = inlined_call_operand.hbm [shape: f32[1,256], index: 12, kind: input, shape index: {}]   ;;  %s5739_s13 = inlined_call_operand.hbm [shape: bf16[256,64], index: 13, kind: input, shape index: {}]   ;;  %s5740_s14 = inlined_call_operand.hbm [shape: f32[1,64], index: 14, kind: input, shape index: {}]   ;;  %s5741_s15 = inlined_call_operand.hbm [shape: f32[2,64,64], index: 15, kind: output, shape index: {}]  }
   0x1   :  { %5775 = sst [smem:[#allocation54_spill]] %s5726_s0 }
   0x2   :  { %5776 = sst [smem:[#allocation55_spill]] %s5727_s1 }
   0x3   :  { %5777 = sst [smem:[#allocation56_spill]] %s5728_s2 }
   0x4   :  { %5778 = sst [smem:[#allocation57_spill]] %s5729_s3 }
   0x5   :  { %5779 = sst [smem:[#allocation58_spill]] %s5730_s4 }
   0x6   :  { %5780 = sst [smem:[#allocation59_spill]] %s5731_s5 }
   0x7   :  { %5781 = sst [smem:[#allocation60_spill]] %s5732_s6 }
   0x8   :  { %5782 = sst [smem:[#allocation61_spill]] %s5733_s7 }
   0x9   :  { %5783 = sst [smem:[#allocation62_spill]] %s5734_s8 }
   0xa   :  { %5784 = sst [smem:[#allocation63_spill]] %s5735_s9 }
   0xb   :  { %5785 = sst [smem:[#allocation64_spill]] %s5736_s10 }
   0xc   :  { %5786 = sst [smem:[#allocation65_spill]] %s5741_s15 }
   0xd   :  { %20 = vsyncpa [#allocation6], 0 }
   0xe   :  { %22 = vsyncpa [#allocation6 + $0x1], 0 }
   0xf   :  { %23 = vsyncpa [#allocation9], 0 }
  0x10   :  { %25 = vsyncpa [#allocation9 + $0x1], 0 }
  0x11   :  { %26 = vsyncpa [#allocation12], 0 }
  0x12   :  { %27 = vsyncpa [#allocation15], 0 }
  0x13   :  { %28 = vsyncpa [#allocation18], 0 }
  0x14   :  { %29 = vsyncpa [#allocation21], 0 }
  0x15   :  { %30 = vsyncpa [#allocation24], 0 }
  0x16   :  { %31 = vsyncpa [#allocation27], 0 }
  0x17   :  { %32 = vsyncpa [#allocation7], 0 }
  0x18   :  { %34 = vsyncpa [#allocation7 + $0x1], 0  ;;  %s4298_s18 = smov 0   ;;  %s4300_s19 = smov 0  }
  0x19   :  { %s4302_s20 = smov 0   ;;  %s4304_s21 = smov 0  }
  0x1a   :  { %s4306_s22 = smov 0   ;;  %s4308_s23 = smov 0  }
  0x1b   :  { %s4310_s24 = smov 0   ;;  %s4312_s25 = smov 0  }
  0x1c LB: > { %5787 = sst [smem:[#allocation40_spill]] %s4162_s18  ;;  %s4339_s26 = sadd.s32 4294967295, %s4190_s25   ;;  %s4190_s25 = sphi %s4312_s25, %s40_s25   ;;  %s4186_s24 = sphi %s4310_s24, %s5886_s24   ;;  %s4182_s23 = sphi %s4308_s23, %s5885_s23   ;;  %s4178_s22 = sphi %s4306_s22, %s5882_s22   ;;  %s4174_s21 = sphi %s4304_s21, %s5884_s21   ;;  %s4170_s20 = sphi %s4302_s20, %s5883_s20   ;;  %s4166_s19 = sphi %s4300_s19, %s5881_s19   ;;  %s4162_s18 = sphi %s4298_s18, %s5880_s18  }
  0x1d   : > { %5788 = sst [smem:[#allocation41_spill]] %s4166_s19  ;;  %p2937_p0 = scmp.ge.s32.totalorder %s4190_s25, 1 }
  0x1e   : > { %5789 = sst [smem:[#allocation42_spill]] %s4170_s20  ;;  %p5752_p1 = scmp.eq.s32.totalorder %s4339_s26, 0 }
  0x1f   : > { %5790 = sst [smem:[#allocation43_spill]] %s4174_s21  ;;  %p414_p2 = scmp.lt.s32.totalorder %s4190_s25, 5 }
  0x20   : > { %5791 = sst [smem:[#allocation44_spill]] %s4178_s22  ;;  %s4192_s28 = smov [#allocation10]  }
  0x21   : > { %5792 = sst [smem:[#allocation45_spill]] %s4186_s24  ;;  %p4344_p3 = pnand %p2937_p0, %p414_p2 }
  0x22   : > { %5793 = sst [smem:[#allocation46_spill]] %s4339_s26  ;;  %s426_s29 = sshll.u32 %s4192_s28, 4  ;;  %s4348_s29 = int_to_ptr.vmem [resolvable:$true] %s426_s29 }
  0x23   : > { %s5794_s27 = scalar_select %p4344_p3, 1, 0 }
  0x24   : > { %p3280_p4 = pneg %p4344_p3  ;;  %s4193_s16 = smov [#allocation11]  }
  0x25   : > { %5795 = sst [smem:[#allocation47_spill]] %s5794_s27  ;;  %s440_s17 = sshll.u32 %s4193_s16, 4  ;;  %s4358_s17 = int_to_ptr.vmem [resolvable:$true] %s440_s17 }
  0x26   : > { %p4354_p5 = pnand %p3280_p4, %p5752_p1  ;;  %s4194_s15 = smov [#allocation14]  }
  0x27   : > { %s4360_s22 = sshll.u32 %s4194_s15, 4  ;;  %s5797_s2 = sld [smem:[#allocation56_spill]]  ;;  %s465_s22 = int_to_ptr.vmem [resolvable:$true] %s4360_s22 }
  0x28   : > { %p4370_p7 = pneg %p4354_p5 }
  0x2d   : > { %s3636_s28 = scalar_lea.hbm %s5797_s2, 1024 }
  0x2e   : > { %p3637_p6 = scmp.ne.s32.totalorder %s5797_s2, %s3636_s28  ;;  %p3643_p10 = scmp.lt.u32.totalorder %s3636_s28, %s5797_s2 }
  0x30   : > { %p3639_p8 = pnand %p4370_p7, %p3637_p6 }
  0x32   : > { %p3640_p9 = pneg %p3639_p8 }
  0x34   : > { %p3645_p11 = pnand %p3643_p10, %p3640_p9 }
  0x36   : > { %3648 = shalt.err (!%p3645_p11)
}
  0x37   : > { %s3649_s0 = scalar_lea.vmem %s4348_s29, 1024  ;;  %p3657_p2 = scmp.lt.s32.totalorder %s4348_s29, %s4348_s29 }
  0x38   : > { %p3650_p12 = scmp.ne.s32.totalorder %s4348_s29, %s3649_s0  ;;  %p3658_p4 = scmp.lt.s32.totalorder %s3649_s0, %s3649_s0 }
  0x3a   : > { %p3652_p13 = pnand %p3650_p12, %p4370_p7  ;;  %p3659_p6 = por %p3658_p4, %p3657_p2 }
  0x3c   : > { %p3653_p0 = pneg %p3652_p13 }
  0x3e   : > { %p3660_p8 = pnand %p3659_p6, %p3653_p0 }
  0x40   : > { %3663 = shalt.err (!%p3660_p8)
}
  0x41   : > { %s5754_s1 = smov 128   ;;  %s5760_s21 = smov 8  }
  0x42   : > { %3283 = dma.hbm_to_vmem [thread:$0]  (!%p4354_p5), %s5797_s2, 1024, %s4348_s29, [#allocation9], %s5754_s1, %s5754_s1, %s5760_s21  }
  0x43   : > { %s5799_s3 = sld [smem:[#allocation57_spill]] }
  0x49   : > { %s3664_s0 = scalar_lea.hbm %s5799_s3, 32 }
  0x4a   : > { %p3665_p9 = scmp.ne.s32.totalorder %s5799_s3, %s3664_s0  ;;  %p3671_p12 = scmp.lt.u32.totalorder %s3664_s0, %s5799_s3 }
  0x4c   : > { %p3667_p10 = pnand %p3665_p9, %p4370_p7 }
  0x4e   : > { %p3668_p11 = pneg %p3667_p10 }
  0x50   : > { %p3673_p13 = pnand %p3671_p12, %p3668_p11 }
  0x52   : > { %3676 = shalt.err (!%p3673_p13)
}
  0x53   : > { %s3677_s29 = scalar_lea.vmem %s4358_s17, 32  ;;  %p3685_p6 = scmp.lt.s32.totalorder %s4358_s17, %s4358_s17 }
  0x54   : > { %p3678_p0 = scmp.ne.s32.totalorder %s4358_s17, %s3677_s29  ;;  %p3686_p8 = scmp.lt.s32.totalorder %s3677_s29, %s3677_s29 }
  0x56   : > { %p3680_p2 = pnand %p3678_p0, %p4370_p7  ;;  %p3687_p9 = por %p3686_p8, %p3685_p6 }
  0x58   : > { %p3681_p4 = pneg %p3680_p2 }
  0x5a   : > { %p3688_p10 = pnand %p3687_p9, %p3681_p4 }
  0x5c   : > { %3691 = shalt.err (!%p3688_p10)
}
  0x5d   : > { %3286 = dma.hbm_to_vmem [thread:$0]  (!%p4354_p5), %s5799_s3, 32, %s4358_s17, [#allocation12]  }
  0x5e   : > { %s5800_s5 = sld [smem:[#allocation59_spill]] }
  0x64   : > { %s3692_s27 = scalar_lea.hbm %s5800_s5, 32 }
  0x65   : > { %p3693_p11 = scmp.ne.s32.totalorder %s5800_s5, %s3692_s27  ;;  %p3699_p0 = scmp.lt.u32.totalorder %s3692_s27, %s5800_s5 }
  0x67   : > { %p3695_p12 = pnand %p3693_p11, %p4370_p7 }
  0x69   : > { %p3696_p13 = pneg %p3695_p12 }
  0x6b   : > { %p3701_p2 = pnand %p3699_p0, %p3696_p13 }
  0x6d   : > { %3704 = shalt.err (!%p3701_p2)
}
  0x6e   : > { %s3705_s29 = scalar_lea.vmem %s465_s22, 32  ;;  %p3713_p9 = scmp.lt.s32.totalorder %s465_s22, %s465_s22 }
  0x6f   : > { %p3706_p4 = scmp.ne.s32.totalorder %s465_s22, %s3705_s29  ;;  %p3714_p10 = scmp.lt.s32.totalorder %s3705_s29, %s3705_s29 }
  0x71   : > { %p3708_p6 = pnand %p3706_p4, %p4370_p7  ;;  %p3715_p1 = por %p3714_p10, %p3713_p9 }
  0x73   : > { %p3709_p8 = pneg %p3708_p6 }
  0x75   : > { %p3716_p3 = pnand %p3715_p1, %p3709_p8 }
  0x77   : > { %3719 = shalt.err (!%p3716_p3)
}
  0x78   : > { %3292 = dma.hbm_to_vmem [thread:$0]  (!%p4354_p5), %s5800_s5, 32, %s465_s22, [#allocation15]  }
  0x79   : > { %s4197_s19 = smov [#allocation17]   ;;  %s4198_s24 = smov [#allocation20]  }
  0x7a   : > { %s486_s20 = sshll.u32 %s4197_s19, 4  ;;  %s510_s27 = sshll.u32 %s4198_s24, 4  ;;  %s487_s20 = int_to_ptr.vmem [resolvable:$true] %s486_s20  ;;  %s511_s27 = int_to_ptr.vmem [resolvable:$true] %s510_s27 }
  0x7b   : > { %s5801_s7 = sld [smem:[#allocation61_spill]] }
  0x81   : > { %s3720_s15 = scalar_lea.hbm %s5801_s7, 32 }
  0x82   : > { %p3721_p1 = scmp.ne.s32.totalorder %s5801_s7, %s3720_s15  ;;  %p3727_p12 = scmp.lt.u32.totalorder %s3720_s15, %s5801_s7 }
  0x84   : > { %p3723_p3 = pnand %p3721_p1, %p4370_p7 }
  0x86   : > { %p3724_p11 = pneg %p3723_p3 }
  0x88   : > { %p3729_p13 = pnand %p3727_p12, %p3724_p11 }
  0x8a   : > { %3732 = shalt.err (!%p3729_p13)
}
  0x8b   : > { %s3733_s22 = scalar_lea.vmem %s487_s20, 32  ;;  %p3741_p6 = scmp.lt.s32.totalorder %s487_s20, %s487_s20 }
  0x8c   : > { %p3734_p0 = scmp.ne.s32.totalorder %s487_s20, %s3733_s22  ;;  %p3742_p8 = scmp.lt.s32.totalorder %s3733_s22, %s3733_s22 }
  0x8e   : > { %p3736_p2 = pnand %p3734_p0, %p4370_p7  ;;  %p3743_p9 = por %p3742_p8, %p3741_p6 }
  0x90   : > { %p3737_p4 = pneg %p3736_p2 }
  0x92   : > { %p3744_p10 = pnand %p3743_p9, %p3737_p4 }
  0x94   : > { %3747 = shalt.err (!%p3744_p10)
}
  0x95   : > { %3298 = dma.hbm_to_vmem [thread:$0]  (!%p4354_p5), %s5801_s7, 32, %s487_s20, [#allocation18]  }
  0x96   : > { %s5802_s9 = sld [smem:[#allocation63_spill]] }
  0x9c   : > { %s3748_s28 = scalar_lea.hbm %s5802_s9, 32 }
  0x9d   : > { %p3749_p1 = scmp.ne.s32.totalorder %s5802_s9, %s3748_s28  ;;  %p3755_p12 = scmp.lt.u32.totalorder %s3748_s28, %s5802_s9 }
  0x9f   : > { %p3751_p3 = pnand %p3749_p1, %p4370_p7 }
  0xa1   : > { %p3752_p11 = pneg %p3751_p3 }
  0xa3   : > { %p3757_p13 = pnand %p3755_p12, %p3752_p11 }
  0xa5   : > { %3760 = shalt.err (!%p3757_p13)
}
  0xa6   : > { %s3761_s17 = scalar_lea.vmem %s511_s27, 32  ;;  %p3769_p6 = scmp.lt.s32.totalorder %s511_s27, %s511_s27 }
  0xa7   : > { %p3762_p0 = scmp.ne.s32.totalorder %s511_s27, %s3761_s17  ;;  %p3770_p8 = scmp.lt.s32.totalorder %s3761_s17, %s3761_s17 }
  0xa9   : > { %p3764_p2 = pnand %p3762_p0, %p4370_p7  ;;  %p3771_p9 = por %p3770_p8, %p3769_p6 }
  0xab   : > { %p3765_p4 = pneg %p3764_p2 }
  0xad   : > { %p3772_p10 = pnand %p3771_p9, %p3765_p4 }
  0xaf   : > { %3775 = shalt.err (!%p3772_p10)
}
  0xb0   : > { %3304 = dma.hbm_to_vmem [thread:$0]  (!%p4354_p5), %s5802_s9, 32, %s511_s27, [#allocation21]  }
  0xb1   : > { %s4199_s18 = smov [#allocation23]   ;;  %s3776_s28 = scalar_lea.hbm %s5737_s11, 32 }
  0xb2   : > { %s534_s19 = sshll.u32 %s4199_s18, 4  ;;  %p3777_p1 = scmp.ne.s32.totalorder %s5737_s11, %s3776_s28  ;;  %s535_s19 = int_to_ptr.vmem [resolvable:$true] %s534_s19 }
  0xb3   : > { %p3783_p12 = scmp.lt.u32.totalorder %s3776_s28, %s5737_s11 }
  0xb4   : > { %p3779_p3 = pnand %p3777_p1, %p4370_p7 }
  0xb6   : > { %p3780_p11 = pneg %p3779_p3 }
  0xb8   : > { %p3785_p13 = pnand %p3783_p12, %p3780_p11 }
  0xba   : > { %3788 = shalt.err (!%p3785_p13)
}
  0xbb   : > { %s3789_s27 = scalar_lea.vmem %s535_s19, 32  ;;  %p3797_p6 = scmp.lt.s32.totalorder %s535_s19, %s535_s19 }
  0xbc   : > { %p3790_p0 = scmp.ne.s32.totalorder %s535_s19, %s3789_s27  ;;  %p3798_p8 = scmp.lt.s32.totalorder %s3789_s27, %s3789_s27 }
  0xbe   : > { %p3792_p2 = pnand %p3790_p0, %p4370_p7  ;;  %p3799_p9 = por %p3798_p8, %p3797_p6 }
  0xc0   : > { %p3793_p4 = pneg %p3792_p2 }
  0xc2   : > { %p3800_p10 = pnand %p3799_p9, %p3793_p4 }
  0xc4   : > { %3803 = shalt.err (!%p3800_p10)
}
  0xc5   : > { %3310 = dma.hbm_to_vmem [thread:$0]  (!%p4354_p5), %s5737_s11, 32, %s535_s19, [#allocation24]  }
  0xc6   : > { %s4200_s22 = smov [#allocation26]   ;;  %s4201_s1 = smov [#allocation13]  }
  0xc7   : > { %s555_s18 = sshll.u32 %s4200_s22, 4  ;;  %s450_s24 = sshll.u32 %s4201_s1, 4  ;;  %s556_s18 = int_to_ptr.vmem [resolvable:$true] %s555_s18  ;;  %s4490_s24 = int_to_ptr.vmem [resolvable:$true] %s450_s24 }
  0xc8   : > { %s3804_s15 = scalar_lea.hbm %s5739_s13, 2048 }
  0xc9   : > { %p3805_p1 = scmp.ne.s32.totalorder %s5739_s13, %s3804_s15  ;;  %p3811_p12 = scmp.lt.u32.totalorder %s3804_s15, %s5739_s13 }
  0xcb   : > { %p3807_p3 = pnand %p3805_p1, %p4370_p7 }
  0xcd   : > { %p3808_p11 = pneg %p3807_p3 }
  0xcf   : > { %p3813_p13 = pnand %p3811_p12, %p3808_p11 }
  0xd1   : > { %3816 = shalt.err (!%p3813_p13)
}
  0xd2   : > { %s3817_s17 = scalar_lea.vmem %s556_s18, 2048  ;;  %p3825_p6 = scmp.lt.s32.totalorder %s556_s18, %s556_s18 }
  0xd3   : > { %p3818_p0 = scmp.ne.s32.totalorder %s556_s18, %s3817_s17  ;;  %p3826_p8 = scmp.lt.s32.totalorder %s3817_s17, %s3817_s17 }
  0xd5   : > { %p3820_p2 = pnand %p3818_p0, %p4370_p7  ;;  %p3827_p9 = por %p3826_p8, %p3825_p6 }
  0xd7   : > { %p3821_p4 = pneg %p3820_p2 }
  0xd9   : > { %p3828_p10 = pnand %p3827_p9, %p3821_p4 }
  0xdb   : > { %3831 = shalt.err (!%p3828_p10)
}
  0xdc   : > { %s5756_s20 = smov 64   ;;  %s5758_s22 = smov 4  }
  0xdd   : > { %3316 = dma.hbm_to_vmem [thread:$0]  (!%p4354_p5), %s5739_s13, 2048, %s556_s18, [#allocation27], %s5756_s20, %s5756_s20, %s5758_s22  }
  0xde   : > { %s5803_s4 = sld [smem:[#allocation58_spill]] }
  0xe4   : > { %s3832_s0 = scalar_lea.hbm %s5803_s4, 1024 }
  0xe5   : > { %p3833_p1 = scmp.ne.s32.totalorder %s5803_s4, %s3832_s0  ;;  %p3839_p12 = scmp.lt.u32.totalorder %s3832_s0, %s5803_s4 }
  0xe7   : > { %p3835_p3 = pnand %p3833_p1, %p4370_p7 }
  0xe9   : > { %p3836_p11 = pneg %p3835_p3 }
  0xeb   : > { %p3841_p13 = pnand %p3839_p12, %p3836_p11 }
  0xed   : > { %3844 = shalt.err (!%p3841_p13)
}
  0xee   : > { %s3845_s18 = scalar_lea.vmem %s4490_s24, 1024  ;;  %p3853_p6 = scmp.lt.s32.totalorder %s4490_s24, %s4490_s24 }
  0xef   : > { %p3846_p0 = scmp.ne.s32.totalorder %s4490_s24, %s3845_s18  ;;  %p3854_p8 = scmp.lt.s32.totalorder %s3845_s18, %s3845_s18 }
  0xf1   : > { %p3848_p2 = pnand %p3846_p0, %p4370_p7  ;;  %p3855_p9 = por %p3854_p8, %p3853_p6 }
  0xf3   : > { %p3849_p4 = pneg %p3848_p2 }
  0xf5   : > { %p3856_p10 = pnand %p3855_p9, %p3849_p4 }
  0xf7   : > { %3859 = shalt.err (!%p3856_p10)
}
  0xf8   : > { %s5804_s1 = smov 128   ;;  %s4204_s15 = smov [#allocation16]  }
  0xf9   : > { %3289 = dma.hbm_to_vmem [thread:$0]  (!%p4354_p5), %s5803_s4, 1024, %s4490_s24, [#allocation12], %s5804_s1, %s5804_s1, %s5760_s21  }
  0xfa   : > { %s475_s0 = sshll.u32 %s4204_s15, 4  ;;  %s4205_s29 = smov [#allocation19]   ;;  %s476_s0 = int_to_ptr.vmem [resolvable:$true] %s475_s0 }
  0xfb   : > { %s496_s27 = sshll.u32 %s4205_s29, 4  ;;  %s5805_s6 = sld [smem:[#allocation60_spill]]  ;;  %s4539_s27 = int_to_ptr.vmem [resolvable:$true] %s496_s27 }
 0x101   : > { %s3860_s18 = scalar_lea.hbm %s5805_s6, 128 }
 0x102   : > { %p3861_p1 = scmp.ne.s32.totalorder %s5805_s6, %s3860_s18  ;;  %p3867_p12 = scmp.lt.u32.totalorder %s3860_s18, %s5805_s6 }
 0x104   : > { %p3863_p3 = pnand %p3861_p1, %p4370_p7 }
 0x106   : > { %p3864_p11 = pneg %p3863_p3 }
 0x108   : > { %p3869_p13 = pnand %p3867_p12, %p3864_p11 }
 0x10a   : > { %3872 = shalt.err (!%p3869_p13)
}
 0x10b   : > { %s3873_s16 = scalar_lea.vmem %s476_s0, 128  ;;  %p3881_p6 = scmp.lt.s32.totalorder %s476_s0, %s476_s0 }
 0x10c   : > { %p3874_p0 = scmp.ne.s32.totalorder %s476_s0, %s3873_s16  ;;  %p3882_p8 = scmp.lt.s32.totalorder %s3873_s16, %s3873_s16 }
 0x10e   : > { %p3876_p2 = pnand %p3874_p0, %p4370_p7  ;;  %p3883_p9 = por %p3882_p8, %p3881_p6 }
 0x110   : > { %p3877_p4 = pneg %p3876_p2 }
 0x112   : > { %p3884_p10 = pnand %p3883_p9, %p3877_p4 }
 0x114   : > { %3887 = shalt.err (!%p3884_p10)
}
 0x115   : > { %3295 = dma.hbm_to_vmem [thread:$0]  (!%p4354_p5), %s5805_s6, 128, %s476_s0, [#allocation15]  }
 0x116   : > { %s5806_s8 = sld [smem:[#allocation62_spill]] }
 0x11c   : > { %s3888_s19 = scalar_lea.hbm %s5806_s8, 2048 }
 0x11d   : > { %p3889_p1 = scmp.ne.s32.totalorder %s5806_s8, %s3888_s19  ;;  %p3895_p12 = scmp.lt.u32.totalorder %s3888_s19, %s5806_s8 }
 0x11f   : > { %p3891_p3 = pnand %p3889_p1, %p4370_p7 }
 0x121   : > { %p3892_p11 = pneg %p3891_p3 }
 0x123   : > { %p3897_p13 = pnand %p3895_p12, %p3892_p11 }
 0x125   : > { %3900 = shalt.err (!%p3897_p13)
}
 0x126   : > { %s3901_s0 = scalar_lea.vmem %s4539_s27, 2048  ;;  %p3909_p6 = scmp.lt.s32.totalorder %s4539_s27, %s4539_s27 }
 0x127   : > { %p3902_p0 = scmp.ne.s32.totalorder %s4539_s27, %s3901_s0  ;;  %p3910_p8 = scmp.lt.s32.totalorder %s3901_s0, %s3901_s0 }
 0x129   : > { %p3904_p2 = pnand %p3902_p0, %p4370_p7  ;;  %p3911_p9 = por %p3910_p8, %p3909_p6 }
 0x12b   : > { %p3905_p4 = pneg %p3904_p2 }
 0x12d   : > { %p3912_p10 = pnand %p3911_p9, %p3905_p4 }
 0x12f   : > { %3915 = shalt.err (!%p3912_p10)
}
 0x130   : > { %s5807_s16 = smov 4   ;;  %s5808_s20 = smov 64  }
 0x131   : > { %3301 = dma.hbm_to_vmem [thread:$0]  (!%p4354_p5), %s5806_s8, 2048, %s4539_s27, [#allocation18], %s5808_s20, %s5808_s20, %s5807_s16  }
 0x132   : > { %s4206_s29 = smov [#allocation22]   ;;  %s4207_s17 = smov [#allocation25]  }
 0x133   : > { %s520_s19 = sshll.u32 %s4206_s29, 4  ;;  %s545_s18 = sshll.u32 %s4207_s17, 4  ;;  %s521_s19 = int_to_ptr.vmem [resolvable:$true] %s520_s19  ;;  %s4585_s18 = int_to_ptr.vmem [resolvable:$true] %s545_s18 }
 0x134   : > { %s5809_s10 = sld [smem:[#allocation64_spill]] }
 0x13a   : > { %s3916_s0 = scalar_lea.hbm %s5809_s10, 2048 }
 0x13b   : > { %p3917_p1 = scmp.ne.s32.totalorder %s5809_s10, %s3916_s0  ;;  %p3923_p12 = scmp.lt.u32.totalorder %s3916_s0, %s5809_s10 }
 0x13d   : > { %p3919_p3 = pnand %p3917_p1, %p4370_p7 }
 0x13f   : > { %p3920_p11 = pneg %p3919_p3 }
 0x141   : > { %p3925_p13 = pnand %p3923_p12, %p3920_p11 }
 0x143   : > { %3928 = shalt.err (!%p3925_p13)
}
 0x144   : > { %s3929_s15 = scalar_lea.vmem %s521_s19, 2048  ;;  %p3937_p6 = scmp.lt.s32.totalorder %s521_s19, %s521_s19 }
 0x145   : > { %p3930_p0 = scmp.ne.s32.totalorder %s521_s19, %s3929_s15  ;;  %p3938_p8 = scmp.lt.s32.totalorder %s3929_s15, %s3929_s15 }
 0x147   : > { %p3932_p2 = pnand %p3930_p0, %p4370_p7  ;;  %p3939_p9 = por %p3938_p8, %p3937_p6 }
 0x149   : > { %p3933_p4 = pneg %p3932_p2 }
 0x14b   : > { %p3940_p10 = pnand %p3939_p9, %p3933_p4 }
 0x14d   : > { %3943 = shalt.err (!%p3940_p10)
}
 0x14e   : > { %3307 = dma.hbm_to_vmem [thread:$0]  (!%p4354_p5), %s5809_s10, 2048, %s521_s19, [#allocation21], %s5808_s20, %s5808_s20, %s5807_s16  }
 0x14f   : > { %s3944_s28 = scalar_lea.hbm %s5738_s12, 32 }
 0x150   : > { %p3945_p1 = scmp.ne.s32.totalorder %s5738_s12, %s3944_s28  ;;  %p3951_p12 = scmp.lt.u32.totalorder %s3944_s28, %s5738_s12 }
 0x152   : > { %p3947_p3 = pnand %p3945_p1, %p4370_p7 }
 0x154   : > { %p3948_p11 = pneg %p3947_p3 }
 0x156   : > { %p3953_p13 = pnand %p3951_p12, %p3948_p11 }
 0x158   : > { %3956 = shalt.err (!%p3953_p13)
}
 0x159   : > { %s3957_s16 = scalar_lea.vmem %s4585_s18, 32  ;;  %p3965_p6 = scmp.lt.s32.totalorder %s4585_s18, %s4585_s18 }
 0x15a   : > { %p3958_p0 = scmp.ne.s32.totalorder %s4585_s18, %s3957_s16  ;;  %p3966_p8 = scmp.lt.s32.totalorder %s3957_s16, %s3957_s16 }
 0x15c   : > { %p3960_p2 = pnand %p3958_p0, %p4370_p7  ;;  %p3967_p9 = por %p3966_p8, %p3965_p6 }
 0x15e   : > { %p3961_p4 = pneg %p3960_p2 }
 0x160   : > { %p3968_p10 = pnand %p3967_p9, %p3961_p4 }
 0x162   : > { %3971 = shalt.err (!%p3968_p10)
}
 0x163   : > { %3313 = dma.hbm_to_vmem [thread:$0]  (!%p4354_p5), %s5738_s12, 32, %s4585_s18, [#allocation24]  }
 0x164   : > { %s4208_s15 = smov [#allocation28]   ;;  %s3972_s17 = scalar_lea.hbm %s5740_s14, 16 }
 0x165   : > { %s569_s2 = sshll.u32 %s4208_s15, 4  ;;  %p3973_p1 = scmp.ne.s32.totalorder %s5740_s14, %s3972_s17  ;;  %s570_s2 = int_to_ptr.vmem [resolvable:$true] %s569_s2 }
 0x166   : > { %p3979_p12 = scmp.lt.u32.totalorder %s3972_s17, %s5740_s14 }
 0x167   : > { %p3975_p3 = pnand %p3973_p1, %p4370_p7 }
 0x169   : > { %p3976_p11 = pneg %p3975_p3 }
 0x16b   : > { %p3981_p13 = pnand %p3979_p12, %p3976_p11 }
 0x16d   : > { %3984 = shalt.err (!%p3981_p13)
}
 0x16e   : > { %s3985_s18 = scalar_lea.vmem %s570_s2, 16  ;;  %s3992_s27 = scalar_lea.vmem %s570_s2, 32 }
 0x16f   : > { %p3986_p0 = scmp.ne.s32.totalorder %s570_s2, %s3985_s18  ;;  %p3993_p6 = scmp.lt.s32.totalorder %s570_s2, %s570_s2 }
 0x170   : > { %p3994_p8 = scmp.lt.s32.totalorder %s3992_s27, %s3985_s18 }
 0x171   : > { %p3988_p2 = pnand %p3986_p0, %p4370_p7 }
 0x172   : > { %p3995_p9 = por %p3994_p8, %p3993_p6 }
 0x173   : > { %p3989_p4 = pneg %p3988_p2 }
 0x175   : > { %p3996_p10 = pnand %p3995_p9, %p3989_p4 }
 0x177   : > { %3999 = shalt.err (!%p3996_p10)
}
 0x178   : > { %s5810_s19 = sld [smem:[#allocation45_spill]]  ;;  %s5811_s15 = sld [smem:[#allocation42_spill]] }
 0x179   : > { %s5812_s21 = sld [smem:[#allocation41_spill]]  ;;  %s5813_s26 = sld [smem:[#allocation40_spill]] }
 0x17a   : > { %s5814_s29 = sld [smem:[#allocation46_spill]]  ;;  %s2936_s17 = sadd.s32 4294967294, %s4190_s25  }
 0x17b   : > { %3319 = dma.hbm_to_vmem [thread:$0]  (!%p4354_p5), %s5740_s14, 16, %s570_s2, [#allocation27]  }
 0x17c   : > { %s49_s28 = sadd.s32 1, %s4182_s23  ;;  %p69_p3 = scmp.eq.s32.totalorder %s4190_s25, 0 }
 0x17d   : > { %p50_p7 = scmp.ge.s32.totalorder %s49_s28, 2  ;;  %p407_p0 = scmp.eq.s32.totalorder %s2936_s17, 3 }
 0x17e   : > { %s52_s30 = sadd.s32 1, %s5810_s19  ;;  %s61_s24 = sadd.s32 1, %s5811_s15 }
 0x17f   : > { %p68_p1 = scmp.ne.s32.totalorder %s5811_s15, %s5812_s21  ;;  %s5888_s28 = smov (%p50_p7, %s49_s28), 0 }
 0x180   : > { %s5890_s30 = smov (!%p50_p7, %s52_s30), %s5810_s19  ;;  %s57_s0 = ssub.s32 %s4182_s23, %s5888_s28 }
 0x181   : > { %p4661_p11 = por %p69_p3, %p68_p1  ;;  %p54_p5 = scmp.ge.s32.totalorder %s5890_s30, 2 }
 0x182   : > { %p74_p12 = scmp.ne.s32.totalorder %s5812_s21, %s5813_s26  ;;  %p401_p13 = scmp.eq.s32.totalorder %s5814_s29, 3 }
 0x183   : > { %s5892_s30 = smov (%p54_p5, %s5890_s30), 0  ;;  %p5816_p2 = scmp.eq.s32.totalorder %s5814_s29, 0 }
 0x184   : > { %p4676_p6 = por %p401_p13, %p68_p1  ;;  %s56_s27 = ssub.s32 %s5810_s19, %s5892_s30 }
 0x185   : > { %p4672_p4 = por %p5816_p2, %p74_p12  ;;  %p4682_p8 = por %p407_p0, %p74_p12 }
 0x186   : > { %s5818_s18 = scalar_select %p4676_p6, 1, 0 }
 0x187   : > { %s5819_s16 = scalar_select %p4682_p8, 1, 0 }
 0x188   : > { %s58_s20 = sor.u32 %s57_s0, %s56_s27  ;;  %p3344_p9 = scmp.lt.s32.totalorder %s4190_s25, 4 }
 0x189   : > { %p59_p10 = scmp.eq.s32.totalorder %s58_s20, 0  ;;  %s580_s21 = sand.u32 1, %s5811_s15  }
 0x18a   : > { %s4688_s26 = sshll.u32 %s580_s21, 5  ;;  %s2953_s29 = sshll.u32 %s4182_s23, 2 }
 0x18b   : > { %s5894_s15 = smov (!%p59_p10, %s5811_s15), %s61_s24  ;;  %s2954_s17 = sshll.u32 %s5810_s19, 3 }
 0x18c   : > { %s584_s3 = scalar_lea.vmem [#allocation5], %s4688_s26  ;;  %s590_s5 = sadd.s32 %s2954_s17, %s2953_s29 }
 0x18d   : > { %s593_s4 = sshll.u32 %s584_s3, 4  ;;  %s2955_s6 = sshll.u32 %s590_s5, 7  ;;  %s4696_s4 = int_to_ptr.vmem [resolvable:$true] %s593_s4 }
 0x18e   : > { %p4700_p7 = pnand %p3344_p9, %p4661_p11  ;;  %s5821_s20 = sld [smem:[#allocation54_spill]] }
 0x18f   : > { %s5823_s10 = sld [smem:[#allocation55_spill]]  ;;  %s4714_s5 = scalar_lea.sflag [#allocation6], %s580_s21 }
 0x190   : > { %p4002_p3 = pneg %p4700_p7 }
 0x194   : > { %s5822_s8 = smov %s5821_s20  ;;  %s4707_s24 = scalar_lea.hbm %s5821_s20, %s2955_s6 }
 0x195   : > { %s4712_s3 = scalar_lea.hbm %s5823_s10, %s2955_s6  ;;  %s4000_s22 = scalar_lea.hbm %s4707_s24, 512 }
 0x196   : > { %p4001_p1 = scmp.ne.s32.totalorder %s4707_s24, %s4000_s22  ;;  %s4005_s9 = scalar_lea.hbm %s5822_s8, 2048 }
 0x197   : > { %p4006_p12 = scmp.lt.u32.totalorder %s4707_s24, %s5822_s8  ;;  %p4007_p13 = scmp.lt.u32.totalorder %s4005_s9, %s4000_s22 }
 0x198   : > { %p4003_p11 = pnand %p4002_p3, %p4001_p1  ;;  %p4009_p2 = scmp.lt.u32.totalorder %s4000_s22, %s4707_s24 }
 0x199   : > { %p4008_p0 = por %p4007_p13, %p4006_p12 }
 0x19a   : > { %p4004_p5 = pneg %p4003_p11 }
 0x19b   : > { %p4010_p9 = por %p4009_p2, %p4008_p0 }
 0x19d   : > { %p4011_p10 = pnand %p4010_p9, %p4004_p5 }
 0x19f   : > { %4014 = shalt.err (!%p4011_p10)
}
 0x1a0   : > { %s4015_s6 = scalar_lea.vmem %s4696_s4, 512  ;;  %s4209_s21 = smov [#allocation5]  }
 0x1a1   : > { %p4016_p1 = scmp.ne.s32.totalorder %s4696_s4, %s4015_s6  ;;  %s4020_s20 = sshll.u32 %s4209_s21, 4  ;;  %s4021_s20 = int_to_ptr.vmem [resolvable:$false] %s4020_s20 }
 0x1a2   : > { %s4022_s19 = scalar_lea.vmem %s4021_s20, 1024  ;;  %p4023_p6 = scmp.lt.s32.totalorder %s4696_s4, %s4021_s20 }
 0x1a3   : > { %p4018_p11 = pnand %p4016_p1, %p4002_p3  ;;  %p4024_p12 = scmp.lt.s32.totalorder %s4022_s19, %s4015_s6 }
 0x1a5   : > { %p4019_p8 = pneg %p4018_p11  ;;  %p4025_p13 = por %p4024_p12, %p4023_p6 }
 0x1a7   : > { %p4026_p0 = pnand %p4025_p13, %p4019_p8 }
 0x1a9   : > { %4029 = shalt.err (!%p4026_p0)
}
 0x1aa   : > { %s5824_s22 = smov 8   ;;  %s607_s29 = scalar_lea.vmem [#allocation8], %s4688_s26 }
 0x1ab   : > { %3323 = dma.hbm_to_vmem [thread:$0]  (!%p4700_p7), %s4707_s24, 512, %s4696_s4, %s4714_s5, %s5804_s1, %s5804_s1, %s5824_s22  }
 0x1ac   : > { %s616_s17 = sshll.u32 %s607_s29, 4  ;;  %s603_s9 = sand.u32 1, %s4190_s25   ;;  %s4747_s17 = int_to_ptr.vmem [resolvable:$true] %s616_s17 }
 0x1ad   : > { %s4749_s0 = scalar_lea.sflag [#allocation9], %s603_s9  ;;  %s4030_s27 = scalar_lea.hbm %s4712_s3, 512 }
 0x1ae   : > { %p4031_p6 = scmp.ne.s32.totalorder %s4712_s3, %s4030_s27  ;;  %s4035_s20 = scalar_lea.hbm %s5823_s10, 2048 }
 0x1af   : > { %p4036_p2 = scmp.lt.u32.totalorder %s4712_s3, %s5823_s10  ;;  %p4037_p9 = scmp.lt.u32.totalorder %s4035_s20, %s4030_s27 }
 0x1b0   : > { %p4033_p8 = pnand %p4031_p6, %p4002_p3  ;;  %p4039_p1 = scmp.lt.u32.totalorder %s4030_s27, %s4712_s3 }
 0x1b1   : > { %p4038_p10 = por %p4037_p9, %p4036_p2 }
 0x1b2   : > { %p4034_p5 = pneg %p4033_p8 }
 0x1b3   : > { %p4040_p11 = por %p4039_p1, %p4038_p10 }
 0x1b5   : > { %p4041_p12 = pnand %p4040_p11, %p4034_p5 }
 0x1b7   : > { %4044 = shalt.err (!%p4041_p12)
}
 0x1b8   : > { %s4045_s4 = scalar_lea.vmem %s4747_s17, 512  ;;  %s4210_s26 = smov [#allocation8]  }
 0x1b9   : > { %p4046_p13 = scmp.ne.s32.totalorder %s4747_s17, %s4045_s4  ;;  %s4050_s24 = sshll.u32 %s4210_s26, 4  ;;  %s4051_s24 = int_to_ptr.vmem [resolvable:$false] %s4050_s24 }
 0x1ba   : > { %s4052_s8 = scalar_lea.vmem %s4051_s24, 1024  ;;  %p4053_p8 = scmp.lt.s32.totalorder %s4747_s17, %s4051_s24 }
 0x1bb   : > { %p4048_p0 = pnand %p4046_p13, %p4002_p3  ;;  %p4054_p2 = scmp.lt.s32.totalorder %s4052_s8, %s4045_s4 }
 0x1bd   : > { %p4049_p6 = pneg %p4048_p0  ;;  %p4055_p9 = por %p4054_p2, %p4053_p8 }
 0x1bf   : > { %p4056_p10 = pnand %p4055_p9, %p4049_p6 }
 0x1c1   : > { %4059 = shalt.err (!%p4056_p10)
}
 0x1c2   : > { %3326 = dma.hbm_to_vmem [thread:$0]  (!%p4700_p7), %s4712_s3, 512, %s4747_s17, %s4749_s0, %s5804_s1, %s5804_s1, %s5824_s22  }
 0x1c3   : > { %s5825_s5 = sld [smem:[#allocation47_spill]] }
 0x1c9   : > { %p5826_p3 = scmp.ne.s32.totalorder %s5825_s5, 0 }
 0x1cb   : > { %628 = sbr.rel (%p5826_p3) target bundleno = 1418 (0x58a), region = 80 }
 0x1d2   : > { %s5827_s29 = sld [smem:[#allocation41_spill]] }
 0x1d8   : > { %s4781_s9 = sand.u32 1, %s5827_s29  }
 0x1d9   : > { %s2961_s27 = sshll.u32 %s4781_s9, 5  ;;  %s631_s6 = scalar_lea.sflag [#allocation6], %s4781_s9 }
 0x1da   : > { %s4785_s21 = scalar_lea.vmem [#allocation5], %s2961_s27 }
 0x1db   : > { %4121 = dma.done.wait (%p4672_p4), %s631_s6, 512  }
 0x1dc   : > { %4123 = vsyncadd (%p4672_p4), %s631_s6, 4294966784  ;;  %s5828_s7 = sld [smem:[#allocation46_spill]]  ;;  %s4792_s22 = scalar_lea.vmem [#allocation8], %s2961_s27 }
 0x1e2   : > { %s639_s1 = sand.u32 1, %s5828_s7  }
 0x1e3   : > { %s640_s3 = scalar_lea.sflag [#allocation9], %s639_s1 }
 0x1e4   : > { %4125 = dma.done.wait (%p4672_p4), %s640_s3, 512  }
 0x1e5   : > { %4127 = vsyncadd (%p4672_p4), %s640_s3, 4294966784  ;;  %p5829_p7 = scmp.eq.s32.totalorder %s5828_s7, 0 }
 0x1e7   : > { %4129 = dma.done.wait (%p5829_p7), [#allocation9], 1024   ;;  %p5830_p5 = pmov %p5829_p7 }
 0x1e9   : > { %4131 = vsyncadd (%p5830_p5), [#allocation9], 4294966272  ;;  %p5831_p1 = pmov %p5830_p5 }
 0x1eb   : > { %4133 = dma.done.wait (%p5831_p1), [#allocation12], 1056   ;;  %p5832_p11 = pmov %p5831_p1 }
 0x1ec   : > { %p5833_p12 = pmov %p5831_p1 }
 0x1ed   : > { %4135 = vsyncadd (%p5832_p11), [#allocation12], 4294966240 }
 0x1ee   : > { %4137 = dma.done.wait (%p5833_p12), [#allocation15], 160   ;;  %p5834_p13 = pmov %p5831_p1 }
 0x1ef   : > { %p5835_p4 = pmov %p5831_p1 }
 0x1f0   : > { %4139 = vsyncadd (%p5834_p13), [#allocation15], 4294967136 }
 0x1f1   : > { %4141 = dma.done.wait (%p5835_p4), [#allocation18], 2080   ;;  %p5836_p0 = pmov %p5831_p1 }
 0x1f3   : > { %4143 = vsyncadd (%p5836_p0), [#allocation18], 4294965216  ;;  %p5837_p6 = pmov %p5836_p0 }
 0x1f4   : > { %p5838_p8 = pmov %p5836_p0 }
 0x1f5   : > { %4145 = dma.done.wait (%p5837_p6), [#allocation21], 2080  }
 0x1f6   : > { %4147 = vsyncadd (%p5838_p8), [#allocation21], 4294965216  ;;  %p5839_p2 = pmov %p5836_p0 }
 0x1f7   : > { %p5840_p9 = pmov %p5836_p0 }
 0x1f8   : > { %4149 = dma.done.wait (%p5839_p2), [#allocation24], 64  }
 0x1f9   : > { %4151 = vsyncadd (%p5840_p9), [#allocation24], 4294967232  ;;  %p5841_p10 = pmov %p5836_p0 }
 0x1fa   : > { %p5842_p3 = pmov %p5836_p0 }
 0x1fb   : > { %4153 = dma.done.wait (%p5841_p10), [#allocation27], 2064  }
 0x1fc   : > { %4155 = vsyncadd (%p5842_p3), [#allocation27], 4294965232  ;;  %s4826_s2 = scalar_lea.vmem [#allocation29], %s2961_s27  ;;  %s5843_s17 = sld [smem:[#allocation43_spill]] }
 0x202   : > { %p2977_p7 = scmp.ne.s32.totalorder %s5843_s17, 0 }
 0x203   : > { %v755_v0 = vlaneseq (!%p2977_p7)  ;;  %v4211_v1 = vmov (!%p2977_p7), 0.0  }
 0x204   : > { %754 = sbr.rel (%p2977_p7) target bundleno = 523 (0x20b), region = 144  ;;  %760 = vst [vmem:[#allocation3] sm:$0x77] (!%p2977_p7), %v4211_v1 }
 0x205   : > { %vm757_vm0 = vcmp.lt.s32.totalorder (!%p2977_p7), %v755_v0, 256 }
 0x206   : > { %759 = vst.msk [vmem:[#allocation2] sm:$0x3] (!%p2977_p7), %vm757_vm0, %v4211_v1 }
 0x20b PF: > { %v3448_v2 = vld [vmem:[#allocation10 + $0x4] ss:$8 sps:$4 sm:$0xff]   ;;  %v3450_v3 = vld [vmem:[#allocation10] ss:$8 sps:$4 sm:$0xff]   ;;  %v4212_v4 = vmov 0   ;;  %vm831_vm1 = vcmask 523264   ;;  %v5764_v56 = vlaneseq }
 0x20c   : > { %870 = vmatprep.mubr.bf16.mxu1 %v4212_v4  ;;  %3447 = vset.pattern.permute.xlu1 %v4212_v4  ;;  %v3451_v5 = vld [vmem:[#allocation10 + $0x14] ss:$8 sps:$4 sm:$0xff]   ;;  %v3453_v6 = vld [vmem:[#allocation10 + $0x10] ss:$8 sps:$4 sm:$0xff]   ;;  %v3454_v7 = vld [vmem:[#allocation10 + $0x24] ss:$8 sps:$4 sm:$0xff]  }
 0x20d   : > { %838 = vmatprep.subr.bf16.mxu1 %v3448_v2  ;;  %3446 = vset.pattern.permute.xlu0 %v4212_v4  ;;  %v3456_v8 = vld [vmem:[#allocation10 + $0x20] ss:$8 sps:$4 sm:$0xff]   ;;  %v3457_v9 = vld [vmem:[#allocation10 + $0x34] ss:$8 sps:$4 sm:$0xff]   ;;  %v3459_v10 = vld [vmem:[#allocation10 + $0x30] ss:$8 sps:$4 sm:$0xff]  }
 0x20e   : > { %839 = vmatpush1.bf16.msra.mxu1 %v3450_v3  ;;  %v761_v11 = vld [vmem:[%s4785_s21] sm:$0xff]  ;;  %v762_v12 = vld [vmem:[%s4785_s21 + $0x8] sm:$0xff]  ;;  %v3463_v17 = vld [vmem:[#allocation13 + $0x10] ss:$8 sps:$4 sm:$0xff]   ;;  %v4213_v47 = vmov 0.0   ;;  %v4862_v60 = vshrl.u32 %v5764_v56, 7 }
 0x20f   : > { %840 = vmatprep.subr.bf16.mxu1 %v3451_v5  ;;  %v3462_v13 = vld [vmem:[#allocation13 + $0x4] ss:$8 sps:$4 sm:$0xff]   ;;  %v3460_v14 = vld [vmem:[#allocation13] ss:$8 sps:$4 sm:$0xff]   ;;  %v769_v15 = vpack.c.bf16 %v762_v12, %v761_v11  ;;  %v3465_v16 = vld [vmem:[#allocation13 + $0x14] ss:$8 sps:$4 sm:$0xff]  }
 0x210   : > { %v763_v18 = vld [vmem:[%s4785_s21 + $0x10] sm:$0xff]  ;;  %v764_v19 = vld [vmem:[%s4785_s21 + $0x18] sm:$0xff]  ;;  %v3466_v21 = vld [vmem:[#allocation13 + $0x20] ss:$8 sps:$4 sm:$0xff]   ;;  %5844 = vst [vmem:[#allocation48_spill] sm:$0xff] %v4862_v60  ;;  %v4867_v63 = vsub.s32 1, %v4862_v60 }
 0x211   : > { %v3468_v20 = vld [vmem:[#allocation13 + $0x24] ss:$8 sps:$4 sm:$0xff]   ;;  %v770_v22 = vpack.c.bf16 %v764_v19, %v763_v18  ;;  %v3471_v23 = vld [vmem:[#allocation13 + $0x34] ss:$8 sps:$4 sm:$0xff]   ;;  %v3469_v24 = vld [vmem:[#allocation13 + $0x30] ss:$8 sps:$4 sm:$0xff]  }
 0x212   : > { %841 = vmatpush1.bf16.msra.mxu1 %v3453_v6  ;;  %v3472_v25 = vld [vmem:[#allocation19] sm:$0xff]   ;;  %v3474_v27 = vld [vmem:[#allocation19 + $0x8] sm:$0xff]   ;;  %v3476_v29 = vld [vmem:[#allocation19 + $0x10] sm:$0xff]   ;;  %v4873_v3 = vsub.s32 0, %v4862_v60  ;;  %vm1117_vm6 = vcmask 1040384   ;;  %vm1176_vm7 = vcmask 1041408  }
 0x213   : > { %842 = vmatprep.subr.bf16.mxu1 %v3454_v7  ;;  %v3473_v26 = vld [vmem:[#allocation22] sm:$0xff]   ;;  %3142 = vmatprep.subr.bf16.mxu0 %v3472_v25  ;;  %v3475_v28 = vld [vmem:[#allocation22 + $0x8] sm:$0xff]   ;;  %v3477_v30 = vld [vmem:[#allocation22 + $0x10] sm:$0xff]   ;;  %vm1231_vm8 = vcmask 1042432   ;;  %s5874_s0 = sld [smem:[#allocation43_spill]]  ;;  %s5875_s20 = sld [smem:[#allocation44_spill]] }
 0x214   : > { %3143 = vmatpush3.bf16.msra.mxu0 %v3472_v25  ;;  %v3478_v31 = vld [vmem:[#allocation19 + $0x18] sm:$0xff]   ;;  %v3480_v33 = vld [vmem:[#allocation19 + $0x20] sm:$0xff]   ;;  %v3482_v35 = vld [vmem:[#allocation19 + $0x28] sm:$0xff]   ;;  %s2696_s24 = sshll.u32 %s4826_s2, 4  ;;  %s5876_s27 = sld [smem:[#allocation65_spill]]  ;;  %s5663_s24 = int_to_ptr.vmem [resolvable:$true] %s2696_s24 }
 0x215   : > { %3144 = vmatprep.subr.bf16.mxu0 %v3474_v27  ;;  %v3479_v32 = vld [vmem:[#allocation22 + $0x18] sm:$0xff]   ;;  %v3481_v34 = vld [vmem:[#allocation22 + $0x20] sm:$0xff]   ;;  %v3483_v36 = vld [vmem:[#allocation22 + $0x28] sm:$0xff]   ;;  %s2681_s21 = scalar_lea.sflag [#allocation7], %s4781_s9  ;;  %s4060_s7 = scalar_lea.vmem %s5663_s24, 512 }
 0x216   : > { %843 = vmatpush1.bf16.msra.mxu1 %v3456_v8  ;;  %v3484_v37 = vld [vmem:[#allocation19 + $0x30] sm:$0xff]   ;;  %v3486_v39 = vld [vmem:[#allocation19 + $0x38] sm:$0xff]   ;;  %v4837_v41 = vld [vmem:[#allocation19 + $0x40] sm:$0xff]   ;;  %p4061_p5 = scmp.ne.s32.totalorder %s5663_s24, %s4060_s7  ;;  %p5877_p1 = scmp.ne.s32.totalorder %s5818_s18, 0 }
 0x217   : > { %844 = vmatprep.subr.bf16.mxu1 %v3457_v9  ;;  %v3485_v38 = vld [vmem:[#allocation22 + $0x30] sm:$0xff]   ;;  %v3487_v40 = vld [vmem:[#allocation22 + $0x38] sm:$0xff]   ;;  %v4839_v42 = vld [vmem:[#allocation22 + $0x40] sm:$0xff]   ;;  %v1105_v9 = vsub.s32 6, %v4862_v60  ;;  %s4215_s1 = smov [#allocation29]  }
 0x218   : > { %3145 = vmatpush3.bf16.msra.mxu0 %v3474_v27  ;;  %v767_v43 = vld [vmem:[%s4792_s22 + $0x10] sm:$0xff]  ;;  %v765_v44 = vld [vmem:[%s4792_s22] sm:$0xff]  ;;  %v768_v45 = vld [vmem:[%s4792_s22 + $0x18] sm:$0xff]  ;;  %p4062_p11 = pnand %p4061_p5, %p5877_p1  ;;  %s4064_s3 = sshll.u32 %s4215_s1, 4  ;;  %s4065_s3 = int_to_ptr.vmem [resolvable:$false] %s4064_s3 }
 0x219   : > { %3146 = vmatprep.subr.bf16.mxu0 %v3476_v29  ;;  %vm1972_vm2 = vcmp.eq.s32.totalorder %v767_v43, 0  ;;  %vm1970_vm3 = vcmp.eq.s32.totalorder %v765_v44, 0  ;;  %vm1973_vm4 = vcmp.eq.s32.totalorder %v768_v45, 0  ;;  %v766_v46 = vld [vmem:[%s4792_s22 + $0x8] sm:$0xff]  ;;  %v971_v62 = vld [vmem:[#allocation14] sm:$0x3]  ;;  %p4067_p13 = scmp.lt.s32.totalorder %s5663_s24, %s4065_s3 }
 0x21a   : > { %845 = vmatpush1.bf16.msra.mxu1 %v3459_v10  ;;  %v3049_v48 = vsel %vm1972_vm2, 1.0, %v4213_v47  ;;  %v3047_v49 = vsel %vm1970_vm3, 1.0, %v4213_v47  ;;  %vm1971_vm5 = vcmp.eq.s32.totalorder %v766_v46, 0  ;;  %v3050_v50 = vsel %vm1973_vm4, 1.0, %v4213_v47  ;;  %v4876_v8 = vld [vmem:[#allocation3] sm:$0x77]  ;;  %p4063_p12 = pneg %p4062_p11 }
 0x21b   : > { %1023 = vmatprep.subr.bf16.mxu1 %v3462_v13  ;;  %1994 = vperm.xlu1 %3447, %v3049_v48   ;;  %v3048_v51 = vsel %vm1971_vm5, 1.0, %v4213_v47  ;;  %v4870_v1 = vrot.slane %v971_v62, %v4867_v63  ;;  %v976_v6 = vrot.slane %v971_v62, %v4873_v3  ;;  %v1078_v7 = vld [vmem:[#allocation16 + $0x3] ss:$4 sm:$0x3]  ;;  %v1101_v13 = vsub.s32 2, %v4862_v60  ;;  %s3069_s19 = sshll.u32 %s5874_s0, 2 }
 0x21c   : > { %3147 = vmatpush3.bf16.msra.mxu0 %v3476_v29  ;;  %1984 = vperm.xlu0 %3446, %v3047_v49   ;;  %v1143_v11 = vld [vmem:[#allocation16 + $0x2] ss:$4 sm:$0x3]  ;;  %v1202_v12 = vld [vmem:[#allocation16 + $0x1] ss:$4 sm:$0x3]  ;;  %v4896_v19 = vrot.slane %v1078_v7, %v4867_v63 }
 0x21d   : > { %2986 = vmatmul.mubr.msk.bf16.vlgmr.msra.gmra.mrb[0].mxu1 %vm831_vm1, %v769_v15  ;;  %3148 = vmatprep.subr.bf16.mxu0 %v3478_v31  ;;  %v1284_v27 = vld [vmem:[#allocation17] sm:$0x3]  ;;  %v1102_v29 = vrot.slane %v4876_v8, %v1101_v13  ;;  %vm2161_vm2 = vcmask 1043456   ;;  %s3070_s4 = sshll.u32 %s5875_s20, 3  ;;  %s4066_s22 = scalar_lea.vmem %s4065_s3, 1024 }
 0x21e   : > { %1024 = vmatpush1.bf16.msra.mxu1 %v3460_v14  ;;  %880 = vmatprep.mubr.bf16.mxu1 %v4212_v4  ;;  %v4884_v14 = vrot.slane %v1078_v7, %v4873_v3  ;;  %v4931_v43 = vrot.slane %v1284_v27, %v4867_v63  ;;  %s2693_s26 = sadd.s32 %s3070_s4, %s3069_s19  ;;  %p4068_p4 = scmp.lt.s32.totalorder %s4066_s22, %s4060_s7 }
 0x21f   : > { %1025 = vmatprep.subr.bf16.mxu1 %v3465_v16  ;;  %1999 = vperm.xlu1 %3447, %v3050_v50   ;;  %v1256_v16 = vld [vmem:[#allocation16] ss:$4 sm:$0x3]  ;;  %s3071_s8 = sshll.u32 %s2693_s26, 7 }
 0x220   : > { %3149 = vmatpush3.bf16.msra.mxu0 %v3478_v31  ;;  %1989 = vperm.xlu0 %3446, %v3048_v51   ;;  %v4912_v31 = vrot.slane %v1202_v12, %v4873_v3  ;;  %s5670_s6 = scalar_lea.hbm %s5876_s27, %s3071_s8  ;;  %p4069_p0 = por %p4068_p4, %p4067_p13 }
 0x221   : > { %3150 = vmatprep.subr.bf16.mxu0 %v3480_v33 }
 0x222   : > { %1026 = vmatpush1.bf16.msra.mxu1 %v3463_v17  ;;  %v4891_v17 = vcombine.high %v4876_v8, %v4876_v8  ;;  %p4070_p6 = pnand %p4069_p0, %p4063_p12 }
 0x223   : > { %1027 = vmatprep.subr.bf16.mxu1 %v3468_v20  ;;  %v1106_v20 = vrot.slane %v4876_v8, %v1105_v9 }
 0x224   : > { %3151 = vmatpush3.bf16.msra.mxu0 %v3480_v33 }
 0x225   : > { %2987 = vmatmul.mubr.msk.bf16.gmra.mrb[4].mxu1 %vm831_vm1, %v770_v22  ;;  %3152 = vmatprep.subr.bf16.mxu0 %v3482_v35 }
 0x226   : > { %1028 = vmatpush1.bf16.msra.mxu1 %v3466_v21  ;;  %1055 = vmatprep.mubr.bf16.mxu1 %v4212_v4 }
 0x227   : > { %1029 = vmatprep.subr.bf16.mxu1 %v3471_v23  ;;  %v4901_v23 = vrot.slane %v1143_v11, %v4867_v63 }
 0x228   : > { %3153 = vmatpush3.bf16.msra.mxu0 %v3482_v35 }
 0x229   : > { %3154 = vmatprep.subr.bf16.mxu0 %v3484_v37 }
 0x22a   : > { %1030 = vmatpush1.bf16.msra.mxu1 %v3469_v24  ;;  %v4904_v24 = vrot.slane %v1143_v11, %v4873_v3 }
 0x22b   : > { %3162 = vmatprep.subr.bf16.mxu1 %v3473_v26 }
 0x22c   : > { %3155 = vmatpush3.bf16.msra.mxu0 %v3484_v37 }
 0x22d   : > { %2996 = vmatmul.mubr.msk.bf16.vlgmr.msra.gmra.mrb[8].mxu1 %vm831_vm1, %v769_v15  ;;  %3156 = vmatprep.subr.bf16.mxu0 %v3486_v39 }
 0x22e   : > { %1065 = vmatprep.mubr.bf16.mxu1 %v4212_v4  ;;  %3163 = vmatpush3.bf16.msra.mxu1 %v3473_v26  ;;  %v4907_v26 = vrot.slane %v1202_v12, %v4867_v63 }
 0x22f   : > { %3164 = vmatprep.subr.bf16.mxu1 %v3475_v28 }
 0x230   : > { %3157 = vmatpush3.bf16.msra.mxu0 %v3486_v39 }
 0x231   : > { %3182 = vmatprep.subr.bf16.mxu0 %v4837_v41 }
 0x232   : > { %3165 = vmatpush3.bf16.msra.mxu1 %v3475_v28 }
 0x233   : > { %3166 = vmatprep.subr.bf16.mxu1 %v3477_v30 }
 0x235   : > { %2997 = vmatmul.mubr.msk.bf16.gmra.mrb[12].mxu1 %vm831_vm1, %v770_v22 }
 0x236   : > { %3167 = vmatpush3.bf16.msra.mxu1 %v3477_v30  ;;  %v1172_v30 = vrot.slane %v4876_v8, 1 }
 0x237   : > { %3168 = vmatprep.subr.bf16.mxu1 %v3479_v32 }
 0x23a   : > { %3169 = vmatpush3.bf16.msra.mxu1 %v3479_v32  ;;  %v4915_v32 = vrot.slane %v1256_v16, %v4873_v3 }
 0x23b   : > { %3170 = vmatprep.subr.bf16.mxu1 %v3481_v34 }
 0x23e   : > { %3171 = vmatpush3.bf16.msra.mxu1 %v3481_v34 }
 0x23f   : > { %3172 = vmatprep.subr.bf16.mxu1 %v3483_v36 }
 0x242   : > { %3173 = vmatpush3.bf16.msra.mxu1 %v3483_v36  ;;  %v4921_v36 = vrot.slane %v1256_v16, %v4867_v63 }
 0x243   : > { %3174 = vmatprep.subr.bf16.mxu1 %v3485_v38 }
 0x246   : > { %3175 = vmatpush3.bf16.msra.mxu1 %v3485_v38 }
 0x247   : > { %3176 = vmatprep.subr.bf16.mxu1 %v3487_v40 }
 0x24a   : > { %3177 = vmatpush3.bf16.msra.mxu1 %v3487_v40  ;;  %v4928_v40 = vrot.slane %v1284_v27, %v4873_v3 }
 0x24b   : > { %3202 = vmatprep.subr.bf16.mxu1 %v4839_v42 }
 0x2f0   : > { %v4847_v52 = vpop.f32.mrb[0].mxu1 }
 0x2f1   : > { %v4849_v53 = vpop.f32.mrb[1].mxu1 }
 0x2f2   : > { %v4851_v54 = vpop.f32.mrb[2].mxu1 }
 0x2f3   : > { %v4853_v55 = vpop.f32.mrb[3].mxu1 }
 0x2f8   : > { %v4855_v57 = vpop.f32.mrb[4].mxu1 }
 0x2f9   : > { %v4857_v58 = vpop.f32.mrb[5].mxu1 }
 0x2fa   : > { %v4859_v59 = vpop.f32.mrb[6].mxu1 }
 0x2fb   : > { %v4864_v61 = vpop.f32.mrb[7].mxu1 }
 0x2fc   : > { %5845 = vst [vmem:[#allocation49_spill] sm:$0xff] %v4864_v61 }
 0x300   : > { %v1057_v0 = vpop.f32.mrb[8].mxu1 }
 0x301   : > { %v1059_v2 = vpop.f32.mrb[9].mxu1  ;;  %v4893_v18 = vadd.f32 %v1057_v0, %v976_v6 }
 0x302   : > { %v1061_v4 = vpop.f32.mrb[10].mxu1  ;;  %v4880_v10 = vadd.f32 %v1059_v2, %v4870_v1 }
 0x303   : > { %v1063_v5 = vpop.f32.mrb[11].mxu1  ;;  %v4917_v33 = vadd.f32 %v1061_v4, %v976_v6  ;;  %v1090_v38 = vmul.f32 %v4884_v14, %v4893_v18  ;;  %v1118_v39 = vrot.slane %v4893_v18, 7  ;;  %v1177_v44 = vrot.slane %v4893_v18, 6 }
 0x304   : > { %v4887_v15 = vadd.f32 %v1063_v5, %v4870_v1  ;;  %v1119_v22 = vrot.slane %v4880_v10, 7  ;;  %v1232_v48 = vrot.slane %v4893_v18, 5  ;;  %v1091_v62 = vmul.f32 %v4896_v19, %v4880_v10 }
 0x305   : > { %v1120_v2 = vrot.slane %v4917_v33, 7  ;;  %v1140_v11 = vsel %vm1117_vm6, %v1102_v29, %v1118_v39  ;;  %v1092_v27 = vmul.f32 %v4884_v14, %v4917_v33  ;;  %v1234_v56 = vrot.slane %v4917_v33, 5 }
 0x306   : > { %v1122_v34 = vrot.slane %v4887_v15, 7  ;;  %v1141_v45 = vsel %vm1117_vm6, %v1106_v20, %v1119_v22  ;;  %v1093_v49 = vmul.f32 %v4896_v19, %v4887_v15  ;;  %v5766_v12 = vrot.slane %v4887_v15, 6 }
 0x307   : > { %v1156_v5 = vmul.f32 %v4901_v23, %v1141_v45  ;;  %v5768_v29 = vrot.slane %v4887_v15, 5 }
 0x308   : > { %v1067_v21 = vpop.f32.mrb[12].mxu1  ;;  %v1123_v46 = vsel %vm1117_vm6, %v1119_v22, %v1122_v34 }
 0x309   : > { %v1069_v25 = vpop.f32.mrb[13].mxu1  ;;  %v4936_v47 = vadd.f32 %v1067_v21, %v976_v6  ;;  %v1158_v50 = vmul.f32 %v4901_v23, %v1123_v46 }
 0x30a   : > { %v1071_v28 = vpop.f32.mrb[14].mxu1  ;;  %v4943_v51 = vadd.f32 %v1069_v25, %v4870_v1 }
 0x30b   : > { %v1073_v35 = vpop.f32.mrb[15].mxu1  ;;  %v1124_v4 = vrot.slane %v4936_v47, 7  ;;  %v4952_v9 = vadd.f32 %v1158_v50, %v1093_v49  ;;  %v1094_v20 = vmul.f32 %v4884_v14, %v4936_v47  ;;  %v1072_v25 = vadd.f32 %v1071_v28, %v976_v6 }
 0x30c   : > { %v1126_v16 = vrot.slane %v4943_v51, 7  ;;  %v5765_v18 = vrot.slane %v4943_v51, 6  ;;  %v5767_v22 = vrot.slane %v4943_v51, 5  ;;  %v1179_v49 = vrot.slane %v4917_v33, 6 }
 0x30d   : > { %v1125_v13 = vsel %vm1117_vm6, %v1120_v2, %v1124_v4  ;;  %v4976_v28 = vadd.f32 %v1156_v5, %v1091_v62  ;;  %v1128_v62 = vrot.slane %v1072_v25, 7  ;;  %v1187_v5 = vrot.slane %v1072_v25, 6 }
 0x30e   : > { %v1159_v21 = vmul.f32 %v4904_v24, %v1125_v13  ;;  %v1127_v45 = vsel %vm1117_vm6, %v1122_v34, %v1126_v16  ;;  %v1186_v46 = vsel %vm1176_vm7, %v5766_v12, %v5765_v18  ;;  %v1095_v13 = vmul.f32 %v4896_v19, %v4943_v51 }
 0x30f   : > { %v1160_v6 = vmul.f32 %v4901_v23, %v1127_v45  ;;  %v1183_v34 = vrot.slane %v4936_v47, 6  ;;  %v4985_v18 = vsel %vm1231_vm8, %v5768_v29, %v5767_v22  ;;  %v1219_v7 = vmul.f32 %v4907_v26, %v1186_v46 }
 0x310   : > { %v1167_v50 = vadd.f32 %v1159_v21, %v1094_v20  ;;  %v1238_v20 = vrot.slane %v4936_v47, 5  ;;  %v1096_v45 = vmul.f32 %v4884_v14, %v1072_v25  ;;  %v1242_v37 = vrot.slane %v1072_v25, 5 }
 0x311   : > { %v1168_v21 = vadd.f32 %v1160_v6, %v1095_v13  ;;  %v4991_v33 = vadd.f32 %v1073_v35, %v4870_v1  ;;  %v1121_v12 = vsel %vm1117_vm6, %v1118_v39, %v1120_v2  ;;  %v1155_v22 = vmul.f32 %v4904_v24, %v1140_v11 }
 0x312   : > { %v1180_v29 = vsel %vm1176_vm7, %v1177_v44, %v1179_v49  ;;  %v1157_v35 = vmul.f32 %v4904_v24, %v1121_v12  ;;  %v1199_v39 = vsel %vm1176_vm7, %v1172_v30, %v1177_v44  ;;  %v1235_v6 = vsel %vm1231_vm8, %v1232_v48, %v1234_v56 }
 0x313   : > { %v4993_v0 = vadd.f32 %v1219_v7, %v1168_v21  ;;  %v1097_v47 = vmul.f32 %v4896_v19, %v4991_v33  ;;  %v1130_v46 = vrot.slane %v4991_v33, 7  ;;  %v1189_v14 = vrot.slane %v4991_v33, 6 }
 0x314   : > { %v1244_v13 = vrot.slane %v4991_v33, 5  ;;  %v1304_v1 = vcombine.high %v1072_v25, %v4991_v33  ;;  %v1163_v7 = vadd.f32 %v1155_v22, %v1090_v38  ;;  %v1214_v11 = vmul.f32 %v4912_v31, %v1199_v39 }
 0x315   : > { %v1131_v2 = vsel %vm1117_vm6, %v1126_v16, %v1130_v46  ;;  %v1216_v19 = vmul.f32 %v4912_v31, %v1180_v29  ;;  %v1165_v61 = vadd.f32 %v1157_v35, %v1092_v27  ;;  %v1254_v12 = vsel %vm1231_vm8, %v4876_v8, %v1232_v48 }
 0x316   : > { %v1162_v21 = vmul.f32 %v4901_v23, %v1131_v2  ;;  %v2998_v60 = vrot.slane %v1304_v1, 9  ;;  %v1222_v38 = vadd.f32 %v1214_v11, %v1163_v7  ;;  %v1268_v22 = vmul.f32 %v4915_v32, %v1254_v12 }
 0x317   : > { %v1270_v30 = vmul.f32 %v4915_v32, %v1235_v6  ;;  %v1129_v44 = vsel %vm1117_vm6, %v1124_v4, %v1128_v62  ;;  %v1224_v25 = vadd.f32 %v1216_v19, %v1165_v61  ;;  %v1184_v33 = vsel %vm1176_vm7, %v1179_v49, %v1183_v34 }
 0x318   : > { %v1170_v16 = vadd.f32 %v1162_v21, %v1097_v47  ;;  %1308 = vst [vmem:[#allocation3] sm:$0x77] %v2998_v60  ;;  %v1161_v29 = vmul.f32 %v4904_v24, %v1129_v44  ;;  %v1276_v23 = vadd.f32 %v1268_v22, %v1222_v38  ;;  %v1188_v27 = vsel %vm1176_vm7, %v1183_v34, %v1187_v5 }
 0x319   : > { %v1218_v46 = vmul.f32 %v4912_v31, %v1184_v33  ;;  %v1239_v8 = vsel %vm1231_vm8, %v1234_v56, %v1238_v20  ;;  %v1278_v48 = vadd.f32 %v1270_v30, %v1224_v25  ;;  %v1220_v35 = vmul.f32 %v4912_v31, %v1188_v27 }
 0x31a   : > { %v1169_v1 = vadd.f32 %v1161_v29, %v1096_v45  ;;  %v1243_v4 = vsel %vm1231_vm8, %v1238_v20, %v1242_v37  ;;  %v5026_v60 = vadd.f32 %v4928_v40, %v1276_v23  ;;  %v1272_v24 = vmul.f32 %v4915_v32, %v1239_v8 }
 0x31b   : > { %v1226_v61 = vadd.f32 %v1218_v46, %v1167_v50  ;;  %v1274_v49 = vmul.f32 %v4915_v32, %v1243_v4  ;;  %v5031_v34 = vadd.f32 %v4928_v40, %v1278_v48  ;;  %v5846_v56 = vrot.slane %v4887_v15, 6  ;;  %v3491_v46 = vld [vmem:[#allocation22 + $0x48] sm:$0xff]  }
 0x31c   : > { %v1228_v62 = vadd.f32 %v1220_v35, %v1169_v1  ;;  %v5847_v45 = vrot.slane %v4880_v10, 6  ;;  %v5849_v20 = vrot.slane %v4891_v17, 1  ;;  %v5850_v7 = vrot.slane %v4887_v15, 5  ;;  %v3493_v1 = vld [vmem:[#allocation22 + $0x50] sm:$0xff]   ;;  %v3498_v35 = vld [vmem:[#allocation19 + $0x68] sm:$0xff]  }
 0x31d   : > { %v1280_v5 = vadd.f32 %v1272_v24, %v1226_v61  ;;  %v5851_v39 = vrot.slane %v4880_v10, 5  ;;  %v1309_v11 = vpack.c.bf16 %v5031_v34, %v5026_v60  ;;  %v5853_v10 = vrot.slane %v4943_v51, 6  ;;  %v3499_v4 = vld [vmem:[#allocation22 + $0x68] sm:$0xff]   ;;  %v3501_v24 = vld [vmem:[#allocation22 + $0x70] sm:$0xff]  }
 0x31e   : > { %v1182_v31 = vsel %vm1176_vm7, %v5847_v45, %v5846_v56  ;;  %v5848_v37 = vmov %v5847_v45  ;;  %v1282_v19 = vadd.f32 %v1274_v49, %v1228_v62  ;;  %v5854_v25 = vrot.slane %v4943_v51, 5  ;;  %v3500_v61 = vld [vmem:[#allocation19 + $0x70] sm:$0xff]   ;;  %v3502_v49 = vld [vmem:[#allocation19 + $0x78] sm:$0xff]  }
 0x31f   : > { %v1200_v50 = vsel %vm1176_vm7, %v5849_v20, %v5848_v37  ;;  %v1217_v32 = vmul.f32 %v4907_v26, %v1182_v31  ;;  %v1237_v2 = vsel %vm1231_vm8, %v5851_v39, %v5850_v7  ;;  %v5852_v6 = vmov %v5851_v39  ;;  %3158 = vmatprep.mubr.bf16.mxu0 %v1309_v11  ;;  %v3503_v62 = vld [vmem:[#allocation22 + $0x78] sm:$0xff]   ;;  %v5097_v37 = vld [vmem:[#allocation25] sm:$0x3] }
 0x320   : > { %v1215_v47 = vmul.f32 %v4907_v26, %v1200_v50  ;;  %v1255_v21 = vsel %vm1231_vm8, %v4891_v17, %v5852_v6  ;;  %v1271_v12 = vmul.f32 %v4921_v36, %v1237_v2  ;;  %v5058_v38 = vadd.f32 %v4928_v40, %v1280_v5  ;;  %3178 = vmatprep.mubr.bf16.mxu1 %v1309_v11  ;;  %v5116_v6 = vld [vmem:[#allocation20] sm:$0x3] }
 0x321   : > { %v1225_v22 = vadd.f32 %v1217_v32, %v4952_v9  ;;  %v1269_v30 = vmul.f32 %v4921_v36, %v1255_v21  ;;  %v5064_v44 = vadd.f32 %v4928_v40, %v1282_v19  ;;  %v1190_v17 = vsel %vm1176_vm7, %v5853_v10, %v1189_v14  ;;  %v3490_v40 = vld [vmem:[#allocation19 + $0x48] sm:$0xff]   ;;  %v5100_v32 = vld [vmem:[#allocation23] sm:$0x3] }
 0x322   : > { %v1223_v15 = vadd.f32 %v1215_v47, %v4976_v28  ;;  %v1245_v29 = vsel %vm1231_vm8, %v5854_v25, %v1244_v13  ;;  %v1221_v28 = vmul.f32 %v4907_v26, %v1190_v17  ;;  %v1273_v9 = vmul.f32 %v4921_v36, %v4985_v18  ;;  %v779_v47 = vld [vmem:[#allocation11] sm:$0x3] }
 0x323   : > { %v1279_v23 = vadd.f32 %v1271_v12, %v1225_v22  ;;  %v1311_v27 = vpack.c.bf16 %v5064_v44, %v5058_v38  ;;  %v1275_v8 = vmul.f32 %v4921_v36, %v1245_v29  ;;  %v3492_v36 = vld [vmem:[#allocation19 + $0x50] sm:$0xff]   ;;  %v1905_v20 = vand.u32 2147483647, %v5097_v37 }
 0x324   : > { %v1277_v33 = vadd.f32 %v1269_v30, %v1223_v15  ;;  %v1229_v13 = vadd.f32 %v1221_v28, %v1170_v16  ;;  %v1281_v48 = vadd.f32 %v1273_v9, %v4993_v0  ;;  %v3494_v0 = vld [vmem:[#allocation19 + $0x58] sm:$0xff]   ;;  %v1840_v39 = vrot.slane %v5100_v32, %v4873_v3 }
 0x325   : > { %v5082_v51 = vadd.f32 %v4931_v43, %v1279_v23  ;;  %3159 = vmatmul.mubr.bf16.vlgmr.msra.gmra.mrb[0].mxu0 %v1311_v27  ;;  %3179 = vmatmul.mubr.bf16.vlgmr.msra.gmra.mrb[16].mxu1 %v1311_v27  ;;  %v3495_v16 = vld [vmem:[#allocation22 + $0x58] sm:$0xff]   ;;  %v1906_v50 = vsub.f32 0.0, %v1905_v20  ;;  %v5110_v2 = vrot.slane %v779_v47, %v4867_v63 }
 0x326   : > { %v5079_v14 = vadd.f32 %v4931_v43, %v1277_v33  ;;  %3183 = vmatpush3.bf16.msra.mxu0 %v4837_v41  ;;  %3203 = vmatpush3.bf16.msra.mxu1 %v4839_v42  ;;  %v1283_v18 = vadd.f32 %v1275_v8, %v1229_v13  ;;  %v3496_v41 = vld [vmem:[#allocation19 + $0x60] sm:$0xff]   ;;  %v5093_v45 = vadd.f32 %v4931_v43, %v1281_v48 }
 0x327   : > { %3184 = vmatprep.subr.bf16.mxu0 %v3490_v40  ;;  %3204 = vmatprep.subr.bf16.mxu1 %v3491_v46  ;;  %v3497_v42 = vld [vmem:[#allocation22 + $0x60] sm:$0xff]   ;;  %v1907_v5 = vmul.f32 1.442695, %v1906_v50  ;;  %v5121_v10 = vadd.f32 %v4849_v53, %v5110_v2  ;;  %v1772_v33 = vrot.slane %v5116_v6, %v4873_v3  ;;  %v5133_v8 = vadd.f32 %v4853_v55, %v5110_v2 }
 0x328   : > { %v1310_v26 = vpack.c.bf16 %v5082_v51, %v5079_v14  ;;  %v5090_v56 = vadd.f32 %v4931_v43, %v1283_v18  ;;  %v5103_v43 = vrot.slane %v779_v47, %v4873_v3 }
 0x329   : > { %3520 = vpow2.f32 %v1907_v5  ;;  %5855 = vst [vmem:[#allocation50_spill] sm:$0xff] %v5133_v8  ;;  %v892_v13 = vmul.f32 %v5121_v10, %v5121_v10 }
 0x32a   : > { %3198 = vmatprep.mubr.bf16.mxu0 %v1310_v26  ;;  %3218 = vmatprep.mubr.bf16.mxu1 %v1310_v26  ;;  %v1312_v31 = vpack.c.bf16 %v5090_v56, %v5093_v45  ;;  %v5114_v11 = vadd.f32 %v4847_v52, %v5103_v43  ;;  %v5139_v48 = vadd.f32 %v4855_v57, %v5103_v43 }
 0x32b   : > { %3185 = vmatpush3.bf16.msra.mxu0 %v3490_v40  ;;  %3205 = vmatpush3.bf16.msra.mxu1 %v3491_v46  ;;  %v5129_v40 = vadd.f32 %v4851_v54, %v5103_v43  ;;  %v5144_v54 = vadd.f32 %v4857_v58, %v5110_v2 }
 0x32c   : > { %3186 = vmatprep.subr.bf16.mxu0 %v3492_v36  ;;  %3206 = vmatprep.subr.bf16.mxu1 %v3493_v1  ;;  %v891_v52 = vmul.f32 %v5114_v11, %v5114_v11 }
 0x32d   : > { %5856 = vst [vmem:[#allocation51_spill] sm:$0xff] %v5144_v54  ;;  %v893_v55 = vmul.f32 %v5129_v40, %v5129_v40  ;;  %v896_v58 = vmul.f32 %v5144_v54, %v5144_v54 }
 0x32e   : > { %v899_v18 = vmul.f32 %v891_v52, %v5114_v11 }
 0x32f   : > { %3187 = vmatpush3.bf16.msra.mxu0 %v3492_v36  ;;  %3207 = vmatpush3.bf16.msra.mxu1 %v3493_v1 }
 0x330   : > { %3188 = vmatprep.subr.bf16.mxu0 %v3494_v0  ;;  %3208 = vmatprep.subr.bf16.mxu1 %v3495_v16 }
 0x333   : > { %3189 = vmatpush3.bf16.msra.mxu0 %v3494_v0  ;;  %3209 = vmatpush3.bf16.msra.mxu1 %v3495_v16  ;;  %v5105_v7 = vpop.eup %3520  ;;  %v894_v16 = vmul.f32 %v5133_v8, %v5133_v8 }
 0x334   : > { %3190 = vmatprep.subr.bf16.mxu0 %v3496_v41  ;;  %3210 = vmatprep.subr.bf16.mxu1 %v3497_v42  ;;  %v1909_v12 = vadd.f32 1.0, %v5105_v7  ;;  %v1912_v57 = vmul.f32 -0.5, %v5105_v7  ;;  %v1915_v47 = vand.u32 2147483647, %v5105_v7 }
 0x336   : > { %3522 = vlog2.f32 %v1909_v12  ;;  %vm5164_vm9 = vcmp.lt.f32.partialorder %v1915_v47, 0.0004427343 }
 0x337   : > { %3191 = vmatpush3.bf16.msra.mxu0 %v3496_v41  ;;  %3211 = vmatpush3.bf16.msra.mxu1 %v3497_v42  ;;  %v900_v41 = vmul.f32 %v892_v13, %v5121_v10  ;;  %v895_v42 = vmul.f32 %v5139_v48, %v5139_v48 }
 0x338   : > { %3192 = vmatprep.subr.bf16.mxu0 %v3498_v35  ;;  %3212 = vmatprep.subr.bf16.mxu1 %v3499_v4 }
 0x339   : > { %v908_v50 = vmul.f32 0.044715, %v900_v41  ;;  %v903_v5 = vmul.f32 %v895_v42, %v5139_v48 }
 0x33b   : > { %3193 = vmatpush3.bf16.msra.mxu0 %v3498_v35  ;;  %3213 = vmatpush3.bf16.msra.mxu1 %v3499_v4  ;;  %v916_v52 = vadd.f32 %v908_v50, %v5121_v10 }
 0x33c   : > { %3194 = vmatprep.subr.bf16.mxu0 %v3500_v61  ;;  %3214 = vmatprep.subr.bf16.mxu1 %v3501_v24 }
 0x33f   : > { %3195 = vmatpush3.bf16.msra.mxu0 %v3500_v61  ;;  %3215 = vmatpush3.bf16.msra.mxu1 %v3501_v24  ;;  %v907_v61 = vmul.f32 0.044715, %v899_v18  ;;  %v901_v24 = vmul.f32 %v893_v55, %v5129_v40 }
 0x340   : > { %3196 = vmatprep.subr.bf16.mxu0 %v3502_v49  ;;  %3216 = vmatprep.subr.bf16.mxu1 %v3503_v62  ;;  %v3523_v20 = vpop.eup %3522 }
 0x341   : > { %v915_v12 = vadd.f32 %v907_v61, %v5114_v11 }
 0x343   : > { %3197 = vmatpush3.bf16.msra.mxu0 %v3502_v49  ;;  %3217 = vmatpush3.bf16.msra.mxu1 %v3503_v62  ;;  %v902_v62 = vmul.f32 %v894_v16, %v5133_v8 }
 0x346   : > { %3199 = vmatmul.mubr.bf16.vlgmr.msra.gmra.mrb[4].mxu0 %v1312_v31  ;;  %3219 = vmatmul.mubr.bf16.vlgmr.msra.gmra.mrb[20].mxu1 %v1312_v31  ;;  %v1913_v31 = vadd.f32 1.0, %v1912_v57  ;;  %v924_v57 = vmul.f32 0.7978846, %v916_v52 }
 0x3f8   : > { %v3160_v19 = vpop.f32.mrb[0].mxu0  ;;  %v3180_v21 = vpop.f32.mrb[16].mxu1 }
 0x3f9   : > { %v1851_v15 = vadd.f32 %v3180_v21, %v1840_v39  ;;  %v1411_v22 = vpop.f32.mrb[1].mxu0  ;;  %v1524_v30 = vpop.f32.mrb[17].mxu1  ;;  %v1783_v36 = vadd.f32 %v3160_v19, %v1772_v33  ;;  %v904_v19 = vmul.f32 %v896_v58, %v5144_v54 }
 0x3fa   : > { %v1847_v17 = vadd.f32 %v1840_v39, %v1524_v30  ;;  %v3161_v25 = vpop.f32.mrb[2].mxu0  ;;  %v3181_v29 = vpop.f32.mrb[18].mxu1  ;;  %v1779_v1 = vadd.f32 %v1772_v33, %v1411_v22  ;;  %v910_v22 = vmul.f32 0.044715, %v902_v62 }
 0x3fb   : > { %v3043_v23 = vmul.f32 -1.442695, %v1851_v15  ;;  %v1853_v28 = vadd.f32 %v3181_v29, %v1840_v39  ;;  %v1414_v9 = vpop.f32.mrb[3].mxu0  ;;  %v1527_v27 = vpop.f32.mrb[19].mxu1  ;;  %v1785_v35 = vadd.f32 %v3161_v25, %v1772_v33  ;;  %v3035_v4 = vmul.f32 -1.442695, %v1783_v36 }
 0x3fc   : > { %v3039_v53 = vmul.f32 -1.442695, %v1847_v17  ;;  %v1849_v46 = vadd.f32 %v1840_v39, %v1527_v27  ;;  %v3031_v49 = vmul.f32 -1.442695, %v1779_v1  ;;  %v909_v15 = vmul.f32 0.044715, %v901_v24 }
 0x3fd   : > { %3524 = vpow2.f32 %v3043_v23  ;;  %v3045_v26 = vmul.f32 -1.442695, %v1853_v28  ;;  %v3037_v39 = vmul.f32 -1.442695, %v1785_v35  ;;  %v1911_v17 = vmul.f32 0.6931472, %v3523_v20 }
 0x3fe   : > { %3526 = vpow2.f32 %v3039_v53  ;;  %v3041_v0 = vmul.f32 -1.442695, %v1849_v46  ;;  %v1914_v25 = vmul.f32 %v5105_v7, %v1913_v31  ;;  %v911_v23 = vmul.f32 0.044715, %v903_v5 }
 0x3ff   : > { %3528 = vpow2.f32 %v3045_v26  ;;  %v912_v27 = vmul.f32 0.044715, %v904_v19  ;;  %v1781_v46 = vadd.f32 %v1772_v33, %v1414_v9  ;;  %v923_v26 = vmul.f32 0.7978846, %v915_v12  ;;  %v5860_v9 = vld [vmem:[#allocation49_spill] sm:$0xff] }
 0x400   : > { %3530 = vpow2.f32 %v3041_v0  ;;  %v917_v18 = vadd.f32 %v909_v15, %v5129_v40  ;;  %v5171_v7 = vadd.f32 %v4859_v59, %v5103_v43  ;;  %v1904_v36 = vmax.f32 %v5097_v37, 0.0 }
 0x401   : > { %3532 = vpow2.f32 %v3035_v4  ;;  %v918_v55 = vadd.f32 %v910_v22, %v5133_v8  ;;  %v1917_v1 = vsel %vm5164_vm9, %v1914_v25, %v1911_v17  ;;  %v919_v33 = vadd.f32 %v911_v23, %v5139_v48 }
 0x402   : > { %3534 = vpow2.f32 %v3031_v49  ;;  %5859 = vst [vmem:[#allocation52_spill] sm:$0xff] %v5171_v7  ;;  %v5180_v41 = vadd.f32 %v5860_v9, %v5110_v2  ;;  %v920_v59 = vadd.f32 %v912_v27, %v5144_v54  ;;  %v3033_v43 = vmul.f32 -1.442695, %v1781_v46 }
 0x403   : > { %3536 = vpow2.f32 %v3037_v39  ;;  %v925_v42 = vmul.f32 0.7978846, %v917_v18  ;;  %v897_v35 = vmul.f32 %v5171_v7, %v5171_v7  ;;  %v5185_v58 = vadd.f32 %v1917_v1, %v1904_v36 }
 0x404   : > { %5861 = vst [vmem:[#allocation49_spill] sm:$0xff] %v5180_v41  ;;  %v926_v61 = vmul.f32 0.7978846, %v918_v55  ;;  %v927_v49 = vmul.f32 0.7978846, %v919_v33  ;;  %v898_v62 = vmul.f32 %v5180_v41, %v5180_v41  ;;  %v5194_v19 = vrot.slane %v5116_v6, %v4867_v63 }
 0x405   : > { %v928_v2 = vmul.f32 0.7978846, %v920_v59  ;;  %v905_v20 = vmul.f32 %v897_v35, %v5171_v7  ;;  %v1931_v5 = vrot.slane %v5185_v58, %v4873_v3 }
 0x407   : > { %v3525_v21 = vpop.eup %3524  ;;  %v913_v28 = vmul.f32 0.044715, %v905_v20 }
 0x408   : > { %v1883_v30 = vadd.f32 1.0, %v3525_v21  ;;  %v3527_v29 = vpop.eup %3526  ;;  %v1844_v21 = vrot.slane %v5100_v32, %v4867_v63 }
 0x409   : > { %v1879_v53 = vadd.f32 1.0, %v3527_v29  ;;  %v3529_v13 = vpop.eup %3528 }
 0x40a   : > { %3538 = vrcp.f32 %v1883_v30  ;;  %v1885_v0 = vadd.f32 1.0, %v3529_v13  ;;  %v3531_v16 = vpop.eup %3530  ;;  %v906_v30 = vmul.f32 %v898_v62, %v5180_v41 }
 0x40b   : > { %3540 = vrcp.f32 %v1879_v53  ;;  %v1881_v37 = vadd.f32 1.0, %v3531_v16  ;;  %v3533_v4 = vpop.eup %3532 }
 0x40c   : > { %3542 = vrcp.f32 %v1885_v0  ;;  %v3535_v24 = vpop.eup %3534  ;;  %v1815_v50 = vadd.f32 1.0, %v3533_v4  ;;  %v3504_v0 = vld [vmem:[#allocation26 + $0x40] sm:$0xff]  }
 0x40d   : > { %3544 = vtanh.f32 %v923_v26  ;;  %v3537_v31 = vpop.eup %3536  ;;  %v1811_v39 = vadd.f32 1.0, %v3535_v24  ;;  %3114 = vmatprep.subr.bf16.mxu0 %v3504_v0  ;;  %v3506_v24 = vld [vmem:[#allocation26 + $0x48] sm:$0xff]  }
 0x40e   : > { %3546 = vrcp.f32 %v1881_v37  ;;  %v1817_v22 = vadd.f32 1.0, %v3537_v31 }
 0x40f   : > { %3548 = vtanh.f32 %v924_v57 }
 0x410   : > { %3550 = vpow2.f32 %v3033_v43 }
 0x411   : > { %3552 = vtanh.f32 %v925_v42 }
 0x412   : > { %3554 = vtanh.f32 %v926_v61  ;;  %v3505_v61 = vld [vmem:[#allocation26] sm:$0xff]  }
 0x413   : > { %3556 = vtanh.f32 %v927_v49  ;;  %3115 = vmatpush3.bf16.msra.mxu0 %v3505_v61  ;;  %v3512_v61 = vld [vmem:[#allocation26 + $0x60] sm:$0xff]  }
 0x414   : > { %v3539_v47 = vpop.eup %3538  ;;  %3558 = vtanh.f32 %v928_v2  ;;  %v914_v2 = vmul.f32 0.044715, %v906_v30  ;;  %3116 = vmatprep.subr.bf16.mxu0 %v3506_v24  ;;  %v921_v30 = vadd.f32 %v913_v28, %v5171_v7 }
 0x415   : > { %v1923_v12 = vmul.f32 -8.0, %v3539_v47  ;;  %v3541_v15 = vpop.eup %3540  ;;  %3560 = vrcp.f32 %v1815_v50 }
 0x416   : > { %v1919_v25 = vmul.f32 -8.0, %v3541_v15  ;;  %v3543_v23 = vpop.eup %3542  ;;  %3562 = vrcp.f32 %v1811_v39  ;;  %v929_v0 = vmul.f32 0.7978846, %v921_v30 }
 0x417   : > { %v1942_v17 = vmul.f32 %v1931_v5, %v1923_v12  ;;  %v3545_v46 = vpop.eup %3544  ;;  %v1925_v18 = vmul.f32 -8.0, %v3543_v23  ;;  %3564 = vrcp.f32 %v1817_v22  ;;  %v3507_v12 = vld [vmem:[#allocation26 + $0x8] sm:$0xff]  }
 0x418   : > { %v1938_v26 = vmul.f32 %v1931_v5, %v1919_v25  ;;  %v3547_v16 = vpop.eup %3546  ;;  %v3508_v25 = vld [vmem:[#allocation26 + $0x50] sm:$0xff]   ;;  %3117 = vmatpush3.bf16.msra.mxu0 %v3507_v12 }
 0x419   : > { %v3200_v29 = vpop.f32.mrb[4].mxu0  ;;  %v3220_v52 = vpop.f32.mrb[20].mxu1  ;;  %v1954_v13 = vmul.f32 1.442695, %v1942_v17  ;;  %v1944_v35 = vmul.f32 %v1931_v5, %v1925_v18  ;;  %v1921_v4 = vmul.f32 -8.0, %v3547_v16  ;;  %3118 = vmatprep.subr.bf16.mxu0 %v3508_v25 }
 0x41a   : > { %v1784_v6 = vadd.f32 %v3200_v29, %v5194_v19  ;;  %v1852_v27 = vadd.f32 %v3220_v52, %v1844_v21  ;;  %v1638_v53 = vpop.f32.mrb[5].mxu0  ;;  %v1752_v32 = vpop.f32.mrb[21].mxu1  ;;  %v1946_v42 = vmul.f32 1.442695, %v1938_v26  ;;  %v3509_v26 = vld [vmem:[#allocation26 + $0x10] sm:$0xff]  }
 0x41b   : > { %v1780_v36 = vadd.f32 %v5194_v19, %v1638_v53  ;;  %v3201_v55 = vpop.f32.mrb[6].mxu0  ;;  %v3221_v1 = vpop.f32.mrb[22].mxu1  ;;  %v1848_v9 = vadd.f32 %v1844_v21, %v1752_v32  ;;  %3566 = vpow2.f32 %v1954_v13  ;;  %v1958_v50 = vmul.f32 1.442695, %v1944_v35 }
 0x41c   : > { %v3036_v57 = vmul.f32 -1.442695, %v1784_v6  ;;  %v3044_v33 = vmul.f32 -1.442695, %v1852_v27  ;;  %v1641_v59 = vpop.f32.mrb[7].mxu0  ;;  %v1755_v43 = vpop.f32.mrb[23].mxu1  ;;  %v1786_v31 = vadd.f32 %v3201_v55, %v5194_v19  ;;  %v1940_v47 = vmul.f32 %v1931_v5, %v1921_v4  ;;  %3119 = vmatpush3.bf16.msra.mxu0 %v3509_v26 }
 0x41d   : > { %v3549_v37 = vpop.eup %3548  ;;  %v3032_v62 = vmul.f32 -1.442695, %v1780_v36  ;;  %v1854_v39 = vadd.f32 %v3221_v1, %v1844_v21  ;;  %v3040_v22 = vmul.f32 -1.442695, %v1848_v9  ;;  %v1850_v17 = vadd.f32 %v1844_v21, %v1755_v43  ;;  %v5211_v13 = vpop.permute.xlu1 %1994  ;;  %v3510_v55 = vld [vmem:[#allocation26 + $0x58] sm:$0xff]  }
 0x41e   : > { %v3551_v49 = vpop.eup %3550  ;;  %3568 = vpow2.f32 %v3036_v57  ;;  %v1950_v23 = vmul.f32 1.442695, %v1940_v47  ;;  %v1782_v27 = vadd.f32 %v5194_v19, %v1641_v59  ;;  %v922_v32 = vadd.f32 %v914_v2, %v5180_v41  ;;  %v5220_v59 = vpop.permute.xlu0 %1984  ;;  %v3511_v43 = vld [vmem:[#allocation26 + $0x18] sm:$0xff]   ;;  %3120 = vmatprep.subr.bf16.mxu0 %v3510_v55 }
 0x41f   : > { %v3553_v20 = vpop.eup %3552  ;;  %3570 = vpow2.f32 %v1946_v42  ;;  %v1813_v52 = vadd.f32 1.0, %v3551_v49  ;;  %v3046_v5 = vmul.f32 -1.442695, %v1854_v39  ;;  %v3038_v21 = vmul.f32 -1.442695, %v1786_v31 }
 0x420   : > { %v5202_v15 = vpop.eup %3554  ;;  %3572 = vpow2.f32 %v3044_v33  ;;  %v3042_v18 = vmul.f32 -1.442695, %v1850_v17  ;;  %v5216_v36 = vsub.f32 1.0, %v5211_v13  ;;  %v939_v19 = vadd.f32 1.0, %v3545_v46  ;;  %3121 = vmatpush3.bf16.msra.mxu0 %v3511_v43 }
 0x421   : > { %v3557_v29 = vpop.eup %3556  ;;  %3574 = vpow2.f32 %v1958_v50  ;;  %v941_v1 = vadd.f32 1.0, %v3553_v20  ;;  %v3034_v57 = vmul.f32 -1.442695, %v1782_v27  ;;  %v930_v9 = vmul.f32 0.7978846, %v922_v32  ;;  %3122 = vmatprep.subr.bf16.mxu0 %v3512_v61 }
 0x422   : > { %v5205_v6 = vpop.eup %3558  ;;  %3576 = vpow2.f32 %v3032_v62  ;;  %v940_v35 = vadd.f32 1.0, %v3549_v37  ;;  %v947_v49 = vmul.f32 0.5, %v939_v19  ;;  %v5226_v62 = vsub.f32 1.0, %v5220_v59  ;;  %v5256_v26 = vpop.permute.xlu0 %1989 }
 0x423   : > { %v5208_v53 = vpop.eup %3560  ;;  %3578 = vpow2.f32 %v1950_v23  ;;  %v949_v2 = vmul.f32 0.5, %v941_v1  ;;  %v943_v20 = vadd.f32 1.0, %v3557_v29  ;;  %v5236_v30 = vadd.f32 1.0, %v5202_v15  ;;  %v5241_v29 = vpop.permute.xlu1 %1999  ;;  %v3514_v23 = vld [vmem:[#allocation26 + $0x68] sm:$0xff]  }
 0x424   : > { %v5213_v28 = vpop.eup %3562  ;;  %3580 = vpow2.f32 %v3040_v22  ;;  %v3513_v22 = vld [vmem:[#allocation26 + $0x20] sm:$0xff]   ;;  %v5233_v25 = vmul.f32 0.5, %v940_v35  ;;  %v5246_v27 = vmul.f32 %v947_v49, %v5114_v11  ;;  %v5271_v35 = vrot.slane %v5185_v58, %v4867_v63 }
 0x425   : > { %3582 = vrcp.f32 %v1813_v52  ;;  %v5218_v16 = vpop.eup %3564  ;;  %v5249_v32 = vmul.f32 %v949_v2, %v5129_v40  ;;  %v5258_v55 = vmul.f32 0.5, %v943_v20  ;;  %3123 = vmatpush3.bf16.msra.mxu0 %v3513_v22  ;;  %v5276_v61 = vsub.f32 1.0, %v5256_v26 }
 0x426   : > { %3584 = vpow2.f32 %v3046_v5  ;;  %v3567_v33 = vpop.eup %3566  ;;  %3124 = vmatprep.subr.bf16.mxu0 %v3514_v23 }
 0x427   : > { %3586 = vpow2.f32 %v3038_v21  ;;  %v1966_v4 = vmul.f32 %v3567_v33, %v3567_v33  ;;  %v5223_v46 = vmul.f32 %v3567_v33, %v5216_v36  ;;  %v5251_v21 = vld [vmem:[#allocation2] sm:$0x3]  ;;  %v5267_v33 = vsub.f32 1.0, %v5241_v29 }
 0x428   : > { %v3569_v42 = vpop.eup %3568  ;;  %3588 = vpow2.f32 %v3042_v18 }
 0x429   : > { %v3571_v24 = vpop.eup %3570  ;;  %3590 = vtanh.f32 %v929_v0  ;;  %v5228_v50 = vsub.f32 1.0, %v1966_v4  ;;  %v2303_v12 = vrot.slane %v5223_v46, 7  ;;  %v1816_v1 = vadd.f32 1.0, %v3569_v42 }
 0x42a   : > { %v3573_v31 = vpop.eup %3572  ;;  %v1962_v47 = vmul.f32 %v3571_v24, %v3571_v24  ;;  %3592 = vpow2.f32 %v3034_v57  ;;  %v5254_v15 = vmul.f32 %v3571_v24, %v5226_v62  ;;  %v3516_v24 = vld [vmem:[#allocation26 + $0x70] sm:$0xff]  }
 0x42b   : > { %v5230_v37 = vpop.eup %3574  ;;  %3594 = vtanh.f32 %v930_v9  ;;  %v1884_v39 = vadd.f32 1.0, %v3573_v31  ;;  %v2307_v57 = vsel %vm1117_vm6, 1.0, %v2303_v12  ;;  %v3515_v9 = vld [vmem:[#allocation26 + $0x28] sm:$0xff]   ;;  %vm2044_vm10 = vcmp.eq.f32.partialorder %v5228_v50, inf }
 0x42c   : > { %v3577_v17 = vpop.eup %3576  ;;  %v5238_v52 = vsub.f32 1.0, %v1962_v47  ;;  %3596 = vrsqrt.f32 %v5228_v50  ;;  %v1968_v19 = vmul.f32 %v5230_v37, %v5230_v37  ;;  %v2125_v20 = vrot.slane %v5254_v15, 7  ;;  %v5862_v12 = vld [vmem:[#allocation48_spill] sm:$0xff]  ;;  %3125 = vmatpush3.bf16.msra.mxu0 %v3515_v9 }
 0x42d   : > { %v5243_v5 = vpop.eup %3578  ;;  %3598 = vrcp.f32 %v1884_v39  ;;  %v1812_v42 = vadd.f32 1.0, %v3577_v17  ;;  %v5284_v39 = vmul.f32 %v2307_v57, %v5223_v46  ;;  %v5287_v22 = vsub.s32 7, %v5862_v12  ;;  %3126 = vmatprep.subr.bf16.mxu0 %v3516_v24 }
 0x42e   : > { %v3581_v18 = vpop.eup %3580  ;;  %3600 = vrsqrt.f32 %v5238_v52  ;;  %v1964_v40 = vmul.f32 %v5243_v5, %v5243_v5  ;;  %v5281_v58 = vsub.f32 1.0, %v1968_v19  ;;  %v2090_v19 = vmul.f32 %v5208_v53, %v5058_v38 }
 0x42f   : > { %v3583_v11 = vpop.eup %3582  ;;  %v1880_v0 = vadd.f32 1.0, %v3581_v18  ;;  %v5302_v57 = vmul.f32 %v5218_v16, %v5064_v44  ;;  %vm2046_vm11 = vcmp.eq.f32.partialorder %v5228_v50, 0.0  ;;  %vm2016_vm12 = vcmp.eq.f32.partialorder %v5238_v52, inf }
 0x430   : > { %v3585_v43 = vpop.eup %3584  ;;  %v5291_v23 = vsub.f32 1.0, %v1964_v40  ;;  %v3518_v40 = vld [vmem:[#allocation26 + $0x78] sm:$0xff]   ;;  %v5308_v9 = vmul.f32 %v3583_v11, %v5031_v34  ;;  %vm2018_vm13 = vcmp.eq.f32.partialorder %v5238_v52, 0.0  ;;  %vm2058_vm14 = vcmp.eq.f32.partialorder %v5281_v58, inf }
 0x431   : > { %v3587_v49 = vpop.eup %3586  ;;  %3602 = vrcp.f32 %v1880_v0  ;;  %v1886_v2 = vadd.f32 1.0, %v3585_v43  ;;  %v2129_v0 = vsel %vm1117_vm6, 1.0, %v2125_v20  ;;  %v3517_v43 = vld [vmem:[#allocation26 + $0x30] sm:$0xff]   ;;  %v3519_v34 = vld [vmem:[#allocation26 + $0x38] sm:$0xff]   ;;  %vm2060_vm15 = vcmp.eq.f32.partialorder %v5281_v58, 0.0 }
 0x432   : > { %v3589_v47 = vpop.eup %3588  ;;  %3604 = vrcp.f32 %v1816_v1  ;;  %v5298_v1 = vmul.f32 %v5213_v28, %v5026_v60  ;;  %v1818_v20 = vadd.f32 1.0, %v3587_v49  ;;  %v2047_v60 = vand.u32 2147483648, %v5228_v50  ;;  %3127 = vmatpush3.bf16.msra.mxu0 %v3517_v43 }
 0x433   : > { %v5289_v17 = vpop.eup %3590  ;;  %3606 = vrcp.f32 %v1886_v2  ;;  %v1882_v18 = vadd.f32 1.0, %v3589_v47  ;;  %v5313_v53 = vmul.f32 %v2129_v0, %v5254_v15  ;;  %v5323_v49 = vmul.f32 %v5230_v37, %v5267_v33  ;;  %3128 = vmatprep.subr.bf16.mxu0 %v3518_v40 }
 0x434   : > { %v3593_v31 = vpop.eup %3592  ;;  %3608 = vrcp.f32 %v1812_v42  ;;  %v2325_v42 = vrot.slane %v5284_v39, 6  ;;  %vm2030_vm0 = vcmp.eq.f32.partialorder %v5291_v23, inf  ;;  %vm2032_vm3 = vcmp.eq.f32.partialorder %v5291_v23, 0.0 }
 0x435   : > { %v5304_v2 = vpop.eup %3594  ;;  %3610 = vrcp.f32 %v1882_v18  ;;  %v1814_v28 = vadd.f32 1.0, %v3593_v31  ;;  %v2019_v18 = vand.u32 2147483648, %v5238_v52 }
 0x436   : > { %5863 = vst [vmem:[#allocation53_spill] sm:$0xff] %v5304_v2  ;;  %v3597_v38 = vpop.eup %3596  ;;  %3612 = vrsqrt.f32 %v5281_v58  ;;  %3129 = vmatpush3.bf16.msra.mxu0 %v3519_v34 }
 0x437   : > { %v3599_v44 = vpop.eup %3598  ;;  %v2043_v16 = vmul.f32 %v3597_v38, %v5228_v50  ;;  %3614 = vrsqrt.f32 %v5291_v23  ;;  %v2147_v38 = vrot.slane %v5313_v53, 6 }
 0x438   : > { %v3601_v11 = vpop.eup %3600  ;;  %v1924_v24 = vmul.f32 -8.0, %v3599_v44  ;;  %3616 = vrcp.f32 %v1818_v20  ;;  %v2329_v20 = vsel %vm1176_vm7, 1.0, %v2325_v42 }
 0x439   : > { %v2045_v31 = vsel %vm2044_vm10, %v5228_v50, %v2043_v16  ;;  %v2015_v47 = vmul.f32 %v3601_v11, %v5238_v52  ;;  %3618 = vrcp.f32 %v1814_v28  ;;  %v2387_v28 = vrot.slane %v5323_v49, 7 }
 0x43a   : > { %v1943_v0 = vmul.f32 %v5271_v35, %v1924_v24  ;;  %v2048_v43 = vsel %vm2046_vm11, %v2047_v60, %v2045_v31 }
 0x43b   : > { %v3603_v37 = vpop.eup %3602  ;;  %v2074_v40 = vmul.f32 %v2048_v43, %v5216_v36  ;;  %v2017_v44 = vsel %vm2016_vm12, %v5238_v52, %v2015_v47  ;;  %v2061_v43 = vand.u32 2147483648, %v5281_v58  ;;  %v2151_v52 = vsel %vm1176_vm7, 1.0, %v2147_v38 }
 0x43c   : > { %v5341_v16 = vpop.eup %3604  ;;  %v1956_v50 = vmul.f32 1.442695, %v1943_v0  ;;  %v1920_v60 = vmul.f32 -8.0, %v3603_v37  ;;  %v2020_v11 = vsel %vm2018_vm13, %v2019_v18, %v2017_v44 }
 0x43d   : > { %v3607_v24 = vpop.eup %3606  ;;  %v2082_v31 = vadd.f32 %v2074_v40, %v5211_v13  ;;  %v2070_v42 = vmul.f32 %v2020_v11, %v5226_v62  ;;  %v2033_v40 = vand.u32 2147483648, %v5291_v23  ;;  %v5358_v11 = vmul.f32 %v5243_v5, %v5276_v61 }
 0x43e   : > { %v5350_v47 = vpop.eup %3608  ;;  %3620 = vpow2.f32 %v1956_v50  ;;  %v1939_v34 = vmul.f32 %v5271_v35, %v1920_v60  ;;  %v1926_v0 = vmul.f32 -8.0, %v3607_v24  ;;  %v2391_v60 = vsel %vm1117_vm6, 1.0, %v2387_v28 }
 0x43f   : > { %v3611_v18 = vpop.eup %3610  ;;  %v2098_v37 = vmul.f32 %v2090_v19, %v2082_v31  ;;  %v2078_v44 = vadd.f32 %v2070_v42, %v5220_v59  ;;  %v5364_v31 = vmul.f32 %v2151_v52, %v5313_v53  ;;  %v5376_v52 = vmul.f32 %v2391_v60, %v5323_v49 }
 0x440   : > { %v3613_v4 = vpop.eup %3612  ;;  %v1948_v12 = vmul.f32 1.442695, %v1939_v34  ;;  %v1945_v41 = vmul.f32 %v5271_v35, %v1926_v0  ;;  %v1922_v50 = vmul.f32 -8.0, %v3611_v18 }
 0x441   : > { %v3615_v24 = vpop.eup %3614  ;;  %v2291_v38 = vrot.slane %v2098_v37, 7  ;;  %v2094_v19 = vmul.f32 %v5298_v1, %v2078_v44  ;;  %v2057_v42 = vmul.f32 %v3613_v4, %v5281_v58 }
 0x442   : > { %3622 = vpow2.f32 %v1948_v12  ;;  %v1960_v5 = vmul.f32 1.442695, %v1945_v41  ;;  %v1941_v54 = vmul.f32 %v5271_v35, %v1922_v50  ;;  %v2029_v34 = vmul.f32 %v3615_v24, %v5291_v23  ;;  %v5369_v0 = vpop.eup %3616 }
 0x443   : > { %v2295_v18 = vsel %vm1117_vm6, 0.0, %v2291_v38  ;;  %v2113_v28 = vrot.slane %v2094_v19, 7  ;;  %v2059_v1 = vsel %vm2058_vm14, %v5281_v58, %v2057_v42  ;;  %v3619_v12 = vpop.eup %3618  ;;  %v2213_v38 = vrot.slane %v5358_v11, 7 }
 0x444   : > { %3624 = vpow2.f32 %v1960_v5  ;;  %v1952_v4 = vmul.f32 1.442695, %v1941_v54  ;;  %v2297_v41 = vmul.f32 %v2295_v18, %v5223_v46  ;;  %v2062_v35 = vsel %vm2060_vm15, %v2061_v43, %v2059_v1 }
 0x445   : > { %v2117_v44 = vsel %vm1117_vm6, 0.0, %v2113_v28  ;;  %v2076_v50 = vmul.f32 %v2062_v35, %v5267_v33  ;;  %v2031_v24 = vsel %vm2030_vm0, %v5291_v23, %v2029_v34  ;;  %v5390_v46 = vmul.f32 %v2329_v20, %v5284_v39 }
 0x446   : > { %3626 = vpow2.f32 %v1952_v4  ;;  %v2299_v60 = vadd.f32 %v2297_v41, %v2098_v37  ;;  %v2119_v54 = vmul.f32 %v2117_v44, %v5254_v15  ;;  %v2170_v58 = vrot.slane %v5364_v31, 4 }
 0x447   : > { %v2084_v43 = vadd.f32 %v2076_v50, %v5241_v29  ;;  %v2034_v42 = vsel %vm2032_vm3, %v2033_v40, %v2031_v24  ;;  %v2409_v34 = vrot.slane %v5376_v52, 6  ;;  %v2217_v20 = vsel %vm1117_vm6, 1.0, %v2213_v38 }
 0x448   : > { %v3621_v5 = vpop.eup %3620  ;;  %v2313_v18 = vrot.slane %v2299_v60, 6  ;;  %v2121_v28 = vadd.f32 %v2119_v54, %v2094_v19  ;;  %v2072_v1 = vmul.f32 %v2034_v42, %v5276_v61  ;;  %v5405_v4 = vmul.f32 %v5341_v16, %v5093_v45 }
 0x449   : > { %v1967_v37 = vmul.f32 %v3621_v5, %v3621_v5  ;;  %v5397_v15 = vmul.f32 %v3621_v5, %v5216_v36  ;;  %v5400_v23 = vmul.f32 %v5302_v57, %v2084_v43  ;;  %v2174_v57 = vsel %vm2161_vm2, 1.0, %v2170_v58 }
 0x44a   : > { %v2317_v40 = vsel %vm1176_vm7, 0.0, %v2313_v18  ;;  %v2135_v19 = vrot.slane %v2121_v28, 6  ;;  %v2080_v41 = vadd.f32 %v2072_v1, %v5256_v26  ;;  %v5419_v45 = vmul.f32 %v2217_v20, %v5358_v11 }
 0x44b   : > { %v5409_v35 = vsub.f32 1.0, %v1967_v37  ;;  %v2304_v44 = vrot.slane %v5397_v15, 7  ;;  %v2319_v50 = vmul.f32 %v2317_v40, %v5284_v39  ;;  %v2347_v16 = vrot.slane %v5390_v46, 4 }
 0x44c   : > { %v3623_v24 = vpop.eup %3622  ;;  %v2139_v38 = vsel %vm1176_vm7, 0.0, %v2135_v19  ;;  %v5416_v54 = vmul.f32 %v5308_v9, %v2080_v41  ;;  %v5425_v42 = vmul.f32 %v5350_v47, %v5079_v14  ;;  %v2413_v39 = vsel %vm1176_vm7, 1.0, %v2409_v34 }
 0x44d   : > { %v1963_v43 = vmul.f32 %v3623_v24, %v3623_v24  ;;  %3628 = vrsqrt.f32 %v5409_v35  ;;  %v2308_v5 = vsel %vm1117_vm6, 1.0, %v2304_v44  ;;  %v2321_v18 = vadd.f32 %v2319_v50, %v2299_v60 }
 0x44e   : > { %v3625_v58 = vpop.eup %3624  ;;  %v5430_v9 = vmul.f32 %v3623_v24, %v5226_v62  ;;  %v2176_v1 = vmul.f32 %v2174_v57, %v5364_v31  ;;  %v2141_v40 = vmul.f32 %v2139_v38, %v5313_v53  ;;  %v2375_v19 = vrot.slane %v5400_v23, 7 }
 0x44f   : > { %v5433_v37 = vsub.f32 1.0, %v1963_v43  ;;  %v1969_v20 = vmul.f32 %v3625_v58, %v3625_v58  ;;  %v2335_v47 = vrot.slane %v2321_v18, 4  ;;  %v5439_v41 = vmul.f32 %v2413_v39, %v5376_v52 }
 0x450   : > { %v3627_v14 = vpop.eup %3626  ;;  %v2126_v34 = vrot.slane %v5430_v9, 7  ;;  %v2235_v60 = vrot.slane %v5419_v45, 6  ;;  %v5445_v57 = vmul.f32 %v2308_v5, %v5397_v15  ;;  %v5864_v24 = vrot.slane %v5251_v21, %v4873_v3 }
 0x451   : > { %v5442_v44 = vsub.f32 1.0, %v1969_v20  ;;  %v1965_v50 = vmul.f32 %v3627_v14, %v3627_v14  ;;  %3630 = vrsqrt.f32 %v5433_v37  ;;  %v2339_v53 = vsel %vm2161_vm2, 0.0, %v2335_v47 }
 0x452   : > { %v2189_v38 = vmul.f32 %v5864_v24, %v2176_v1  ;;  %v5454_v43 = vmul.f32 %v5369_v0, %v5090_v56  ;;  %v5457_v39 = vmul.f32 %v3619_v12, %v5082_v51  ;;  %v2341_v5 = vmul.f32 %v2339_v53, %v5390_v46 }
 0x453   : > { %v5459_v20 = vsub.f32 1.0, %v1965_v50  ;;  %v2130_v2 = vsel %vm1117_vm6, 1.0, %v2126_v34  ;;  %v2379_v8 = vsel %vm1117_vm6, 0.0, %v2375_v19  ;;  %v2143_v47 = vadd.f32 %v2141_v40, %v2121_v28 }
 0x454   : > { %3632 = vrsqrt.f32 %v5442_v44  ;;  %v5467_v1 = vsel %vm2161_vm2, 1.0, %v2347_v16  ;;  %vm2051_vm4 = vcmp.eq.f32.partialorder %v5409_v35, inf  ;;  %v2326_v51 = vrot.slane %v5445_v57, 6 }
 0x455   : > { %v5471_v56 = vadd.f32 %v2341_v5, %v2321_v18  ;;  %v5474_v0 = vsel %vm1176_vm7, 1.0, %v2235_v60  ;;  %vm2053_vm5 = vcmp.eq.f32.partialorder %v5409_v35, 0.0  ;;  %v5478_v12 = vmul.f32 %v2130_v2, %v5430_v9 }
 0x456   : > { %v2157_v28 = vrot.slane %v2143_v47, 4  ;;  %v2381_v40 = vmul.f32 %v2379_v8, %v5323_v49  ;;  %v2054_v16 = vand.u32 2147483648, %v5409_v35  ;;  %vm2023_vm8 = vcmp.eq.f32.partialorder %v5433_v37, inf }
 0x457   : > { %v3629_v19 = vpop.eup %3628  ;;  %v5484_v34 = vmul.f32 %v3625_v58, %v5267_v33  ;;  %3634 = vrsqrt.f32 %v5459_v20  ;;  %vm2025_vm9 = vcmp.eq.f32.partialorder %v5433_v37, 0.0  ;;  %v5492_v8 = vsel %vm1176_vm7, 1.0, %v2326_v51 }
 0x458   : > { %v2050_v18 = vmul.f32 %v3629_v19, %v5409_v35  ;;  %v2162_v2 = vsel %vm2161_vm2, 0.0, %v2157_v28  ;;  %v2383_v60 = vadd.f32 %v2381_v40, %v5400_v23  ;;  %v2026_v49 = vand.u32 2147483648, %v5433_v37 }
 0x459   : > { %v2164_v50 = vmul.f32 %v2162_v2, %v5364_v31  ;;  %vm2065_vm10 = vcmp.eq.f32.partialorder %v5442_v44, inf  ;;  %v2148_v53 = vrot.slane %v5478_v12, 6  ;;  %v2201_v5 = vrot.slane %v5416_v54, 7 }
 0x45a   : > { %v2052_v58 = vsel %vm2051_vm4, %v5409_v35, %v2050_v18  ;;  %v2397_v24 = vrot.slane %v2383_v60, 6  ;;  %vm2067_vm11 = vcmp.eq.f32.partialorder %v5442_v44, 0.0  ;;  %v2068_v31 = vand.u32 2147483648, %v5442_v44 }
 0x45b   : > { %v3631_v28 = vpop.eup %3630  ;;  %v2055_v23 = vsel %vm2053_vm5, %v2054_v16, %v2052_v58  ;;  %v2166_v51 = vadd.f32 %v2164_v50, %v2143_v47  ;;  %v5510_v2 = vmul.f32 %v3627_v14, %v5276_v61  ;;  %v2388_v7 = vrot.slane %v5484_v34, 7 }
 0x45c   : > { %v2075_v40 = vmul.f32 %v2055_v23, %v5216_v36  ;;  %v2022_v19 = vmul.f32 %v3631_v28, %v5433_v37  ;;  %v2401_v18 = vsel %vm1176_vm7, 0.0, %v2397_v24  ;;  %vm2037_vm12 = vcmp.eq.f32.partialorder %v5459_v20, inf }
 0x45d   : > { %v5512_v3 = vadd.f32 %v2189_v38, %v2166_v51  ;;  %v2403_v35 = vmul.f32 %v2401_v18, %v5376_v52  ;;  %v2152_v50 = vsel %vm1176_vm7, 1.0, %v2148_v53  ;;  %v2205_v14 = vsel %vm1117_vm6, 0.0, %v2201_v5 }
 0x45e   : > { %v3633_v47 = vpop.eup %3632  ;;  %v2083_v16 = vadd.f32 %v2075_v40, %v5211_v13  ;;  %v2024_v36 = vsel %vm2023_vm8, %v5433_v37, %v2022_v19  ;;  %vm2039_vm13 = vcmp.eq.f32.partialorder %v5459_v20, 0.0  ;;  %v2214_v23 = vrot.slane %v5510_v2, 7 }
 0x45f   : > { %v2027_v38 = vsel %vm2025_vm9, %v2026_v49, %v2024_v36  ;;  %v2193_v58 = vmul.f32 %v5512_v3, %v5246_v27  ;;  %v2064_v52 = vmul.f32 %v3633_v47, %v5442_v44  ;;  %v2405_v28 = vadd.f32 %v2403_v35, %v2383_v60 }
 0x460   : > { %v2099_v13 = vmul.f32 %v5405_v4, %v2083_v16  ;;  %v2071_v24 = vmul.f32 %v2027_v38, %v5226_v62  ;;  %v5533_v5 = vmul.f32 %v2152_v50, %v5478_v12  ;;  %v2207_v49 = vmul.f32 %v2205_v14, %v5358_v11 }
 0x461   : > { %v3635_v53 = vpop.eup %3634  ;;  %v2195_v37 = vpack.c.bf16 %v2193_v58, %v2193_v58  ;;  %v2066_v27 = vsel %vm2065_vm10, %v5442_v44, %v2064_v52  ;;  %v2419_v4 = vrot.slane %v2405_v28, 4  ;;  %v2392_v19 = vsel %vm1117_vm6, 1.0, %v2388_v7 }
 0x462   : > { %v2292_v51 = vrot.slane %v2099_v13, 7  ;;  %v2079_v40 = vadd.f32 %v2071_v24, %v5220_v59  ;;  %v2069_v62 = vsel %vm2067_vm11, %v2068_v31, %v2066_v27  ;;  %v2036_v18 = vmul.f32 %v3635_v53, %v5459_v20 }
 0x463   : > { %2197 = vst [vmem:[#allocation4] sm:$0xf] %v2195_v37  ;;  %v2077_v60 = vmul.f32 %v2069_v62, %v5267_v33  ;;  %v2209_v35 = vadd.f32 %v2207_v49, %v5416_v54  ;;  %v2423_v16 = vsel %vm2161_vm2, 0.0, %v2419_v4  ;;  %v2218_v59 = vsel %vm1117_vm6, 1.0, %v2214_v23 }
 0x464   : > { %v2296_v47 = vsel %vm1117_vm6, 0.0, %v2292_v51  ;;  %v2095_v11 = vmul.f32 %v5425_v42, %v2079_v40  ;;  %v2425_v33 = vmul.f32 %v2423_v16, %v5439_v41  ;;  %v2040_v7 = vand.u32 2147483648, %v5459_v20 }
 0x465   : > { %v2298_v44 = vmul.f32 %v2296_v47, %v5397_v15  ;;  %v2085_v31 = vadd.f32 %v2077_v60, %v5241_v29  ;;  %v5555_v50 = vmul.f32 %v2392_v19, %v5484_v34  ;;  %v2038_v54 = vsel %vm2037_vm12, %v5459_v20, %v2036_v18 }
 0x466   : > { %v2114_v36 = vrot.slane %v2095_v11, 7  ;;  %v5561_v42 = vmul.f32 %v2218_v59, %v5510_v2  ;;  %v5564_v38 = vadd.f32 %v2425_v33, %v2405_v28  ;;  %v2041_v29 = vsel %vm2039_vm13, %v2040_v7, %v2038_v54 }
 0x467   : > { %v2300_v14 = vadd.f32 %v2298_v44, %v2099_v13  ;;  %v2101_v15 = vmul.f32 %v5454_v43, %v2085_v31  ;;  %v2171_v52 = vrot.slane %v5533_v5, 4  ;;  %v2073_v24 = vmul.f32 %v2041_v29, %v5276_v61 }
 0x468   : > { %v2118_v58 = vsel %vm1117_vm6, 0.0, %v2114_v36  ;;  %v2223_v23 = vrot.slane %v2209_v35, 6  ;;  %v2241_v13 = vmul.f32 %v5474_v0, %v5419_v45  ;;  %v5576_v43 = vmul.f32 %v5492_v8, %v5445_v57 }
 0x469   : > { %v2314_v53 = vrot.slane %v2300_v14, 6  ;;  %v2120_v37 = vmul.f32 %v2118_v58, %v5430_v9  ;;  %v2376_v27 = vrot.slane %v2101_v15, 7  ;;  %v2081_v20 = vadd.f32 %v2073_v24, %v5256_v26 }
 0x46a   : > { %v2227_v28 = vsel %vm1176_vm7, 0.0, %v2223_v23  ;;  %v2236_v49 = vrot.slane %v5561_v42, 6  ;;  %v2410_v8 = vrot.slane %v5555_v50, 6  ;;  %v2175_v60 = vsel %vm2161_vm2, 1.0, %v2171_v52 }
 0x46b   : > { %v2318_v61 = vsel %vm1176_vm7, 0.0, %v2314_v53  ;;  %v2122_v51 = vadd.f32 %v2120_v37, %v2095_v11  ;;  %v2380_v40 = vsel %vm1117_vm6, 0.0, %v2376_v27  ;;  %v2229_v9 = vmul.f32 %v2227_v28, %v5419_v45 }
 0x46c   : > { %v2320_v62 = vmul.f32 %v2318_v61, %v5445_v57  ;;  %v2382_v0 = vmul.f32 %v2380_v40, %v5484_v34  ;;  %v2097_v4 = vmul.f32 %v5457_v39, %v2081_v20  ;;  %v2257_v18 = vrot.slane %v2241_v13, 4 }
 0x46d   : > { %v2136_v26 = vrot.slane %v2122_v51, 6  ;;  %v2231_v19 = vadd.f32 %v2229_v9, %v2209_v35  ;;  %v2240_v59 = vsel %vm1176_vm7, 1.0, %v2236_v49  ;;  %v2268_v57 = vrot.slane %v5512_v3, %v5287_v22 }
 0x46e   : > { %v2322_v47 = vadd.f32 %v2320_v62, %v2300_v14  ;;  %v2384_v16 = vadd.f32 %v2382_v0, %v2101_v15  ;;  %v2202_v11 = vrot.slane %v2097_v4, 7  ;;  %v2261_v44 = vsel %vm2161_vm2, 1.0, %v2257_v18 }
 0x46f   : > { %v2140_v45 = vsel %vm1176_vm7, 0.0, %v2136_v26  ;;  %v2245_v34 = vrot.slane %v2231_v19, 4  ;;  %v2242_v36 = vmul.f32 %v2240_v59, %v5561_v42  ;;  %v2263_v14 = vmul.f32 %v2261_v44, %v2241_v13 }
 0x470   : > { %v2336_v31 = vrot.slane %v2322_v47, 4  ;;  %v2142_v39 = vmul.f32 %v2140_v45, %v5478_v12  ;;  %v2398_v33 = vrot.slane %v2384_v16, 6  ;;  %v2206_v35 = vsel %vm1117_vm6, 0.0, %v2202_v11 }
 0x471   : > { %v2208_v7 = vmul.f32 %v2206_v35, %v5510_v2  ;;  %v2249_v54 = vsel %vm2161_vm2, 0.0, %v2245_v34  ;;  %v2177_v12 = vmul.f32 %v2175_v60, %v5533_v5  ;;  %v2414_v2 = vsel %vm1176_vm7, 1.0, %v2410_v8 }
 0x472   : > { %v2340_v15 = vsel %vm2161_vm2, 0.0, %v2336_v31  ;;  %v2144_v29 = vadd.f32 %v2142_v39, %v2122_v51  ;;  %v2402_v3 = vsel %vm1176_vm7, 0.0, %v2398_v33  ;;  %v2251_v58 = vmul.f32 %v2249_v54, %v2241_v13 }
 0x473   : > { %v2342_v52 = vmul.f32 %v2340_v15, %v5576_v43  ;;  %v2404_v24 = vmul.f32 %v2402_v3, %v5555_v50  ;;  %v2210_v23 = vadd.f32 %v2208_v7, %v2097_v4  ;;  %v2273_v27 = vmul.f32 %v2268_v57, %v2263_v14 }
 0x474   : > { %v2158_v53 = vrot.slane %v2144_v29, 4  ;;  %v2253_v37 = vadd.f32 %v2251_v58, %v2231_v19  ;;  %v2258_v61 = vrot.slane %v2242_v36, 4  ;;  %v945_v51 = vadd.f32 1.0, %v5289_v17 }
 0x475   : > { %v5605_v20 = vadd.f32 %v2342_v52, %v2322_v47  ;;  %v2406_v28 = vadd.f32 %v2404_v24, %v2384_v16  ;;  %v2224_v49 = vrot.slane %v2210_v23, 6  ;;  %v5865_v40 = vrot.slane %v5439_v41, 4  ;;  %v5867_v52 = vld [vmem:[#allocation52_spill] sm:$0xff] }
 0x476   : > { %v2163_v13 = vsel %vm2161_vm2, 0.0, %v2158_v53  ;;  %v2275_v62 = vadd.f32 %v2273_v27, %v2253_v37  ;;  %v2353_v26 = vmul.f32 %v5467_v1, %v5390_v46  ;;  %v5617_v60 = vmul.f32 %v2414_v2, %v5555_v50  ;;  %v5868_v53 = vld [vmem:[#allocation50_spill] sm:$0xff] }
 0x477   : > { %v2435_v9 = vsel %vm2161_vm2, 1.0, %v5865_v40  ;;  %v2165_v0 = vmul.f32 %v2163_v13, %v5533_v5  ;;  %v2420_v4 = vrot.slane %v2406_v28, 4  ;;  %v2228_v8 = vsel %vm1176_vm7, 0.0, %v2224_v49 }
 0x478   : > { %v2230_v17 = vmul.f32 %v2228_v8, %v5561_v42  ;;  %v2277_v19 = vmul.f32 %v2275_v62, %v5249_v32  ;;  %v2358_v18 = vrot.slane %v2275_v62, %v5287_v22  ;;  %v5866_v16 = vrot.slane %v5251_v21, %v4867_v63  ;;  %v5870_v8 = vld [vmem:[#allocation51_spill] sm:$0xff] }
 0x479   : > { %v2167_v47 = vadd.f32 %v2165_v0, %v2144_v29  ;;  %v2424_v11 = vsel %vm2161_vm2, 0.0, %v2420_v4  ;;  %v2262_v59 = vsel %vm2161_vm2, 1.0, %v2258_v61  ;;  %v956_v42 = vmul.f32 %v5233_v25, %v5121_v10  ;;  %v5869_v61 = vld [vmem:[#allocation53_spill] sm:$0xff] }
 0x47a   : > { %v2190_v5 = vmul.f32 %v5866_v16, %v2177_v12  ;;  %v2426_v46 = vmul.f32 %v2424_v11, %v5617_v60  ;;  %v2232_v1 = vadd.f32 %v2230_v17, %v2210_v23  ;;  %v2279_v50 = vpack.c.bf16 %v2277_v19, %v2277_v19 }
 0x47b   : > { %v2363_v45 = vmul.f32 %v2358_v18, %v2353_v26  ;;  %v959_v32 = vmul.f32 %v5258_v55, %v5139_v48  ;;  %v953_v57 = vmul.f32 0.5, %v945_v51  ;;  %v2437_v35 = vmul.f32 %v2435_v9, %v5439_v41 }
 0x47c   : > { %v2192_v34 = vadd.f32 %v2190_v5, %v2167_v47  ;;  %v2428_v44 = vadd.f32 %v2426_v46, %v2406_v28  ;;  %v2246_v63 = vrot.slane %v2232_v1, 4  ;;  %v2283_v21 = vrot.slane %v2279_v50, 4  ;;  %v5871_v46 = vld [vmem:[#allocation49_spill] sm:$0xff]  ;;  %v5872_v50 = vld [vmem:[#allocation48_spill] sm:$0xff] }
 0x47d   : > { %v2365_v31 = vadd.f32 %v2363_v45, %v5471_v56  ;;  %v2264_v7 = vmul.f32 %v2262_v59, %v2242_v36  ;;  %v2348_v10 = vrot.slane %v5576_v43, 4  ;;  %v950_v55 = vmul.f32 0.5, %v5236_v30 }
 0x47e   : > { %v2194_v39 = vmul.f32 %v2192_v34, %v956_v42  ;;  %v2272_v33 = vrot.slane %v2192_v34, %v5287_v22  ;;  %v2250_v54 = vsel %vm2161_vm2, 0.0, %v2246_v63  ;;  %2287 = vst [vmem:[#allocation4] sm:$0xf0] %v2283_v21  ;;  %v944_v58 = vadd.f32 1.0, %v5205_v6 }
 0x47f   : > { %v2367_v25 = vmul.f32 %v2365_v31, %v959_v32  ;;  %v2442_v48 = vrot.slane %v2365_v31, %v5287_v22  ;;  %v2252_v15 = vmul.f32 %v2250_v54, %v2242_v36  ;;  %v961_v12 = vmul.f32 %v953_v57, %v5867_v52  ;;  %v3051_v54 = vld [vmem:[#allocation28] ss:$0 sm:$0xff] }
 0x480   : > { %v2196_v14 = vpack.c.bf16 %v2194_v39, %v2194_v39  ;;  %v2274_v29 = vmul.f32 %v2272_v33, %v2264_v7  ;;  %v2352_v24 = vsel %vm2161_vm2, 1.0, %v2348_v10  ;;  %v958_v2 = vmul.f32 %v950_v55, %v5868_v53 }
 0x481   : > { %v2369_v56 = vpack.c.bf16 %v2367_v25, %v2367_v25  ;;  %v2447_v3 = vmul.f32 %v2442_v48, %v2437_v35  ;;  %v2254_v41 = vadd.f32 %v2252_v15, %v2232_v1  ;;  %v2432_v30 = vrot.slane %v5617_v60, 4 }
 0x482   : > { %2198 = vst [vmem:[#allocation4 + $0x8] sm:$0xf] %v2196_v14  ;;  %v952_v27 = vmul.f32 0.5, %v944_v58  ;;  %v2354_v49 = vmul.f32 %v2352_v24, %v5576_v43  ;;  %v946_v51 = vadd.f32 1.0, %v5869_v61  ;;  %v4214_v40 = vmov 1966171168  }
 0x483   : > { %2371 = vst [vmem:[#allocation4 + $0x10] sm:$0xf] %v2369_v56  ;;  %v2449_v23 = vadd.f32 %v2447_v3, %v5564_v38  ;;  %v2276_v37 = vadd.f32 %v2274_v29, %v2254_v41  ;;  %v2467_v9 = vunpack.c.l.s4 %v4214_v40  ;;  %v2436_v38 = vsel %vm2161_vm2, 1.0, %v2432_v30 }
 0x484   : > { %v960_v26 = vmul.f32 %v952_v27, %v5870_v8  ;;  %v954_v18 = vmul.f32 0.5, %v946_v51  ;;  %v2438_v43 = vmul.f32 %v2436_v38, %v5617_v60  ;;  %v5873_v39 = vlaneseq }
 0x485   : > { %v2451_v36 = vmul.f32 %v2449_v23, %v961_v12  ;;  %v2278_v28 = vmul.f32 %v2276_v37, %v958_v2  ;;  %v2362_v6 = vrot.slane %v2276_v37, %v5287_v22  ;;  %v2468_v47 = vunpack.c.0.s8 %v2467_v9  ;;  %v2488_v60 = vld [vmem:[#allocation4] sm:$0xff] }
 0x486   : > { %v962_v1 = vmul.f32 %v954_v18, %v5871_v46  ;;  %vm2485_vm6 = vcmp.lt.s32.totalorder %v5873_v39, 256 }
 0x487   : > { %v2453_v13 = vpack.c.bf16 %v2451_v36, %v2451_v36  ;;  %v2280_v62 = vpack.c.bf16 %v2278_v28, %v2278_v28  ;;  %v2364_v0 = vmul.f32 %v2362_v6, %v2354_v49  ;;  %v2471_v45 = vsub.s32 %v2468_v47, %v5872_v50 }
 0x489   : > { %v2457_v4 = vrot.slane %v2453_v13, 4  ;;  %v2284_v17 = vrot.slane %v2280_v62, 4  ;;  %v2366_v19 = vadd.f32 %v2364_v0, %v5605_v20 }
 0x48b   : > { %2461 = vst [vmem:[#allocation4 + $0x10] sm:$0xf0] %v2457_v4  ;;  %2288 = vst [vmem:[#allocation4 + $0x8] sm:$0xf0] %v2284_v17  ;;  %v2368_v16 = vmul.f32 %v2366_v19, %v960_v26  ;;  %v2446_v5 = vrot.slane %v2366_v19, %v5287_v22 }
 0x48d   : > { %v2370_v11 = vpack.c.bf16 %v2368_v16, %v2368_v16  ;;  %v2448_v59 = vmul.f32 %v2446_v5, %v2438_v43 }
 0x48f   : > { %2372 = vst [vmem:[#allocation4 + $0x18] sm:$0xf] %v2370_v11  ;;  %v2450_v42 = vadd.f32 %v2448_v59, %v2428_v44 }
 0x491   : > { %v2452_v32 = vmul.f32 %v2450_v42, %v962_v1  ;;  %v2465_v57 = vcombine.high %v2449_v23, %v2450_v42 }
 0x492   : > { %v2489_v20 = vld [vmem:[#allocation4 + $0x8] sm:$0xff]  ;;  %v2490_v35 = vld [vmem:[#allocation4 + $0x10] sm:$0xff] }
 0x493   : > { %v2454_v34 = vpack.c.bf16 %v2452_v32, %v2452_v32  ;;  %v2472_v63 = vrot.slane %v2465_v57, %v2471_v45  ;;  %2659 = vmatprep.mubr.bf16.mxu0 %v2489_v20 }
 0x494   : > { %2660 = vmatmul.mubr.bf16.vlgmr.msra.gmra.mrb[8].mxu0 %v2488_v60 }
 0x495   : > { %v2458_v21 = vrot.slane %v2454_v34, 4  ;;  %v2473_v31 = vcombine.high %v2472_v63, %v2472_v63 }
 0x497   : > { %2462 = vst [vmem:[#allocation4 + $0x18] sm:$0xf0] %v2458_v21  ;;  %v2480_v22 = vrot.slane %v2473_v31, %v2471_v45 }
 0x499   : > { %v2481_v33 = vcombine.high %v2480_v22, %v2480_v22 }
 0x49b   : > { %2487 = vst.msk [vmem:[#allocation2] sm:$0x3] %vm2485_vm6, %v2481_v33 }
 0x49e   : > { %v2491_v44 = vld [vmem:[#allocation4 + $0x18] sm:$0xff] }
 0x49f   : > { %2667 = vmatprep.mubr.bf16.mxu0 %v2491_v44 }
 0x4a0   : > { %2668 = vmatmul.mubr.bf16.gmra.mrb[12].mxu0 %v2490_v35 }
 0x567   : > { %v3130_v7 = vpop.f32.mrb[8].mxu0 }
 0x568   : > { %v3131_v10 = vpop.f32.mrb[9].mxu0 }
 0x569   : > { %v3132_v25 = vadd.f32 %v3131_v10, %v3130_v7  ;;  %v3133_v48 = vpop.f32.mrb[10].mxu0 }
 0x56a   : > { %v3134_v55 = vpop.f32.mrb[11].mxu0 }
 0x56b   : > { %v2662_v14 = vadd.f32 %v3132_v25, %v3051_v54  ;;  %v3135_v15 = vadd.f32 %v3134_v55, %v3133_v48 }
 0x56d   : > { %2676 = vst.msk [vmem:[%s4826_s2] sm:$0xff] %vm831_vm1, %v2662_v14  ;;  %v2665_v29 = vadd.f32 %v3135_v15, %v3051_v54 }
 0x56f   : > { %2677 = vst.msk [vmem:[%s4826_s2 + $0x8] sm:$0xff] %vm831_vm1, %v2665_v29 }
 0x573   : > { %v3136_v56 = vpop.f32.mrb[12].mxu0 }
 0x574   : > { %v3137_v3 = vpop.f32.mrb[13].mxu0 }
 0x575   : > { %v3138_v58 = vadd.f32 %v3137_v3, %v3136_v56  ;;  %v3139_v41 = vpop.f32.mrb[14].mxu0 }
 0x576   : > { %v3140_v52 = vpop.f32.mrb[15].mxu0 }
 0x577   : > { %v2670_v12 = vadd.f32 %v3138_v58, %v3051_v54  ;;  %v3141_v24 = vadd.f32 %v3140_v52, %v3139_v41 }
 0x579   : > { %2678 = vst.msk [vmem:[%s4826_s2 + $0x10] sm:$0xff] %vm831_vm1, %v2670_v12  ;;  %v2673_v23 = vadd.f32 %v3141_v24, %v3051_v54 }
 0x57b   : > { %2679 = vst.msk [vmem:[%s4826_s2 + $0x18] sm:$0xff] %vm831_vm1, %v2673_v23 }
 0x57c   : > { %4073 = shalt.err (!%p4070_p6)
}
 0x57d   : > { %s4074_s2 = scalar_lea.hbm %s5670_s6, 512  ;;  %s4078_s20 = scalar_lea.hbm %s5876_s27, 2048 }
 0x57e   : > { %p4075_p8 = scmp.ne.s32.totalorder %s5670_s6, %s4074_s2  ;;  %p4079_p10 = scmp.lt.u32.totalorder %s5670_s6, %s5876_s27 }
 0x57f   : > { %p4080_p3 = scmp.lt.u32.totalorder %s4078_s20, %s4074_s2  ;;  %p4082_p5 = scmp.lt.u32.totalorder %s4074_s2, %s5670_s6 }
 0x580   : > { %p4076_p2 = pnand %p4075_p8, %p5877_p1 }
 0x581   : > { %p4081_p7 = por %p4080_p3, %p4079_p10 }
 0x582   : > { %p4077_p9 = pneg %p4076_p2 }
 0x583   : > { %p4083_p11 = por %p4082_p5, %p4081_p7 }
 0x585   : > { %p4084_p12 = pnand %p4083_p11, %p4077_p9 }
 0x587   : > { %4087 = shalt.err (!%p4084_p12)
}
 0x588   : > { %s4216_s26 = smov 128   ;;  %s4217_s8 = smov 8  }
 0x589   : > { %3278 = dma.vmem_to_hbm [thread:$0]  (%p5877_p1), %s5663_s24, 512, %s5670_s6, %s2681_s21, %s4216_s26, %s4216_s26, %s4217_s8  }
 0x58a PF: > { %s5878_s5 = sld [smem:[#allocation40_spill]]  ;;  %p3358_p13 = scmp.ge.s32.totalorder %s4190_s25, 2 }
 0x58b   : > { %p5879_p4 = scmp.ne.s32.totalorder %s5819_s16, 0 }
 0x58d   : > { %p3328_p0 = pnand %p3358_p13, %p5879_p4 }
 0x590   : > { %s2711_s29 = sand.u32 1, %s5878_s5  }
 0x591   : > { %s2712_s7 = scalar_lea.sflag [#allocation7], %s2711_s29 }
 0x592   : > { %4157 = dma.done.wait (!%p3328_p0), %s2712_s7, 512  }
 0x593   : > { %4159 = vsyncadd (!%p3328_p0), %s2712_s7, 4294966784  ;;  %s40_s25 = sadd.s32 1, %s4190_s25   ;;  %s5880_s18 = sld [smem:[#allocation41_spill]] }
 0x594   : > { %p37_p6 = scmp.ge.s32.totalorder %s40_s25, 6   ;;  %s5881_s19 = sld [smem:[#allocation42_spill]] }
 0x595   : > { %s5882_s22 = sld [smem:[#allocation45_spill]]  ;;  %s5883_s20 = smov %s5894_s15 }
 0x596   : > { %s5884_s21 = smov %s4182_s23  ;;  %s5885_s23 = smov %s5888_s28 }
 0x597   : > { %s5886_s24 = smov %s5892_s30  ;;  %39 = sbr.rel (!%p37_p6) target bundleno = 28 (0x1c), region = 199 }
 0x59e   :  { %2717 = vsyncpa [#allocation6], 1 }
 0x59f   :  { %2719 = vsyncpa [#allocation6 + $0x1], 1 }
 0x5a0   :  { %2720 = vsyncpa [#allocation9], 1 }
 0x5a1   :  { %2722 = vsyncpa [#allocation9 + $0x1], 1 }
 0x5a2   :  { %2723 = vsyncpa [#allocation12], 1 }
 0x5a3   :  { %2724 = vsyncpa [#allocation15], 1 }
 0x5a4   :  { %2725 = vsyncpa [#allocation18], 1 }
 0x5a5   :  { %2726 = vsyncpa [#allocation21], 1 }
 0x5a6   :  { %2727 = vsyncpa [#allocation24], 1 }
 0x5a7   :  { %2728 = vsyncpa [#allocation27], 1 }
 0x5a8   :  { %2729 = vsyncpa [#allocation7], 1 }
 0x5a9   :  { %2731 = vsyncpa [#allocation7 + $0x1], 1 }

</bundles_post_ra>
